<compile_context>
chip_gen: v7x
topology: tpu7x:2x2x1
jax: 0.10.0
libtpu: 0.0.40
codegen_flags: <defaults>
</compile_context>

<pallas_src>
import jax
import jax.numpy as jnp
from jax.experimental import pallas as pl
from jax.experimental.pallas import tpu as pltpu

# ---------------- configuration (faithful to the module) --------------------------
IMG = 32            # args.img_h
PATCH = 16          # patch_size
CHANNELS = 3        # ViT default channels
DIM = 64            # args.vit_dim
HEADS = 12          # heads
DIM_HEAD = 64       # lucidrains default dim_head
INNER = HEADS * DIM_HEAD          # 768
MLP_DIM = 2048      # mlp_dim
N_CLASS = 10        # n_class
EPS = 1e-5          # torch nn.LayerNorm default eps

N_PATCH = (IMG // PATCH) ** 2     # 4
SEQ = N_PATCH + 1                 # 5 (cls token)
SEQ_PAD = 8                       # padded tokens/image -> free 2D<->3D reshapes
PATCH_DIM = CHANNELS * PATCH * PATCH  # 768
SCALE = DIM_HEAD ** -0.5
HEAD_PAD = 128                    # classifier output padded to one full lane group
BLOCK_B = 32                      # images per grid step -> 256 MXU rows per matmul


# ------------------------------- helpers ------------------------------------------
def _layernorm(x, g, b):
    mu = jnp.mean(x, axis=-1, keepdims=True)
    var = jnp.mean((x - mu) ** 2, axis=-1, keepdims=True)
    return (x - mu) * jax.lax.rsqrt(var + EPS) * g + b


# ------------------------------ fused Pallas kernel --------------------------------
def fused_vit_kernel(
    xp_ref, addend_ref, bias_ref, w_pe_ref,
    ln1_g, ln1_b, w_qkv, w_o, b_o,
    ln2_g, ln2_b, w1, b1, w2, b2,
    lnf_g, lnf_b, w_head, b_head,
    out_ref, attn_scr,
):
    m = xp_ref.shape[0]                 # BLOCK_B * SEQ_PAD   (static python int)
    bb = m // SEQ_PAD

    # ---- patch embedding; `addend` folds embed bias, cls token and pos embedding ---
    tokens = (
        jnp.dot(xp_ref[...], w_pe_ref[...], preferred_element_type=jnp.float32)
        + addend_ref[...]
    )                                                            # (m, DIM)

    # ---------------- multi-head self attention (pre-norm) --------------------------
    h = _layernorm(tokens, ln1_g[...], ln1_b[...])
    qkv = jnp.dot(h, w_qkv[...], preferred_element_type=jnp.float32)  # (m, 3*INNER)
    key_bias = bias_ref[...].reshape(1, 1, SEQ_PAD)              # masks padded keys

    for hd in range(HEADS):             # static unroll; each head is image-batched
        lo = hd * DIM_HEAD
        q3 = qkv[:, lo:lo + DIM_HEAD].reshape(bb, SEQ_PAD, DIM_HEAD)
        k3 = qkv[:, INNER + lo:INNER + lo + DIM_HEAD].reshape(bb, SEQ_PAD, DIM_HEAD)
        v3 = qkv[:, 2 * INNER + lo:2 * INNER + lo + DIM_HEAD].reshape(
            bb, SEQ_PAD, DIM_HEAD)

        s = jnp.einsum('bqd,bkd->bqk', q3, k3,
                       preferred_element_type=jnp.float32) * SCALE
        s = s + key_bias                                         # (bb, 8, 8)
        s_max = jnp.max(s, axis=-1, keepdims=True)
        e = jnp.exp(s - s_max)
        p = e / jnp.sum(e, axis=-1, keepdims=True)               # softmax
        o3 = jnp.einsum('bqk,bkd->bqd', p, v3,
                        preferred_element_type=jnp.float32)      # (bb, 8, DIM_HEAD)
        attn_scr[:, lo:lo + DIM_HEAD] = o3.reshape(m, DIM_HEAD)

    attn = (jnp.dot(attn_scr[...], w_o[...], preferred_element_type=jnp.float32)
            + b_o[...])
    x = tokens + attn                                            # residual

    # ---------------- MLP (pre-norm) -------------------------------------------------
    h2 = _layernorm(x, ln2_g[...], ln2_b[...])
    h2 = jnp.dot(h2, w1[...], preferred_element_type=jnp.float32) + b1[...]
    # TODO(synk): torch nn.GELU defaults to the exact erf form; the tanh approximation
    # is used for robust Mosaic transcendental lowering (~1e-3 divergence).
    h2 = jax.nn.gelu(h2, approximate=True)
    h2 = jnp.dot(h2, w2[...], preferred_element_type=jnp.float32) + b2[...]
    x = x + h2                                                   # residual

    # ---------------- final LN + classifier head (on every row) ----------------------
    hf = _layernorm(x, lnf_g[...], lnf_b[...])
    out_ref[...] = (
        jnp.dot(hf, w_head[...], preferred_element_type=jnp.float32) + b_head[...]
    ).astype(out_ref.dtype)


# ------------------------------ wrappers --------------------------------------------
def _img_to_patches(x):
    # einops: 'b c (h p1) (w p2) -> b (h w) (p1 p2 c)'
    B, C, H, W = x.shape
    gh, gw = H // PATCH, W // PATCH
    x = x.reshape(B, C, gh, PATCH, gw, PATCH)
    x = x.transpose(0, 2, 4, 3, 5, 1)                  # b gh gw p1 p2 c
    return x.reshape(B, gh * gw, PATCH * PATCH * C)


def vit_forward(x, params):
    # x: [B, C, H, W] (NCHW, like PyTorch)
    B = x.shape[0]
    bb = min(BLOCK_B, B)
    b_pad = ((B + bb - 1) // bb) * bb
    m_blk = bb * SEQ_PAD

    patches = _img_to_patches(x).astype(jnp.float32)             # (B, N_PATCH, 768)
    if b_pad != B:
        patches = jnp.pad(patches, ((0, b_pad - B), (0, 0), (0, 0)))

    # padded per-image token slots: 0 = cls, 1..N_PATCH = patches, rest = dummy
    xp = jnp.zeros((b_pad, SEQ_PAD, PATCH_DIM), jnp.float32)
    xp = xp.at[:, 1:1 + N_PATCH, :].set(patches)
    xp = xp.reshape(b_pad * SEQ_PAD, PATCH_DIM)

    # per-slot additive term folding patch-embed bias, cls token and pos embedding
    pos = params["pos_emb"][0]                                   # (SEQ, DIM)
    addend = jnp.zeros((SEQ_PAD, DIM), jnp.float32)
    addend = addend.at[0].set(params["cls_token"][0, 0] + pos[0])
    addend = addend.at[1:1 + N_PATCH].set(params["b_pe"] + pos[1:])
    addend = jnp.tile(addend, (bb, 1))                           # (m_blk, DIM)

    key_bias = jnp.where(jnp.arange(SEQ_PAD) < SEQ, 0.0, -1e30)
    key_bias = key_bias.astype(jnp.float32).reshape(1, SEQ_PAD)

    w_head = jnp.zeros((DIM, HEAD_PAD), jnp.float32).at[:, :N_CLASS].set(params["w_head"])
    b_head = jnp.zeros((1, HEAD_PAD), jnp.float32).at[:, :N_CLASS].set(params["b_head"])

    full = lambda shape: pl.BlockSpec(shape, lambda i: (0,) * len(shape))
    grid = (b_pad // bb,)

    out = pl.pallas_call(
        fused_vit_kernel,
        grid=grid,
        in_specs=[
            pl.BlockSpec((m_blk, PATCH_DIM), lambda i: (i, 0)),  # padded patch rows
            full((m_blk, DIM)),                                  # addend
            full((1, SEQ_PAD)),                                  # key mask bias
            full((PATCH_DIM, DIM)),                              # w_pe
            full((1, DIM)), full((1, DIM)),                      # ln1 g, b
            full((DIM, 3 * INNER)),                              # w_qkv (no bias)
            full((INNER, DIM)), full((1, DIM)),                  # w_o, b_o
            full((1, DIM)), full((1, DIM)),                      # ln2 g, b
            full((DIM, MLP_DIM)), full((1, MLP_DIM)),            # w1, b1
            full((MLP_DIM, DIM)), full((1, DIM)),                # w2, b2
            full((1, DIM)), full((1, DIM)),                      # lnf g, b
            full((DIM, HEAD_PAD)), full((1, HEAD_PAD)),          # head (lane padded)
        ],
        out_specs=pl.BlockSpec((m_blk, HEAD_PAD), lambda i: (i, 0)),
        out_shape=jax.ShapeDtypeStruct((b_pad * SEQ_PAD, HEAD_PAD), jnp.float32),
        scratch_shapes=[pltpu.VMEM((m_blk, INNER), jnp.float32)],
        compiler_params=pltpu.CompilerParams(
            dimension_semantics=("parallel",),
            vmem_limit_bytes=48 * 1024 * 1024,
        ),
    )(
        xp, addend, key_bias, params["w_pe"],
        params["ln1_g"], params["ln1_b"], params["w_qkv"], params["w_o"], params["b_o"],
        params["ln2_g"], params["ln2_b"], params["w1"], params["b1"],
        params["w2"], params["b2"],
        params["lnf_g"], params["lnf_b"], w_head, b_head,
    )

    out = out.reshape(b_pad, SEQ_PAD, HEAD_PAD)
    return out[:B, 0, :N_CLASS]                                  # cls pooling


# ------------------------------ parameter init --------------------------------------
def init_params(key):
    ks = jax.random.split(key, 10)
    n = lambda k, shape, s=0.02: (s * jax.random.normal(k, shape)).astype(jnp.float32)
    z = lambda shape: jnp.zeros(shape, jnp.float32)
    o = lambda shape: jnp.ones(shape, jnp.float32)
    return {
        "w_pe": n(ks[0], (PATCH_DIM, DIM)),
        "b_pe": z((1, DIM)),
        "cls_token": n(ks[1], (1, 1, DIM)),
        "pos_emb": n(ks[2], (1, SEQ, DIM)),
        "ln1_g": o((1, DIM)), "ln1_b": z((1, DIM)),
        "w_qkv": n(ks[3], (DIM, 3 * INNER)),        # lucidrains: qkv has no bias
        "w_o": n(ks[4], (INNER, DIM)), "b_o": z((1, DIM)),
        "ln2_g": o((1, DIM)), "ln2_b": z((1, DIM)),
        "w1": n(ks[5], (DIM, MLP_DIM)), "b1": z((1, MLP_DIM)),
        "w2": n(ks[6], (MLP_DIM, DIM)), "b2": z((1, DIM)),
        "lnf_g": o((1, DIM)), "lnf_b": z((1, DIM)),
        "w_head": n(ks[7], (DIM, N_CLASS)), "b_head": z((1, N_CLASS)),
    }


if __name__ == "__main__":
    key = jax.random.PRNGKey(0)
    kx, kp = jax.random.split(key)
    x = jax.random.normal(kx, (2, CHANNELS, IMG, IMG), dtype=jnp.float32)
    params = init_params(kp)

    out = jax.jit(vit_forward)(x, params)
    out = jax.block_until_ready(out)
    assert out.shape == (2, N_CLASS) and out.dtype == jnp.float32
    print("KERNEL_OK")
</pallas_src>

<mosaic_0001>
module attributes {stable_mosaic.version = 11 : i64} {
  func.func @fused_vit_kernel(%arg0: i32, %arg1: memref<16x768xf32, #tpu.memory_space<vmem>>, %arg2: memref<16x64xf32, #tpu.memory_space<vmem>>, %arg3: memref<1x8xf32, #tpu.memory_space<vmem>>, %arg4: memref<768x64xf32, #tpu.memory_space<vmem>>, %arg5: memref<1x64xf32, #tpu.memory_space<vmem>>, %arg6: memref<1x64xf32, #tpu.memory_space<vmem>>, %arg7: memref<64x2304xf32, #tpu.memory_space<vmem>>, %arg8: memref<768x64xf32, #tpu.memory_space<vmem>>, %arg9: memref<1x64xf32, #tpu.memory_space<vmem>>, %arg10: memref<1x64xf32, #tpu.memory_space<vmem>>, %arg11: memref<1x64xf32, #tpu.memory_space<vmem>>, %arg12: memref<64x2048xf32, #tpu.memory_space<vmem>>, %arg13: memref<1x2048xf32, #tpu.memory_space<vmem>>, %arg14: memref<2048x64xf32, #tpu.memory_space<vmem>>, %arg15: memref<1x64xf32, #tpu.memory_space<vmem>>, %arg16: memref<1x64xf32, #tpu.memory_space<vmem>>, %arg17: memref<1x64xf32, #tpu.memory_space<vmem>>, %arg18: memref<64x128xf32, #tpu.memory_space<vmem>>, %arg19: memref<1x128xf32, #tpu.memory_space<vmem>>, %arg20: memref<16x128xf32, #tpu.memory_space<vmem>>, %arg21: memref<16x768xf32, #tpu.memory_space<vmem>>) attributes {dimension_semantics = [#tpu.dimension_semantics<parallel>], iteration_bounds = array<i64: 1>, scalar_prefetch = 0 : i64, scratch_operands = 1 : i64, tpu.core_type = #tpu.core_type<tc>, window_params = [{transform_indices = @transform_0, window_bounds = array<i64: 16, 768>}, {pipeline_mode = #tpu.pipeline_mode<synchronous>, transform_indices = @transform_1, window_bounds = array<i64: 16, 64>}, {pipeline_mode = #tpu.pipeline_mode<synchronous>, transform_indices = @transform_2, window_bounds = array<i64: 1, 8>}, {pipeline_mode = #tpu.pipeline_mode<synchronous>, transform_indices = @transform_3, window_bounds = array<i64: 768, 64>}, {pipeline_mode = #tpu.pipeline_mode<synchronous>, transform_indices = @transform_4, window_bounds = array<i64: 1, 64>}, {pipeline_mode = #tpu.pipeline_mode<synchronous>, transform_indices = @transform_5, window_bounds = array<i64: 1, 64>}, {pipeline_mode = #tpu.pipeline_mode<synchronous>, transform_indices = @transform_6, window_bounds = array<i64: 64, 2304>}, {pipeline_mode = #tpu.pipeline_mode<synchronous>, transform_indices = @transform_7, window_bounds = array<i64: 768, 64>}, {pipeline_mode = #tpu.pipeline_mode<synchronous>, transform_indices = @transform_8, window_bounds = array<i64: 1, 64>}, {pipeline_mode = #tpu.pipeline_mode<synchronous>, transform_indices = @transform_9, window_bounds = array<i64: 1, 64>}, {pipeline_mode = #tpu.pipeline_mode<synchronous>, transform_indices = @transform_10, window_bounds = array<i64: 1, 64>}, {pipeline_mode = #tpu.pipeline_mode<synchronous>, transform_indices = @transform_11, window_bounds = array<i64: 64, 2048>}, {pipeline_mode = #tpu.pipeline_mode<synchronous>, transform_indices = @transform_12, window_bounds = array<i64: 1, 2048>}, {pipeline_mode = #tpu.pipeline_mode<synchronous>, transform_indices = @transform_13, window_bounds = array<i64: 2048, 64>}, {pipeline_mode = #tpu.pipeline_mode<synchronous>, transform_indices = @transform_14, window_bounds = array<i64: 1, 64>}, {pipeline_mode = #tpu.pipeline_mode<synchronous>, transform_indices = @transform_15, window_bounds = array<i64: 1, 64>}, {pipeline_mode = #tpu.pipeline_mode<synchronous>, transform_indices = @transform_16, window_bounds = array<i64: 1, 64>}, {pipeline_mode = #tpu.pipeline_mode<synchronous>, transform_indices = @transform_17, window_bounds = array<i64: 64, 128>}, {pipeline_mode = #tpu.pipeline_mode<synchronous>, transform_indices = @transform_18, window_bounds = array<i64: 1, 128>}, {transform_indices = @transform_19, window_bounds = array<i64: 16, 128>}]} {
    %c0 = arith.constant 0 : index
    %c0_0 = arith.constant 0 : index
    %0 = vector.load %arg1[%c0, %c0_0] : memref<16x768xf32, #tpu.memory_space<vmem>>, vector<16x768xf32>
    %c0_1 = arith.constant 0 : index
    %c0_2 = arith.constant 0 : index
    %1 = vector.load %arg4[%c0_1, %c0_2] : memref<768x64xf32, #tpu.memory_space<vmem>>, vector<768x64xf32>
    %cst = arith.constant dense<0.000000e+00> : vector<16x64xf32>
    %2 = tpu.matmul %0, %1, %cst {dimension_numbers = #tpu.dot_dimension_numbers<[1], [0], [0], [1], [0, 0, 1, 1], [], []>} : vector<16x768xf32>, vector<768x64xf32>, vector<16x64xf32> -> vector<16x64xf32>
    %c0_3 = arith.constant 0 : index
    %c0_4 = arith.constant 0 : index
    %3 = vector.load %arg2[%c0_3, %c0_4] : memref<16x64xf32, #tpu.memory_space<vmem>>, vector<16x64xf32>
    %4 = arith.addf %2, %3 : vector<16x64xf32>
    %c0_5 = arith.constant 0 : index
    %c0_6 = arith.constant 0 : index
    %5 = vector.load %arg5[%c0_5, %c0_6] : memref<1x64xf32, #tpu.memory_space<vmem>>, vector<1x64xf32>
    %c0_7 = arith.constant 0 : index
    %c0_8 = arith.constant 0 : index
    %6 = vector.load %arg6[%c0_7, %c0_8] : memref<1x64xf32, #tpu.memory_space<vmem>>, vector<1x64xf32>
    %cst_9 = arith.constant dense<0.000000e+00> : vector<16xf32>
    %7 = vector.multi_reduction <add>, %4, %cst_9 [1] : vector<16x64xf32> to vector<16xf32>
    %8 = vector.shape_cast %7 : vector<16xf32> to vector<16x1xf32>
    %cst_10 = arith.constant 6.400000e+01 : f32
    %9 = vector.broadcast %cst_10 : f32 to vector<16x1xf32>
    %10 = arith.divf %8, %9 : vector<16x1xf32>
    %11 = vector.broadcast %10 : vector<16x1xf32> to vector<16x64xf32>
    %12 = arith.subf %4, %11 : vector<16x64xf32>
    %13 = arith.mulf %12, %12 : vector<16x64xf32>
    %cst_11 = arith.constant dense<0.000000e+00> : vector<16xf32>
    %14 = vector.multi_reduction <add>, %13, %cst_11 [1] : vector<16x64xf32> to vector<16xf32>
    %15 = vector.shape_cast %14 : vector<16xf32> to vector<16x1xf32>
    %cst_12 = arith.constant 6.400000e+01 : f32
    %16 = vector.broadcast %cst_12 : f32 to vector<16x1xf32>
    %17 = arith.divf %15, %16 : vector<16x1xf32>
    %18 = vector.broadcast %10 : vector<16x1xf32> to vector<16x64xf32>
    %19 = arith.subf %4, %18 : vector<16x64xf32>
    %cst_13 = arith.constant 9.99999974E-6 : f32
    %20 = vector.broadcast %cst_13 : f32 to vector<16x1xf32>
    %21 = arith.addf %17, %20 : vector<16x1xf32>
    %22 = math.rsqrt %21 : vector<16x1xf32>
    %23 = vector.broadcast %22 : vector<16x1xf32> to vector<16x64xf32>
    %24 = arith.mulf %19, %23 : vector<16x64xf32>
    %25 = vector.broadcast %5 : vector<1x64xf32> to vector<16x64xf32>
    %26 = arith.mulf %24, %25 : vector<16x64xf32>
    %27 = vector.broadcast %6 : vector<1x64xf32> to vector<16x64xf32>
    %28 = arith.addf %26, %27 : vector<16x64xf32>
    %c0_14 = arith.constant 0 : index
    %c0_15 = arith.constant 0 : index
    %29 = vector.load %arg7[%c0_14, %c0_15] : memref<64x2304xf32, #tpu.memory_space<vmem>>, vector<64x2304xf32>
    %cst_16 = arith.constant dense<0.000000e+00> : vector<16x2304xf32>
    %30 = tpu.matmul %28, %29, %cst_16 {dimension_numbers = #tpu.dot_dimension_numbers<[1], [0], [0], [1], [0, 0, 1, 1], [], []>} : vector<16x64xf32>, vector<64x2304xf32>, vector<16x2304xf32> -> vector<16x2304xf32>
    %c0_17 = arith.constant 0 : index
    %c0_18 = arith.constant 0 : index
    %31 = vector.load %arg3[%c0_17, %c0_18] : memref<1x8xf32, #tpu.memory_space<vmem>>, vector<1x8xf32>
    %32 = vector.shape_cast %31 : vector<1x8xf32> to vector<1x1x8xf32>
    %33 = vector.extract_strided_slice %30 {offsets = [0, 0], sizes = [16, 64], strides = [1, 1]} : vector<16x2304xf32> to vector<16x64xf32>
    %34 = vector.shape_cast %33 : vector<16x64xf32> to vector<2x8x64xf32>
    %35 = vector.extract_strided_slice %30 {offsets = [0, 768], sizes = [16, 64], strides = [1, 1]} : vector<16x2304xf32> to vector<16x64xf32>
    %36 = vector.shape_cast %35 : vector<16x64xf32> to vector<2x8x64xf32>
    %37 = vector.extract_strided_slice %30 {offsets = [0, 1536], sizes = [16, 64], strides = [1, 1]} : vector<16x2304xf32> to vector<16x64xf32>
    %38 = vector.shape_cast %37 : vector<16x64xf32> to vector<2x8x64xf32>
    "tpu.trace_start"() <{level = 10 : i32, message = "bqd,bkd->bqk"}> : () -> ()
    %cst_19 = arith.constant dense<0.000000e+00> : vector<2x8x8xf32>
    %39 = tpu.matmul %34, %36, %cst_19 {dimension_numbers = #tpu.dot_dimension_numbers<[2], [2], [1], [1], [0, 0, 0, 1, 1, 1], [0], [0]>} : vector<2x8x64xf32>, vector<2x8x64xf32>, vector<2x8x8xf32> -> vector<2x8x8xf32>
    "tpu.trace_stop"() : () -> ()
    %cst_20 = arith.constant 1.250000e-01 : f32
    %40 = vector.broadcast %cst_20 : f32 to vector<2x8x8xf32>
    %41 = arith.mulf %39, %40 : vector<2x8x8xf32>
    %42 = vector.broadcast %32 : vector<1x1x8xf32> to vector<2x8x8xf32>
    %43 = arith.addf %41, %42 : vector<2x8x8xf32>
    %cst_21 = arith.constant dense<0xFF800000> : vector<2x8xf32>
    %44 = vector.multi_reduction <maximumf>, %43, %cst_21 [2] : vector<2x8x8xf32> to vector<2x8xf32>
    %45 = vector.shape_cast %44 : vector<2x8xf32> to vector<2x8x1xf32>
    %46 = vector.broadcast %45 : vector<2x8x1xf32> to vector<2x8x8xf32>
    %47 = arith.subf %43, %46 : vector<2x8x8xf32>
    %48 = math.exp %47 : vector<2x8x8xf32>
    %cst_22 = arith.constant dense<0.000000e+00> : vector<2x8xf32>
    %49 = vector.multi_reduction <add>, %48, %cst_22 [2] : vector<2x8x8xf32> to vector<2x8xf32>
    %50 = vector.shape_cast %49 : vector<2x8xf32> to vector<2x8x1xf32>
    %51 = vector.broadcast %50 : vector<2x8x1xf32> to vector<2x8x8xf32>
    %52 = arith.divf %48, %51 : vector<2x8x8xf32>
    "tpu.trace_start"() <{level = 10 : i32, message = "bqk,bkd->bqd"}> : () -> ()
    %cst_23 = arith.constant dense<0.000000e+00> : vector<2x8x64xf32>
    %53 = tpu.matmul %52, %38, %cst_23 {dimension_numbers = #tpu.dot_dimension_numbers<[2], [1], [1], [2], [0, 0, 0, 1, 1, 2], [0], [0]>} : vector<2x8x8xf32>, vector<2x8x64xf32>, vector<2x8x64xf32> -> vector<2x8x64xf32>
    "tpu.trace_stop"() : () -> ()
    %54 = vector.shape_cast %53 : vector<2x8x64xf32> to vector<16x64xf32>
    %c0_24 = arith.constant 0 : index
    %c0_25 = arith.constant 0 : index
    %55 = vector.load %arg21[%c0_24, %c0_25] : memref<16x768xf32, #tpu.memory_space<vmem>>, vector<16x64xf32>
    tpu.vector_store %arg21[%c0_24, %c0_25], %54 {strides = array<i32>} : memref<16x768xf32, #tpu.memory_space<vmem>>, vector<16x64xf32>,
    %56 = vector.extract_strided_slice %30 {offsets = [0, 64], sizes = [16, 64], strides = [1, 1]} : vector<16x2304xf32> to vector<16x64xf32>
    %57 = vector.shape_cast %56 : vector<16x64xf32> to vector<2x8x64xf32>
    %58 = vector.extract_strided_slice %30 {offsets = [0, 832], sizes = [16, 64], strides = [1, 1]} : vector<16x2304xf32> to vector<16x64xf32>
    %59 = vector.shape_cast %58 : vector<16x64xf32> to vector<2x8x64xf32>
    %60 = vector.extract_strided_slice %30 {offsets = [0, 1600], sizes = [16, 64], strides = [1, 1]} : vector<16x2304xf32> to vector<16x64xf32>
    %61 = vector.shape_cast %60 : vector<16x64xf32> to vector<2x8x64xf32>
    "tpu.trace_start"() <{level = 10 : i32, message = "bqd,bkd->bqk"}> : () -> ()
    %cst_26 = arith.constant dense<0.000000e+00> : vector<2x8x8xf32>
    %62 = tpu.matmul %57, %59, %cst_26 {dimension_numbers = #tpu.dot_dimension_numbers<[2], [2], [1], [1], [0, 0, 0, 1, 1, 1], [0], [0]>} : vector<2x8x64xf32>, vector<2x8x64xf32>, vector<2x8x8xf32> -> vector<2x8x8xf32>
    "tpu.trace_stop"() : () -> ()
    %cst_27 = arith.constant 1.250000e-01 : f32
    %63 = vector.broadcast %cst_27 : f32 to vector<2x8x8xf32>
    %64 = arith.mulf %62, %63 : vector<2x8x8xf32>
    %65 = vector.broadcast %32 : vector<1x1x8xf32> to vector<2x8x8xf32>
    %66 = arith.addf %64, %65 : vector<2x8x8xf32>
    %cst_28 = arith.constant dense<0xFF800000> : vector<2x8xf32>
    %67 = vector.multi_reduction <maximumf>, %66, %cst_28 [2] : vector<2x8x8xf32> to vector<2x8xf32>
    %68 = vector.shape_cast %67 : vector<2x8xf32> to vector<2x8x1xf32>
    %69 = vector.broadcast %68 : vector<2x8x1xf32> to vector<2x8x8xf32>
    %70 = arith.subf %66, %69 : vector<2x8x8xf32>
    %71 = math.exp %70 : vector<2x8x8xf32>
    %cst_29 = arith.constant dense<0.000000e+00> : vector<2x8xf32>
    %72 = vector.multi_reduction <add>, %71, %cst_29 [2] : vector<2x8x8xf32> to vector<2x8xf32>
    %73 = vector.shape_cast %72 : vector<2x8xf32> to vector<2x8x1xf32>
    %74 = vector.broadcast %73 : vector<2x8x1xf32> to vector<2x8x8xf32>
    %75 = arith.divf %71, %74 : vector<2x8x8xf32>
    "tpu.trace_start"() <{level = 10 : i32, message = "bqk,bkd->bqd"}> : () -> ()
    %cst_30 = arith.constant dense<0.000000e+00> : vector<2x8x64xf32>
    %76 = tpu.matmul %75, %61, %cst_30 {dimension_numbers = #tpu.dot_dimension_numbers<[2], [1], [1], [2], [0, 0, 0, 1, 1, 2], [0], [0]>} : vector<2x8x8xf32>, vector<2x8x64xf32>, vector<2x8x64xf32> -> vector<2x8x64xf32>
    "tpu.trace_stop"() : () -> ()
    %77 = vector.shape_cast %76 : vector<2x8x64xf32> to vector<16x64xf32>
    %c0_31 = arith.constant 0 : index
    %c64 = arith.constant 64 : index
    %78 = vector.load %arg21[%c0_31, %c64] : memref<16x768xf32, #tpu.memory_space<vmem>>, vector<16x64xf32>
    tpu.vector_store %arg21[%c0_31, %c64], %77 {strides = array<i32>} : memref<16x768xf32, #tpu.memory_space<vmem>>, vector<16x64xf32>,
    %79 = vector.extract_strided_slice %30 {offsets = [0, 128], sizes = [16, 64], strides = [1, 1]} : vector<16x2304xf32> to vector<16x64xf32>
    %80 = vector.shape_cast %79 : vector<16x64xf32> to vector<2x8x64xf32>
    %81 = vector.extract_strided_slice %30 {offsets = [0, 896], sizes = [16, 64], strides = [1, 1]} : vector<16x2304xf32> to vector<16x64xf32>
    %82 = vector.shape_cast %81 : vector<16x64xf32> to vector<2x8x64xf32>
    %83 = vector.extract_strided_slice %30 {offsets = [0, 1664], sizes = [16, 64], strides = [1, 1]} : vector<16x2304xf32> to vector<16x64xf32>
    %84 = vector.shape_cast %83 : vector<16x64xf32> to vector<2x8x64xf32>
    "tpu.trace_start"() <{level = 10 : i32, message = "bqd,bkd->bqk"}> : () -> ()
    %cst_32 = arith.constant dense<0.000000e+00> : vector<2x8x8xf32>
    %85 = tpu.matmul %80, %82, %cst_32 {dimension_numbers = #tpu.dot_dimension_numbers<[2], [2], [1], [1], [0, 0, 0, 1, 1, 1], [0], [0]>} : vector<2x8x64xf32>, vector<2x8x64xf32>, vector<2x8x8xf32> -> vector<2x8x8xf32>
    "tpu.trace_stop"() : () -> ()
    %cst_33 = arith.constant 1.250000e-01 : f32
    %86 = vector.broadcast %cst_33 : f32 to vector<2x8x8xf32>
    %87 = arith.mulf %85, %86 : vector<2x8x8xf32>
    %88 = vector.broadcast %32 : vector<1x1x8xf32> to vector<2x8x8xf32>
    %89 = arith.addf %87, %88 : vector<2x8x8xf32>
    %cst_34 = arith.constant dense<0xFF800000> : vector<2x8xf32>
    %90 = vector.multi_reduction <maximumf>, %89, %cst_34 [2] : vector<2x8x8xf32> to vector<2x8xf32>
    %91 = vector.shape_cast %90 : vector<2x8xf32> to vector<2x8x1xf32>
    %92 = vector.broadcast %91 : vector<2x8x1xf32> to vector<2x8x8xf32>
    %93 = arith.subf %89, %92 : vector<2x8x8xf32>
    %94 = math.exp %93 : vector<2x8x8xf32>
    %cst_35 = arith.constant dense<0.000000e+00> : vector<2x8xf32>
    %95 = vector.multi_reduction <add>, %94, %cst_35 [2] : vector<2x8x8xf32> to vector<2x8xf32>
    %96 = vector.shape_cast %95 : vector<2x8xf32> to vector<2x8x1xf32>
    %97 = vector.broadcast %96 : vector<2x8x1xf32> to vector<2x8x8xf32>
    %98 = arith.divf %94, %97 : vector<2x8x8xf32>
    "tpu.trace_start"() <{level = 10 : i32, message = "bqk,bkd->bqd"}> : () -> ()
    %cst_36 = arith.constant dense<0.000000e+00> : vector<2x8x64xf32>
    %99 = tpu.matmul %98, %84, %cst_36 {dimension_numbers = #tpu.dot_dimension_numbers<[2], [1], [1], [2], [0, 0, 0, 1, 1, 2], [0], [0]>} : vector<2x8x8xf32>, vector<2x8x64xf32>, vector<2x8x64xf32> -> vector<2x8x64xf32>
    "tpu.trace_stop"() : () -> ()
    %100 = vector.shape_cast %99 : vector<2x8x64xf32> to vector<16x64xf32>
    %c0_37 = arith.constant 0 : index
    %c128 = arith.constant 128 : index
    %101 = vector.load %arg21[%c0_37, %c128] : memref<16x768xf32, #tpu.memory_space<vmem>>, vector<16x64xf32>
    tpu.vector_store %arg21[%c0_37, %c128], %100 {strides = array<i32>} : memref<16x768xf32, #tpu.memory_space<vmem>>, vector<16x64xf32>,
    %102 = vector.extract_strided_slice %30 {offsets = [0, 192], sizes = [16, 64], strides = [1, 1]} : vector<16x2304xf32> to vector<16x64xf32>
    %103 = vector.shape_cast %102 : vector<16x64xf32> to vector<2x8x64xf32>
    %104 = vector.extract_strided_slice %30 {offsets = [0, 960], sizes = [16, 64], strides = [1, 1]} : vector<16x2304xf32> to vector<16x64xf32>
    %105 = vector.shape_cast %104 : vector<16x64xf32> to vector<2x8x64xf32>
    %106 = vector.extract_strided_slice %30 {offsets = [0, 1728], sizes = [16, 64], strides = [1, 1]} : vector<16x2304xf32> to vector<16x64xf32>
    %107 = vector.shape_cast %106 : vector<16x64xf32> to vector<2x8x64xf32>
    "tpu.trace_start"() <{level = 10 : i32, message = "bqd,bkd->bqk"}> : () -> ()
    %cst_38 = arith.constant dense<0.000000e+00> : vector<2x8x8xf32>
    %108 = tpu.matmul %103, %105, %cst_38 {dimension_numbers = #tpu.dot_dimension_numbers<[2], [2], [1], [1], [0, 0, 0, 1, 1, 1], [0], [0]>} : vector<2x8x64xf32>, vector<2x8x64xf32>, vector<2x8x8xf32> -> vector<2x8x8xf32>
    "tpu.trace_stop"() : () -> ()
    %cst_39 = arith.constant 1.250000e-01 : f32
    %109 = vector.broadcast %cst_39 : f32 to vector<2x8x8xf32>
    %110 = arith.mulf %108, %109 : vector<2x8x8xf32>
    %111 = vector.broadcast %32 : vector<1x1x8xf32> to vector<2x8x8xf32>
    %112 = arith.addf %110, %111 : vector<2x8x8xf32>
    %cst_40 = arith.constant dense<0xFF800000> : vector<2x8xf32>
    %113 = vector.multi_reduction <maximumf>, %112, %cst_40 [2] : vector<2x8x8xf32> to vector<2x8xf32>
    %114 = vector.shape_cast %113 : vector<2x8xf32> to vector<2x8x1xf32>
    %115 = vector.broadcast %114 : vector<2x8x1xf32> to vector<2x8x8xf32>
    %116 = arith.subf %112, %115 : vector<2x8x8xf32>
    %117 = math.exp %116 : vector<2x8x8xf32>
    %cst_41 = arith.constant dense<0.000000e+00> : vector<2x8xf32>
    %118 = vector.multi_reduction <add>, %117, %cst_41 [2] : vector<2x8x8xf32> to vector<2x8xf32>
    %119 = vector.shape_cast %118 : vector<2x8xf32> to vector<2x8x1xf32>
    %120 = vector.broadcast %119 : vector<2x8x1xf32> to vector<2x8x8xf32>
    %121 = arith.divf %117, %120 : vector<2x8x8xf32>
    "tpu.trace_start"() <{level = 10 : i32, message = "bqk,bkd->bqd"}> : () -> ()
    %cst_42 = arith.constant dense<0.000000e+00> : vector<2x8x64xf32>
    %122 = tpu.matmul %121, %107, %cst_42 {dimension_numbers = #tpu.dot_dimension_numbers<[2], [1], [1], [2], [0, 0, 0, 1, 1, 2], [0], [0]>} : vector<2x8x8xf32>, vector<2x8x64xf32>, vector<2x8x64xf32> -> vector<2x8x64xf32>
    "tpu.trace_stop"() : () -> ()
    %123 = vector.shape_cast %122 : vector<2x8x64xf32> to vector<16x64xf32>
    %c0_43 = arith.constant 0 : index
    %c192 = arith.constant 192 : index
    %124 = vector.load %arg21[%c0_43, %c192] : memref<16x768xf32, #tpu.memory_space<vmem>>, vector<16x64xf32>
    tpu.vector_store %arg21[%c0_43, %c192], %123 {strides = array<i32>} : memref<16x768xf32, #tpu.memory_space<vmem>>, vector<16x64xf32>,
    %125 = vector.extract_strided_slice %30 {offsets = [0, 256], sizes = [16, 64], strides = [1, 1]} : vector<16x2304xf32> to vector<16x64xf32>
    %126 = vector.shape_cast %125 : vector<16x64xf32> to vector<2x8x64xf32>
    %127 = vector.extract_strided_slice %30 {offsets = [0, 1024], sizes = [16, 64], strides = [1, 1]} : vector<16x2304xf32> to vector<16x64xf32>
    %128 = vector.shape_cast %127 : vector<16x64xf32> to vector<2x8x64xf32>
    %129 = vector.extract_strided_slice %30 {offsets = [0, 1792], sizes = [16, 64], strides = [1, 1]} : vector<16x2304xf32> to vector<16x64xf32>
    %130 = vector.shape_cast %129 : vector<16x64xf32> to vector<2x8x64xf32>
    "tpu.trace_start"() <{level = 10 : i32, message = "bqd,bkd->bqk"}> : () -> ()
    %cst_44 = arith.constant dense<0.000000e+00> : vector<2x8x8xf32>
    %131 = tpu.matmul %126, %128, %cst_44 {dimension_numbers = #tpu.dot_dimension_numbers<[2], [2], [1], [1], [0, 0, 0, 1, 1, 1], [0], [0]>} : vector<2x8x64xf32>, vector<2x8x64xf32>, vector<2x8x8xf32> -> vector<2x8x8xf32>
    "tpu.trace_stop"() : () -> ()
    %cst_45 = arith.constant 1.250000e-01 : f32
    %132 = vector.broadcast %cst_45 : f32 to vector<2x8x8xf32>
    %133 = arith.mulf %131, %132 : vector<2x8x8xf32>
    %134 = vector.broadcast %32 : vector<1x1x8xf32> to vector<2x8x8xf32>
    %135 = arith.addf %133, %134 : vector<2x8x8xf32>
    %cst_46 = arith.constant dense<0xFF800000> : vector<2x8xf32>
    %136 = vector.multi_reduction <maximumf>, %135, %cst_46 [2] : vector<2x8x8xf32> to vector<2x8xf32>
    %137 = vector.shape_cast %136 : vector<2x8xf32> to vector<2x8x1xf32>
    %138 = vector.broadcast %137 : vector<2x8x1xf32> to vector<2x8x8xf32>
    %139 = arith.subf %135, %138 : vector<2x8x8xf32>
    %140 = math.exp %139 : vector<2x8x8xf32>
    %cst_47 = arith.constant dense<0.000000e+00> : vector<2x8xf32>
    %141 = vector.multi_reduction <add>, %140, %cst_47 [2] : vector<2x8x8xf32> to vector<2x8xf32>
    %142 = vector.shape_cast %141 : vector<2x8xf32> to vector<2x8x1xf32>
    %143 = vector.broadcast %142 : vector<2x8x1xf32> to vector<2x8x8xf32>
    %144 = arith.divf %140, %143 : vector<2x8x8xf32>
    "tpu.trace_start"() <{level = 10 : i32, message = "bqk,bkd->bqd"}> : () -> ()
    %cst_48 = arith.constant dense<0.000000e+00> : vector<2x8x64xf32>
    %145 = tpu.matmul %144, %130, %cst_48 {dimension_numbers = #tpu.dot_dimension_numbers<[2], [1], [1], [2], [0, 0, 0, 1, 1, 2], [0], [0]>} : vector<2x8x8xf32>, vector<2x8x64xf32>, vector<2x8x64xf32> -> vector<2x8x64xf32>
    "tpu.trace_stop"() : () -> ()
    %146 = vector.shape_cast %145 : vector<2x8x64xf32> to vector<16x64xf32>
    %c0_49 = arith.constant 0 : index
    %c256 = arith.constant 256 : index
    %147 = vector.load %arg21[%c0_49, %c256] : memref<16x768xf32, #tpu.memory_space<vmem>>, vector<16x64xf32>
    tpu.vector_store %arg21[%c0_49, %c256], %146 {strides = array<i32>} : memref<16x768xf32, #tpu.memory_space<vmem>>, vector<16x64xf32>,
    %148 = vector.extract_strided_slice %30 {offsets = [0, 320], sizes = [16, 64], strides = [1, 1]} : vector<16x2304xf32> to vector<16x64xf32>
    %149 = vector.shape_cast %148 : vector<16x64xf32> to vector<2x8x64xf32>
    %150 = vector.extract_strided_slice %30 {offsets = [0, 1088], sizes = [16, 64], strides = [1, 1]} : vector<16x2304xf32> to vector<16x64xf32>
    %151 = vector.shape_cast %150 : vector<16x64xf32> to vector<2x8x64xf32>
    %152 = vector.extract_strided_slice %30 {offsets = [0, 1856], sizes = [16, 64], strides = [1, 1]} : vector<16x2304xf32> to vector<16x64xf32>
    %153 = vector.shape_cast %152 : vector<16x64xf32> to vector<2x8x64xf32>
    "tpu.trace_start"() <{level = 10 : i32, message = "bqd,bkd->bqk"}> : () -> ()
    %cst_50 = arith.constant dense<0.000000e+00> : vector<2x8x8xf32>
    %154 = tpu.matmul %149, %151, %cst_50 {dimension_numbers = #tpu.dot_dimension_numbers<[2], [2], [1], [1], [0, 0, 0, 1, 1, 1], [0], [0]>} : vector<2x8x64xf32>, vector<2x8x64xf32>, vector<2x8x8xf32> -> vector<2x8x8xf32>
    "tpu.trace_stop"() : () -> ()
    %cst_51 = arith.constant 1.250000e-01 : f32
    %155 = vector.broadcast %cst_51 : f32 to vector<2x8x8xf32>
    %156 = arith.mulf %154, %155 : vector<2x8x8xf32>
    %157 = vector.broadcast %32 : vector<1x1x8xf32> to vector<2x8x8xf32>
    %158 = arith.addf %156, %157 : vector<2x8x8xf32>
    %cst_52 = arith.constant dense<0xFF800000> : vector<2x8xf32>
    %159 = vector.multi_reduction <maximumf>, %158, %cst_52 [2] : vector<2x8x8xf32> to vector<2x8xf32>
    %160 = vector.shape_cast %159 : vector<2x8xf32> to vector<2x8x1xf32>
    %161 = vector.broadcast %160 : vector<2x8x1xf32> to vector<2x8x8xf32>
    %162 = arith.subf %158, %161 : vector<2x8x8xf32>
    %163 = math.exp %162 : vector<2x8x8xf32>
    %cst_53 = arith.constant dense<0.000000e+00> : vector<2x8xf32>
    %164 = vector.multi_reduction <add>, %163, %cst_53 [2] : vector<2x8x8xf32> to vector<2x8xf32>
    %165 = vector.shape_cast %164 : vector<2x8xf32> to vector<2x8x1xf32>
    %166 = vector.broadcast %165 : vector<2x8x1xf32> to vector<2x8x8xf32>
    %167 = arith.divf %163, %166 : vector<2x8x8xf32>
    "tpu.trace_start"() <{level = 10 : i32, message = "bqk,bkd->bqd"}> : () -> ()
    %cst_54 = arith.constant dense<0.000000e+00> : vector<2x8x64xf32>
    %168 = tpu.matmul %167, %153, %cst_54 {dimension_numbers = #tpu.dot_dimension_numbers<[2], [1], [1], [2], [0, 0, 0, 1, 1, 2], [0], [0]>} : vector<2x8x8xf32>, vector<2x8x64xf32>, vector<2x8x64xf32> -> vector<2x8x64xf32>
    "tpu.trace_stop"() : () -> ()
    %169 = vector.shape_cast %168 : vector<2x8x64xf32> to vector<16x64xf32>
    %c0_55 = arith.constant 0 : index
    %c320 = arith.constant 320 : index
    %170 = vector.load %arg21[%c0_55, %c320] : memref<16x768xf32, #tpu.memory_space<vmem>>, vector<16x64xf32>
    tpu.vector_store %arg21[%c0_55, %c320], %169 {strides = array<i32>} : memref<16x768xf32, #tpu.memory_space<vmem>>, vector<16x64xf32>,
    %171 = vector.extract_strided_slice %30 {offsets = [0, 384], sizes = [16, 64], strides = [1, 1]} : vector<16x2304xf32> to vector<16x64xf32>
    %172 = vector.shape_cast %171 : vector<16x64xf32> to vector<2x8x64xf32>
    %173 = vector.extract_strided_slice %30 {offsets = [0, 1152], sizes = [16, 64], strides = [1, 1]} : vector<16x2304xf32> to vector<16x64xf32>
    %174 = vector.shape_cast %173 : vector<16x64xf32> to vector<2x8x64xf32>
    %175 = vector.extract_strided_slice %30 {offsets = [0, 1920], sizes = [16, 64], strides = [1, 1]} : vector<16x2304xf32> to vector<16x64xf32>
    %176 = vector.shape_cast %175 : vector<16x64xf32> to vector<2x8x64xf32>
    "tpu.trace_start"() <{level = 10 : i32, message = "bqd,bkd->bqk"}> : () -> ()
    %cst_56 = arith.constant dense<0.000000e+00> : vector<2x8x8xf32>
    %177 = tpu.matmul %172, %174, %cst_56 {dimension_numbers = #tpu.dot_dimension_numbers<[2], [2], [1], [1], [0, 0, 0, 1, 1, 1], [0], [0]>} : vector<2x8x64xf32>, vector<2x8x64xf32>, vector<2x8x8xf32> -> vector<2x8x8xf32>
    "tpu.trace_stop"() : () -> ()
    %cst_57 = arith.constant 1.250000e-01 : f32
    %178 = vector.broadcast %cst_57 : f32 to vector<2x8x8xf32>
    %179 = arith.mulf %177, %178 : vector<2x8x8xf32>
    %180 = vector.broadcast %32 : vector<1x1x8xf32> to vector<2x8x8xf32>
    %181 = arith.addf %179, %180 : vector<2x8x8xf32>
    %cst_58 = arith.constant dense<0xFF800000> : vector<2x8xf32>
    %182 = vector.multi_reduction <maximumf>, %181, %cst_58 [2] : vector<2x8x8xf32> to vector<2x8xf32>
    %183 = vector.shape_cast %182 : vector<2x8xf32> to vector<2x8x1xf32>
    %184 = vector.broadcast %183 : vector<2x8x1xf32> to vector<2x8x8xf32>
    %185 = arith.subf %181, %184 : vector<2x8x8xf32>
    %186 = math.exp %185 : vector<2x8x8xf32>
    %cst_59 = arith.constant dense<0.000000e+00> : vector<2x8xf32>
    %187 = vector.multi_reduction <add>, %186, %cst_59 [2] : vector<2x8x8xf32> to vector<2x8xf32>
    %188 = vector.shape_cast %187 : vector<2x8xf32> to vector<2x8x1xf32>
    %189 = vector.broadcast %188 : vector<2x8x1xf32> to vector<2x8x8xf32>
    %190 = arith.divf %186, %189 : vector<2x8x8xf32>
    "tpu.trace_start"() <{level = 10 : i32, message = "bqk,bkd->bqd"}> : () -> ()
    %cst_60 = arith.constant dense<0.000000e+00> : vector<2x8x64xf32>
    %191 = tpu.matmul %190, %176, %cst_60 {dimension_numbers = #tpu.dot_dimension_numbers<[2], [1], [1], [2], [0, 0, 0, 1, 1, 2], [0], [0]>} : vector<2x8x8xf32>, vector<2x8x64xf32>, vector<2x8x64xf32> -> vector<2x8x64xf32>
    "tpu.trace_stop"() : () -> ()
    %192 = vector.shape_cast %191 : vector<2x8x64xf32> to vector<16x64xf32>
    %c0_61 = arith.constant 0 : index
    %c384 = arith.constant 384 : index
    %193 = vector.load %arg21[%c0_61, %c384] : memref<16x768xf32, #tpu.memory_space<vmem>>, vector<16x64xf32>
    tpu.vector_store %arg21[%c0_61, %c384], %192 {strides = array<i32>} : memref<16x768xf32, #tpu.memory_space<vmem>>, vector<16x64xf32>,
    %194 = vector.extract_strided_slice %30 {offsets = [0, 448], sizes = [16, 64], strides = [1, 1]} : vector<16x2304xf32> to vector<16x64xf32>
    %195 = vector.shape_cast %194 : vector<16x64xf32> to vector<2x8x64xf32>
    %196 = vector.extract_strided_slice %30 {offsets = [0, 1216], sizes = [16, 64], strides = [1, 1]} : vector<16x2304xf32> to vector<16x64xf32>
    %197 = vector.shape_cast %196 : vector<16x64xf32> to vector<2x8x64xf32>
    %198 = vector.extract_strided_slice %30 {offsets = [0, 1984], sizes = [16, 64], strides = [1, 1]} : vector<16x2304xf32> to vector<16x64xf32>
    %199 = vector.shape_cast %198 : vector<16x64xf32> to vector<2x8x64xf32>
    "tpu.trace_start"() <{level = 10 : i32, message = "bqd,bkd->bqk"}> : () -> ()
    %cst_62 = arith.constant dense<0.000000e+00> : vector<2x8x8xf32>
    %200 = tpu.matmul %195, %197, %cst_62 {dimension_numbers = #tpu.dot_dimension_numbers<[2], [2], [1], [1], [0, 0, 0, 1, 1, 1], [0], [0]>} : vector<2x8x64xf32>, vector<2x8x64xf32>, vector<2x8x8xf32> -> vector<2x8x8xf32>
    "tpu.trace_stop"() : () -> ()
    %cst_63 = arith.constant 1.250000e-01 : f32
    %201 = vector.broadcast %cst_63 : f32 to vector<2x8x8xf32>
    %202 = arith.mulf %200, %201 : vector<2x8x8xf32>
    %203 = vector.broadcast %32 : vector<1x1x8xf32> to vector<2x8x8xf32>
    %204 = arith.addf %202, %203 : vector<2x8x8xf32>
    %cst_64 = arith.constant dense<0xFF800000> : vector<2x8xf32>
    %205 = vector.multi_reduction <maximumf>, %204, %cst_64 [2] : vector<2x8x8xf32> to vector<2x8xf32>
    %206 = vector.shape_cast %205 : vector<2x8xf32> to vector<2x8x1xf32>
    %207 = vector.broadcast %206 : vector<2x8x1xf32> to vector<2x8x8xf32>
    %208 = arith.subf %204, %207 : vector<2x8x8xf32>
    %209 = math.exp %208 : vector<2x8x8xf32>
    %cst_65 = arith.constant dense<0.000000e+00> : vector<2x8xf32>
    %210 = vector.multi_reduction <add>, %209, %cst_65 [2] : vector<2x8x8xf32> to vector<2x8xf32>
    %211 = vector.shape_cast %210 : vector<2x8xf32> to vector<2x8x1xf32>
    %212 = vector.broadcast %211 : vector<2x8x1xf32> to vector<2x8x8xf32>
    %213 = arith.divf %209, %212 : vector<2x8x8xf32>
    "tpu.trace_start"() <{level = 10 : i32, message = "bqk,bkd->bqd"}> : () -> ()
    %cst_66 = arith.constant dense<0.000000e+00> : vector<2x8x64xf32>
    %214 = tpu.matmul %213, %199, %cst_66 {dimension_numbers = #tpu.dot_dimension_numbers<[2], [1], [1], [2], [0, 0, 0, 1, 1, 2], [0], [0]>} : vector<2x8x8xf32>, vector<2x8x64xf32>, vector<2x8x64xf32> -> vector<2x8x64xf32>
    "tpu.trace_stop"() : () -> ()
    %215 = vector.shape_cast %214 : vector<2x8x64xf32> to vector<16x64xf32>
    %c0_67 = arith.constant 0 : index
    %c448 = arith.constant 448 : index
    %216 = vector.load %arg21[%c0_67, %c448] : memref<16x768xf32, #tpu.memory_space<vmem>>, vector<16x64xf32>
    tpu.vector_store %arg21[%c0_67, %c448], %215 {strides = array<i32>} : memref<16x768xf32, #tpu.memory_space<vmem>>, vector<16x64xf32>,
    %217 = vector.extract_strided_slice %30 {offsets = [0, 512], sizes = [16, 64], strides = [1, 1]} : vector<16x2304xf32> to vector<16x64xf32>
    %218 = vector.shape_cast %217 : vector<16x64xf32> to vector<2x8x64xf32>
    %219 = vector.extract_strided_slice %30 {offsets = [0, 1280], sizes = [16, 64], strides = [1, 1]} : vector<16x2304xf32> to vector<16x64xf32>
    %220 = vector.shape_cast %219 : vector<16x64xf32> to vector<2x8x64xf32>
    %221 = vector.extract_strided_slice %30 {offsets = [0, 2048], sizes = [16, 64], strides = [1, 1]} : vector<16x2304xf32> to vector<16x64xf32>
    %222 = vector.shape_cast %221 : vector<16x64xf32> to vector<2x8x64xf32>
    "tpu.trace_start"() <{level = 10 : i32, message = "bqd,bkd->bqk"}> : () -> ()
    %cst_68 = arith.constant dense<0.000000e+00> : vector<2x8x8xf32>
    %223 = tpu.matmul %218, %220, %cst_68 {dimension_numbers = #tpu.dot_dimension_numbers<[2], [2], [1], [1], [0, 0, 0, 1, 1, 1], [0], [0]>} : vector<2x8x64xf32>, vector<2x8x64xf32>, vector<2x8x8xf32> -> vector<2x8x8xf32>
    "tpu.trace_stop"() : () -> ()
    %cst_69 = arith.constant 1.250000e-01 : f32
    %224 = vector.broadcast %cst_69 : f32 to vector<2x8x8xf32>
    %225 = arith.mulf %223, %224 : vector<2x8x8xf32>
    %226 = vector.broadcast %32 : vector<1x1x8xf32> to vector<2x8x8xf32>
    %227 = arith.addf %225, %226 : vector<2x8x8xf32>
    %cst_70 = arith.constant dense<0xFF800000> : vector<2x8xf32>
    %228 = vector.multi_reduction <maximumf>, %227, %cst_70 [2] : vector<2x8x8xf32> to vector<2x8xf32>
    %229 = vector.shape_cast %228 : vector<2x8xf32> to vector<2x8x1xf32>
    %230 = vector.broadcast %229 : vector<2x8x1xf32> to vector<2x8x8xf32>
    %231 = arith.subf %227, %230 : vector<2x8x8xf32>
    %232 = math.exp %231 : vector<2x8x8xf32>
    %cst_71 = arith.constant dense<0.000000e+00> : vector<2x8xf32>
    %233 = vector.multi_reduction <add>, %232, %cst_71 [2] : vector<2x8x8xf32> to vector<2x8xf32>
    %234 = vector.shape_cast %233 : vector<2x8xf32> to vector<2x8x1xf32>
    %235 = vector.broadcast %234 : vector<2x8x1xf32> to vector<2x8x8xf32>
    %236 = arith.divf %232, %235 : vector<2x8x8xf32>
    "tpu.trace_start"() <{level = 10 : i32, message = "bqk,bkd->bqd"}> : () -> ()
    %cst_72 = arith.constant dense<0.000000e+00> : vector<2x8x64xf32>
    %237 = tpu.matmul %236, %222, %cst_72 {dimension_numbers = #tpu.dot_dimension_numbers<[2], [1], [1], [2], [0, 0, 0, 1, 1, 2], [0], [0]>} : vector<2x8x8xf32>, vector<2x8x64xf32>, vector<2x8x64xf32> -> vector<2x8x64xf32>
    "tpu.trace_stop"() : () -> ()
    %238 = vector.shape_cast %237 : vector<2x8x64xf32> to vector<16x64xf32>
    %c0_73 = arith.constant 0 : index
    %c512 = arith.constant 512 : index
    %239 = vector.load %arg21[%c0_73, %c512] : memref<16x768xf32, #tpu.memory_space<vmem>>, vector<16x64xf32>
    tpu.vector_store %arg21[%c0_73, %c512], %238 {strides = array<i32>} : memref<16x768xf32, #tpu.memory_space<vmem>>, vector<16x64xf32>,
    %240 = vector.extract_strided_slice %30 {offsets = [0, 576], sizes = [16, 64], strides = [1, 1]} : vector<16x2304xf32> to vector<16x64xf32>
    %241 = vector.shape_cast %240 : vector<16x64xf32> to vector<2x8x64xf32>
    %242 = vector.extract_strided_slice %30 {offsets = [0, 1344], sizes = [16, 64], strides = [1, 1]} : vector<16x2304xf32> to vector<16x64xf32>
    %243 = vector.shape_cast %242 : vector<16x64xf32> to vector<2x8x64xf32>
    %244 = vector.extract_strided_slice %30 {offsets = [0, 2112], sizes = [16, 64], strides = [1, 1]} : vector<16x2304xf32> to vector<16x64xf32>
    %245 = vector.shape_cast %244 : vector<16x64xf32> to vector<2x8x64xf32>
    "tpu.trace_start"() <{level = 10 : i32, message = "bqd,bkd->bqk"}> : () -> ()
    %cst_74 = arith.constant dense<0.000000e+00> : vector<2x8x8xf32>
    %246 = tpu.matmul %241, %243, %cst_74 {dimension_numbers = #tpu.dot_dimension_numbers<[2], [2], [1], [1], [0, 0, 0, 1, 1, 1], [0], [0]>} : vector<2x8x64xf32>, vector<2x8x64xf32>, vector<2x8x8xf32> -> vector<2x8x8xf32>
    "tpu.trace_stop"() : () -> ()
    %cst_75 = arith.constant 1.250000e-01 : f32
    %247 = vector.broadcast %cst_75 : f32 to vector<2x8x8xf32>
    %248 = arith.mulf %246, %247 : vector<2x8x8xf32>
    %249 = vector.broadcast %32 : vector<1x1x8xf32> to vector<2x8x8xf32>
    %250 = arith.addf %248, %249 : vector<2x8x8xf32>
    %cst_76 = arith.constant dense<0xFF800000> : vector<2x8xf32>
    %251 = vector.multi_reduction <maximumf>, %250, %cst_76 [2] : vector<2x8x8xf32> to vector<2x8xf32>
    %252 = vector.shape_cast %251 : vector<2x8xf32> to vector<2x8x1xf32>
    %253 = vector.broadcast %252 : vector<2x8x1xf32> to vector<2x8x8xf32>
    %254 = arith.subf %250, %253 : vector<2x8x8xf32>
    %255 = math.exp %254 : vector<2x8x8xf32>
    %cst_77 = arith.constant dense<0.000000e+00> : vector<2x8xf32>
    %256 = vector.multi_reduction <add>, %255, %cst_77 [2] : vector<2x8x8xf32> to vector<2x8xf32>
    %257 = vector.shape_cast %256 : vector<2x8xf32> to vector<2x8x1xf32>
    %258 = vector.broadcast %257 : vector<2x8x1xf32> to vector<2x8x8xf32>
    %259 = arith.divf %255, %258 : vector<2x8x8xf32>
    "tpu.trace_start"() <{level = 10 : i32, message = "bqk,bkd->bqd"}> : () -> ()
    %cst_78 = arith.constant dense<0.000000e+00> : vector<2x8x64xf32>
    %260 = tpu.matmul %259, %245, %cst_78 {dimension_numbers = #tpu.dot_dimension_numbers<[2], [1], [1], [2], [0, 0, 0, 1, 1, 2], [0], [0]>} : vector<2x8x8xf32>, vector<2x8x64xf32>, vector<2x8x64xf32> -> vector<2x8x64xf32>
    "tpu.trace_stop"() : () -> ()
    %261 = vector.shape_cast %260 : vector<2x8x64xf32> to vector<16x64xf32>
    %c0_79 = arith.constant 0 : index
    %c576 = arith.constant 576 : index
    %262 = vector.load %arg21[%c0_79, %c576] : memref<16x768xf32, #tpu.memory_space<vmem>>, vector<16x64xf32>
    tpu.vector_store %arg21[%c0_79, %c576], %261 {strides = array<i32>} : memref<16x768xf32, #tpu.memory_space<vmem>>, vector<16x64xf32>,
    %263 = vector.extract_strided_slice %30 {offsets = [0, 640], sizes = [16, 64], strides = [1, 1]} : vector<16x2304xf32> to vector<16x64xf32>
    %264 = vector.shape_cast %263 : vector<16x64xf32> to vector<2x8x64xf32>
    %265 = vector.extract_strided_slice %30 {offsets = [0, 1408], sizes = [16, 64], strides = [1, 1]} : vector<16x2304xf32> to vector<16x64xf32>
    %266 = vector.shape_cast %265 : vector<16x64xf32> to vector<2x8x64xf32>
    %267 = vector.extract_strided_slice %30 {offsets = [0, 2176], sizes = [16, 64], strides = [1, 1]} : vector<16x2304xf32> to vector<16x64xf32>
    %268 = vector.shape_cast %267 : vector<16x64xf32> to vector<2x8x64xf32>
    "tpu.trace_start"() <{level = 10 : i32, message = "bqd,bkd->bqk"}> : () -> ()
    %cst_80 = arith.constant dense<0.000000e+00> : vector<2x8x8xf32>
    %269 = tpu.matmul %264, %266, %cst_80 {dimension_numbers = #tpu.dot_dimension_numbers<[2], [2], [1], [1], [0, 0, 0, 1, 1, 1], [0], [0]>} : vector<2x8x64xf32>, vector<2x8x64xf32>, vector<2x8x8xf32> -> vector<2x8x8xf32>
    "tpu.trace_stop"() : () -> ()
    %cst_81 = arith.constant 1.250000e-01 : f32
    %270 = vector.broadcast %cst_81 : f32 to vector<2x8x8xf32>
    %271 = arith.mulf %269, %270 : vector<2x8x8xf32>
    %272 = vector.broadcast %32 : vector<1x1x8xf32> to vector<2x8x8xf32>
    %273 = arith.addf %271, %272 : vector<2x8x8xf32>
    %cst_82 = arith.constant dense<0xFF800000> : vector<2x8xf32>
    %274 = vector.multi_reduction <maximumf>, %273, %cst_82 [2] : vector<2x8x8xf32> to vector<2x8xf32>
    %275 = vector.shape_cast %274 : vector<2x8xf32> to vector<2x8x1xf32>
    %276 = vector.broadcast %275 : vector<2x8x1xf32> to vector<2x8x8xf32>
    %277 = arith.subf %273, %276 : vector<2x8x8xf32>
    %278 = math.exp %277 : vector<2x8x8xf32>
    %cst_83 = arith.constant dense<0.000000e+00> : vector<2x8xf32>
    %279 = vector.multi_reduction <add>, %278, %cst_83 [2] : vector<2x8x8xf32> to vector<2x8xf32>
    %280 = vector.shape_cast %279 : vector<2x8xf32> to vector<2x8x1xf32>
    %281 = vector.broadcast %280 : vector<2x8x1xf32> to vector<2x8x8xf32>
    %282 = arith.divf %278, %281 : vector<2x8x8xf32>
    "tpu.trace_start"() <{level = 10 : i32, message = "bqk,bkd->bqd"}> : () -> ()
    %cst_84 = arith.constant dense<0.000000e+00> : vector<2x8x64xf32>
    %283 = tpu.matmul %282, %268, %cst_84 {dimension_numbers = #tpu.dot_dimension_numbers<[2], [1], [1], [2], [0, 0, 0, 1, 1, 2], [0], [0]>} : vector<2x8x8xf32>, vector<2x8x64xf32>, vector<2x8x64xf32> -> vector<2x8x64xf32>
    "tpu.trace_stop"() : () -> ()
    %284 = vector.shape_cast %283 : vector<2x8x64xf32> to vector<16x64xf32>
    %c0_85 = arith.constant 0 : index
    %c640 = arith.constant 640 : index
    %285 = vector.load %arg21[%c0_85, %c640] : memref<16x768xf32, #tpu.memory_space<vmem>>, vector<16x64xf32>
    tpu.vector_store %arg21[%c0_85, %c640], %284 {strides = array<i32>} : memref<16x768xf32, #tpu.memory_space<vmem>>, vector<16x64xf32>,
    %286 = vector.extract_strided_slice %30 {offsets = [0, 704], sizes = [16, 64], strides = [1, 1]} : vector<16x2304xf32> to vector<16x64xf32>
    %287 = vector.shape_cast %286 : vector<16x64xf32> to vector<2x8x64xf32>
    %288 = vector.extract_strided_slice %30 {offsets = [0, 1472], sizes = [16, 64], strides = [1, 1]} : vector<16x2304xf32> to vector<16x64xf32>
    %289 = vector.shape_cast %288 : vector<16x64xf32> to vector<2x8x64xf32>
    %290 = vector.extract_strided_slice %30 {offsets = [0, 2240], sizes = [16, 64], strides = [1, 1]} : vector<16x2304xf32> to vector<16x64xf32>
    %291 = vector.shape_cast %290 : vector<16x64xf32> to vector<2x8x64xf32>
    "tpu.trace_start"() <{level = 10 : i32, message = "bqd,bkd->bqk"}> : () -> ()
    %cst_86 = arith.constant dense<0.000000e+00> : vector<2x8x8xf32>
    %292 = tpu.matmul %287, %289, %cst_86 {dimension_numbers = #tpu.dot_dimension_numbers<[2], [2], [1], [1], [0, 0, 0, 1, 1, 1], [0], [0]>} : vector<2x8x64xf32>, vector<2x8x64xf32>, vector<2x8x8xf32> -> vector<2x8x8xf32>
    "tpu.trace_stop"() : () -> ()
    %cst_87 = arith.constant 1.250000e-01 : f32
    %293 = vector.broadcast %cst_87 : f32 to vector<2x8x8xf32>
    %294 = arith.mulf %292, %293 : vector<2x8x8xf32>
    %295 = vector.broadcast %32 : vector<1x1x8xf32> to vector<2x8x8xf32>
    %296 = arith.addf %294, %295 : vector<2x8x8xf32>
    %cst_88 = arith.constant dense<0xFF800000> : vector<2x8xf32>
    %297 = vector.multi_reduction <maximumf>, %296, %cst_88 [2] : vector<2x8x8xf32> to vector<2x8xf32>
    %298 = vector.shape_cast %297 : vector<2x8xf32> to vector<2x8x1xf32>
    %299 = vector.broadcast %298 : vector<2x8x1xf32> to vector<2x8x8xf32>
    %300 = arith.subf %296, %299 : vector<2x8x8xf32>
    %301 = math.exp %300 : vector<2x8x8xf32>
    %cst_89 = arith.constant dense<0.000000e+00> : vector<2x8xf32>
    %302 = vector.multi_reduction <add>, %301, %cst_89 [2] : vector<2x8x8xf32> to vector<2x8xf32>
    %303 = vector.shape_cast %302 : vector<2x8xf32> to vector<2x8x1xf32>
    %304 = vector.broadcast %303 : vector<2x8x1xf32> to vector<2x8x8xf32>
    %305 = arith.divf %301, %304 : vector<2x8x8xf32>
    "tpu.trace_start"() <{level = 10 : i32, message = "bqk,bkd->bqd"}> : () -> ()
    %cst_90 = arith.constant dense<0.000000e+00> : vector<2x8x64xf32>
    %306 = tpu.matmul %305, %291, %cst_90 {dimension_numbers = #tpu.dot_dimension_numbers<[2], [1], [1], [2], [0, 0, 0, 1, 1, 2], [0], [0]>} : vector<2x8x8xf32>, vector<2x8x64xf32>, vector<2x8x64xf32> -> vector<2x8x64xf32>
    "tpu.trace_stop"() : () -> ()
    %307 = vector.shape_cast %306 : vector<2x8x64xf32> to vector<16x64xf32>
    %c0_91 = arith.constant 0 : index
    %c704 = arith.constant 704 : index
    %308 = vector.load %arg21[%c0_91, %c704] : memref<16x768xf32, #tpu.memory_space<vmem>>, vector<16x64xf32>
    tpu.vector_store %arg21[%c0_91, %c704], %307 {strides = array<i32>} : memref<16x768xf32, #tpu.memory_space<vmem>>, vector<16x64xf32>,
    %c0_92 = arith.constant 0 : index
    %c0_93 = arith.constant 0 : index
    %309 = vector.load %arg21[%c0_92, %c0_93] : memref<16x768xf32, #tpu.memory_space<vmem>>, vector<16x768xf32>
    %c0_94 = arith.constant 0 : index
    %c0_95 = arith.constant 0 : index
    %310 = vector.load %arg8[%c0_94, %c0_95] : memref<768x64xf32, #tpu.memory_space<vmem>>, vector<768x64xf32>
    %cst_96 = arith.constant dense<0.000000e+00> : vector<16x64xf32>
    %311 = tpu.matmul %309, %310, %cst_96 {dimension_numbers = #tpu.dot_dimension_numbers<[1], [0], [0], [1], [0, 0, 1, 1], [], []>} : vector<16x768xf32>, vector<768x64xf32>, vector<16x64xf32> -> vector<16x64xf32>
    %c0_97 = arith.constant 0 : index
    %c0_98 = arith.constant 0 : index
    %312 = vector.load %arg9[%c0_97, %c0_98] : memref<1x64xf32, #tpu.memory_space<vmem>>, vector<1x64xf32>
    %313 = vector.broadcast %312 : vector<1x64xf32> to vector<16x64xf32>
    %314 = arith.addf %311, %313 : vector<16x64xf32>
    %315 = arith.addf %4, %314 : vector<16x64xf32>
    %c0_99 = arith.constant 0 : index
    %c0_100 = arith.constant 0 : index
    %316 = vector.load %arg10[%c0_99, %c0_100] : memref<1x64xf32, #tpu.memory_space<vmem>>, vector<1x64xf32>
    %c0_101 = arith.constant 0 : index
    %c0_102 = arith.constant 0 : index
    %317 = vector.load %arg11[%c0_101, %c0_102] : memref<1x64xf32, #tpu.memory_space<vmem>>, vector<1x64xf32>
    %cst_103 = arith.constant dense<0.000000e+00> : vector<16xf32>
    %318 = vector.multi_reduction <add>, %315, %cst_103 [1] : vector<16x64xf32> to vector<16xf32>
    %319 = vector.shape_cast %318 : vector<16xf32> to vector<16x1xf32>
    %cst_104 = arith.constant 6.400000e+01 : f32
    %320 = vector.broadcast %cst_104 : f32 to vector<16x1xf32>
    %321 = arith.divf %319, %320 : vector<16x1xf32>
    %322 = vector.broadcast %321 : vector<16x1xf32> to vector<16x64xf32>
    %323 = arith.subf %315, %322 : vector<16x64xf32>
    %324 = arith.mulf %323, %323 : vector<16x64xf32>
    %cst_105 = arith.constant dense<0.000000e+00> : vector<16xf32>
    %325 = vector.multi_reduction <add>, %324, %cst_105 [1] : vector<16x64xf32> to vector<16xf32>
    %326 = vector.shape_cast %325 : vector<16xf32> to vector<16x1xf32>
    %cst_106 = arith.constant 6.400000e+01 : f32
    %327 = vector.broadcast %cst_106 : f32 to vector<16x1xf32>
    %328 = arith.divf %326, %327 : vector<16x1xf32>
    %329 = vector.broadcast %321 : vector<16x1xf32> to vector<16x64xf32>
    %330 = arith.subf %315, %329 : vector<16x64xf32>
    %cst_107 = arith.constant 9.99999974E-6 : f32
    %331 = vector.broadcast %cst_107 : f32 to vector<16x1xf32>
    %332 = arith.addf %328, %331 : vector<16x1xf32>
    %333 = math.rsqrt %332 : vector<16x1xf32>
    %334 = vector.broadcast %333 : vector<16x1xf32> to vector<16x64xf32>
    %335 = arith.mulf %330, %334 : vector<16x64xf32>
    %336 = vector.broadcast %316 : vector<1x64xf32> to vector<16x64xf32>
    %337 = arith.mulf %335, %336 : vector<16x64xf32>
    %338 = vector.broadcast %317 : vector<1x64xf32> to vector<16x64xf32>
    %339 = arith.addf %337, %338 : vector<16x64xf32>
    %c0_108 = arith.constant 0 : index
    %c0_109 = arith.constant 0 : index
    %340 = vector.load %arg12[%c0_108, %c0_109] : memref<64x2048xf32, #tpu.memory_space<vmem>>, vector<64x2048xf32>
    %cst_110 = arith.constant dense<0.000000e+00> : vector<16x2048xf32>
    %341 = tpu.matmul %339, %340, %cst_110 {dimension_numbers = #tpu.dot_dimension_numbers<[1], [0], [0], [1], [0, 0, 1, 1], [], []>} : vector<16x64xf32>, vector<64x2048xf32>, vector<16x2048xf32> -> vector<16x2048xf32>
    %c0_111 = arith.constant 0 : index
    %c0_112 = arith.constant 0 : index
    %342 = vector.load %arg13[%c0_111, %c0_112] : memref<1x2048xf32, #tpu.memory_space<vmem>>, vector<1x2048xf32>
    %343 = vector.broadcast %342 : vector<1x2048xf32> to vector<16x2048xf32>
    %344 = arith.addf %341, %343 : vector<16x2048xf32>
    %345 = arith.mulf %344, %344 : vector<16x2048xf32>
    %346 = arith.mulf %344, %345 : vector<16x2048xf32>
    %cst_113 = arith.constant 4.471500e-02 : f32
    %347 = vector.broadcast %cst_113 : f32 to vector<16x2048xf32>
    %348 = arith.mulf %347, %346 : vector<16x2048xf32>
    %349 = arith.addf %344, %348 : vector<16x2048xf32>
    %cst_114 = arith.constant 0.797884583 : f32
    %350 = vector.broadcast %cst_114 : f32 to vector<16x2048xf32>
    %351 = arith.mulf %350, %349 : vector<16x2048xf32>
    %352 = math.tanh %351 : vector<16x2048xf32>
    %cst_115 = arith.constant 1.000000e+00 : f32
    %353 = vector.broadcast %cst_115 : f32 to vector<16x2048xf32>
    %354 = arith.addf %353, %352 : vector<16x2048xf32>
    %cst_116 = arith.constant 5.000000e-01 : f32
    %355 = vector.broadcast %cst_116 : f32 to vector<16x2048xf32>
    %356 = arith.mulf %355, %354 : vector<16x2048xf32>
    %357 = arith.mulf %344, %356 : vector<16x2048xf32>
    %c0_117 = arith.constant 0 : index
    %c0_118 = arith.constant 0 : index
    %358 = vector.load %arg14[%c0_117, %c0_118] : memref<2048x64xf32, #tpu.memory_space<vmem>>, vector<2048x64xf32>
    %cst_119 = arith.constant dense<0.000000e+00> : vector<16x64xf32>
    %359 = tpu.matmul %357, %358, %cst_119 {dimension_numbers = #tpu.dot_dimension_numbers<[1], [0], [0], [1], [0, 0, 1, 1], [], []>} : vector<16x2048xf32>, vector<2048x64xf32>, vector<16x64xf32> -> vector<16x64xf32>
    %c0_120 = arith.constant 0 : index
    %c0_121 = arith.constant 0 : index
    %360 = vector.load %arg15[%c0_120, %c0_121] : memref<1x64xf32, #tpu.memory_space<vmem>>, vector<1x64xf32>
    %361 = vector.broadcast %360 : vector<1x64xf32> to vector<16x64xf32>
    %362 = arith.addf %359, %361 : vector<16x64xf32>
    %363 = arith.addf %315, %362 : vector<16x64xf32>
    %c0_122 = arith.constant 0 : index
    %c0_123 = arith.constant 0 : index
    %364 = vector.load %arg16[%c0_122, %c0_123] : memref<1x64xf32, #tpu.memory_space<vmem>>, vector<1x64xf32>
    %c0_124 = arith.constant 0 : index
    %c0_125 = arith.constant 0 : index
    %365 = vector.load %arg17[%c0_124, %c0_125] : memref<1x64xf32, #tpu.memory_space<vmem>>, vector<1x64xf32>
    %cst_126 = arith.constant dense<0.000000e+00> : vector<16xf32>
    %366 = vector.multi_reduction <add>, %363, %cst_126 [1] : vector<16x64xf32> to vector<16xf32>
    %367 = vector.shape_cast %366 : vector<16xf32> to vector<16x1xf32>
    %cst_127 = arith.constant 6.400000e+01 : f32
    %368 = vector.broadcast %cst_127 : f32 to vector<16x1xf32>
    %369 = arith.divf %367, %368 : vector<16x1xf32>
    %370 = vector.broadcast %369 : vector<16x1xf32> to vector<16x64xf32>
    %371 = arith.subf %363, %370 : vector<16x64xf32>
    %372 = arith.mulf %371, %371 : vector<16x64xf32>
    %cst_128 = arith.constant dense<0.000000e+00> : vector<16xf32>
    %373 = vector.multi_reduction <add>, %372, %cst_128 [1] : vector<16x64xf32> to vector<16xf32>
    %374 = vector.shape_cast %373 : vector<16xf32> to vector<16x1xf32>
    %cst_129 = arith.constant 6.400000e+01 : f32
    %375 = vector.broadcast %cst_129 : f32 to vector<16x1xf32>
    %376 = arith.divf %374, %375 : vector<16x1xf32>
    %377 = vector.broadcast %369 : vector<16x1xf32> to vector<16x64xf32>
    %378 = arith.subf %363, %377 : vector<16x64xf32>
    %cst_130 = arith.constant 9.99999974E-6 : f32
    %379 = vector.broadcast %cst_130 : f32 to vector<16x1xf32>
    %380 = arith.addf %376, %379 : vector<16x1xf32>
    %381 = math.rsqrt %380 : vector<16x1xf32>
    %382 = vector.broadcast %381 : vector<16x1xf32> to vector<16x64xf32>
    %383 = arith.mulf %378, %382 : vector<16x64xf32>
    %384 = vector.broadcast %364 : vector<1x64xf32> to vector<16x64xf32>
    %385 = arith.mulf %383, %384 : vector<16x64xf32>
    %386 = vector.broadcast %365 : vector<1x64xf32> to vector<16x64xf32>
    %387 = arith.addf %385, %386 : vector<16x64xf32>
    %c0_131 = arith.constant 0 : index
    %c0_132 = arith.constant 0 : index
    %388 = vector.load %arg18[%c0_131, %c0_132] : memref<64x128xf32, #tpu.memory_space<vmem>>, vector<64x128xf32>
    %cst_133 = arith.constant dense<0.000000e+00> : vector<16x128xf32>
    %389 = tpu.matmul %387, %388, %cst_133 {dimension_numbers = #tpu.dot_dimension_numbers<[1], [0], [0], [1], [0, 0, 1, 1], [], []>} : vector<16x64xf32>, vector<64x128xf32>, vector<16x128xf32> -> vector<16x128xf32>
    %c0_134 = arith.constant 0 : index
    %c0_135 = arith.constant 0 : index
    %390 = vector.load %arg19[%c0_134, %c0_135] : memref<1x128xf32, #tpu.memory_space<vmem>>, vector<1x128xf32>
    %391 = vector.broadcast %390 : vector<1x128xf32> to vector<16x128xf32>
    %392 = arith.addf %389, %391 : vector<16x128xf32>
    %c0_136 = arith.constant 0 : index
    %c0_137 = arith.constant 0 : index
    %393 = vector.load %arg20[%c0_136, %c0_137] : memref<16x128xf32, #tpu.memory_space<vmem>>, vector<16x128xf32>
    tpu.vector_store %arg20[%c0_136, %c0_137], %392 {strides = array<i32>} : memref<16x128xf32, #tpu.memory_space<vmem>>, vector<16x128xf32>,
    return
  }
  func.func @transform_0(%arg0: i32) -> (i32, i32) {
    %c0_i32 = arith.constant 0 : i32
    %c0_i32_0 = arith.constant 0 : i32
    return %arg0, %c0_i32 : i32, i32
  }
  func.func @transform_1(%arg0: i32) -> (i32, i32) {
    %c0_i32 = arith.constant 0 : i32
    %c0_i32_0 = arith.constant 0 : i32
    %c0_i32_1 = arith.constant 0 : i32
    return %c0_i32, %c0_i32_0 : i32, i32
  }
  func.func @transform_2(%arg0: i32) -> (i32, i32) {
    %c0_i32 = arith.constant 0 : i32
    %c0_i32_0 = arith.constant 0 : i32
    %c0_i32_1 = arith.constant 0 : i32
    return %c0_i32, %c0_i32_0 : i32, i32
  }
  func.func @transform_3(%arg0: i32) -> (i32, i32) {
    %c0_i32 = arith.constant 0 : i32
    %c0_i32_0 = arith.constant 0 : i32
    %c0_i32_1 = arith.constant 0 : i32
    return %c0_i32, %c0_i32_0 : i32, i32
  }
  func.func @transform_4(%arg0: i32) -> (i32, i32) {
    %c0_i32 = arith.constant 0 : i32
    %c0_i32_0 = arith.constant 0 : i32
    %c0_i32_1 = arith.constant 0 : i32
    return %c0_i32, %c0_i32_0 : i32, i32
  }
  func.func @transform_5(%arg0: i32) -> (i32, i32) {
    %c0_i32 = arith.constant 0 : i32
    %c0_i32_0 = arith.constant 0 : i32
    %c0_i32_1 = arith.constant 0 : i32
    return %c0_i32, %c0_i32_0 : i32, i32
  }
  func.func @transform_6(%arg0: i32) -> (i32, i32) {
    %c0_i32 = arith.constant 0 : i32
    %c0_i32_0 = arith.constant 0 : i32
    %c0_i32_1 = arith.constant 0 : i32
    return %c0_i32, %c0_i32_0 : i32, i32
  }
  func.func @transform_7(%arg0: i32) -> (i32, i32) {
    %c0_i32 = arith.constant 0 : i32
    %c0_i32_0 = arith.constant 0 : i32
    %c0_i32_1 = arith.constant 0 : i32
    return %c0_i32, %c0_i32_0 : i32, i32
  }
  func.func @transform_8(%arg0: i32) -> (i32, i32) {
    %c0_i32 = arith.constant 0 : i32
    %c0_i32_0 = arith.constant 0 : i32
    %c0_i32_1 = arith.constant 0 : i32
    return %c0_i32, %c0_i32_0 : i32, i32
  }
  func.func @transform_9(%arg0: i32) -> (i32, i32) {
    %c0_i32 = arith.constant 0 : i32
    %c0_i32_0 = arith.constant 0 : i32
    %c0_i32_1 = arith.constant 0 : i32
    return %c0_i32, %c0_i32_0 : i32, i32
  }
  func.func @transform_10(%arg0: i32) -> (i32, i32) {
    %c0_i32 = arith.constant 0 : i32
    %c0_i32_0 = arith.constant 0 : i32
    %c0_i32_1 = arith.constant 0 : i32
    return %c0_i32, %c0_i32_0 : i32, i32
  }
  func.func @transform_11(%arg0: i32) -> (i32, i32) {
    %c0_i32 = arith.constant 0 : i32
    %c0_i32_0 = arith.constant 0 : i32
    %c0_i32_1 = arith.constant 0 : i32
    return %c0_i32, %c0_i32_0 : i32, i32
  }
  func.func @transform_12(%arg0: i32) -> (i32, i32) {
    %c0_i32 = arith.constant 0 : i32
    %c0_i32_0 = arith.constant 0 : i32
    %c0_i32_1 = arith.constant 0 : i32
    return %c0_i32, %c0_i32_0 : i32, i32
  }
  func.func @transform_13(%arg0: i32) -> (i32, i32) {
    %c0_i32 = arith.constant 0 : i32
    %c0_i32_0 = arith.constant 0 : i32
    %c0_i32_1 = arith.constant 0 : i32
    return %c0_i32, %c0_i32_0 : i32, i32
  }
  func.func @transform_14(%arg0: i32) -> (i32, i32) {
    %c0_i32 = arith.constant 0 : i32
    %c0_i32_0 = arith.constant 0 : i32
    %c0_i32_1 = arith.constant 0 : i32
    return %c0_i32, %c0_i32_0 : i32, i32
  }
  func.func @transform_15(%arg0: i32) -> (i32, i32) {
    %c0_i32 = arith.constant 0 : i32
    %c0_i32_0 = arith.constant 0 : i32
    %c0_i32_1 = arith.constant 0 : i32
    return %c0_i32, %c0_i32_0 : i32, i32
  }
  func.func @transform_16(%arg0: i32) -> (i32, i32) {
    %c0_i32 = arith.constant 0 : i32
    %c0_i32_0 = arith.constant 0 : i32
    %c0_i32_1 = arith.constant 0 : i32
    return %c0_i32, %c0_i32_0 : i32, i32
  }
  func.func @transform_17(%arg0: i32) -> (i32, i32) {
    %c0_i32 = arith.constant 0 : i32
    %c0_i32_0 = arith.constant 0 : i32
    %c0_i32_1 = arith.constant 0 : i32
    return %c0_i32, %c0_i32_0 : i32, i32
  }
  func.func @transform_18(%arg0: i32) -> (i32, i32) {
    %c0_i32 = arith.constant 0 : i32
    %c0_i32_0 = arith.constant 0 : i32
    %c0_i32_1 = arith.constant 0 : i32
    return %c0_i32, %c0_i32_0 : i32, i32
  }
  func.func @transform_19(%arg0: i32) -> (i32, i32) {
    %c0_i32 = arith.constant 0 : i32
    %c0_i32_0 = arith.constant 0 : i32
    return %arg0, %c0_i32 : i32, i32
  }
}

</mosaic_0001>

<bundles_post_ra>
// kernel: vit_forward.1
= control target key start
LH: loop header
LB: loop body
LE: loop exit
PB: predicated region body
PF: predicated region fallthrough
CT: control target
= control target key end

     0   :  { %vm399_vm0 = vcmask 523264   ;;  %vm9774_vm1 = vmmov 0   ;;  %vm1449_vm2 = vcmask 64512   ;;  %vm1964_vm3 = vcmask 1048064   ;;  %s13375_s3 = inlined_call_operand.vmem [shape: f32[768,64], index: 3, kind: input, shape index: {}]   ;;  %s13376_s0 = inlined_call_operand.vmem [shape: f32[16,768], index: 0, kind: input, shape index: {}]   ;;  %s13377_s1 = inlined_call_operand.vmem [shape: f32[16,64], index: 1, kind: input, shape index: {}]   ;;  %s13378_s6 = inlined_call_operand.vmem [shape: f32[64,2304], index: 6, kind: input, shape index: {}]   ;;  %s13379_s4 = inlined_call_operand.vmem [shape: f32[1,64], index: 4, kind: input, shape index: {}]   ;;  %s13380_s5 = inlined_call_operand.vmem [shape: f32[1,64], index: 5, kind: input, shape index: {}]   ;;  %s13381_s2 = inlined_call_operand.vmem [shape: f32[1,8], index: 2, kind: input, shape index: {}]   ;;  %s13382_s7 = inlined_call_operand.vmem [shape: f32[768,64], index: 7, kind: input, shape index: {}]   ;;  %s13383_s8 = inlined_call_operand.vmem [shape: f32[1,64], index: 8, kind: input, shape index: {}]   ;;  %s13384_s11 = inlined_call_operand.vmem [shape: f32[64,2048], index: 11, kind: input, shape index: {}]   ;;  %s13385_s9 = inlined_call_operand.vmem [shape: f32[1,64], index: 9, kind: input, shape index: {}]   ;;  %s13386_s10 = inlined_call_operand.vmem [shape: f32[1,64], index: 10, kind: input, shape index: {}]   ;;  %s13387_s13 = inlined_call_operand.vmem [shape: f32[2048,64], index: 13, kind: input, shape index: {}]   ;;  %s13388_s12 = inlined_call_operand.vmem [shape: f32[1,2048], index: 12, kind: input, shape index: {}]   ;;  %s13389_s14 = inlined_call_operand.vmem [shape: f32[1,64], index: 14, kind: input, shape index: {}]   ;;  %s13390_s17 = inlined_call_operand.vmem [shape: f32[64,128], index: 17, kind: input, shape index: {}]   ;;  %s13391_s15 = inlined_call_operand.vmem [shape: f32[1,64], index: 15, kind: input, shape index: {}]   ;;  %s13392_s16 = inlined_call_operand.vmem [shape: f32[1,64], index: 16, kind: input, shape index: {}]   ;;  %s13393_s18 = inlined_call_operand.vmem [shape: f32[1,128], index: 18, kind: input, shape index: {}]   ;;  %s13394_s19 = inlined_call_operand.vmem [shape: f32[16,128], index: 19, kind: output, shape index: {}]  }
   0x1   :  { %13412 = sst [smem:[#allocation15_spill]] %s13375_s3 }
   0x2   :  { %13413 = sst [smem:[#allocation16_spill]] %s13376_s0  ;;  %s13416_s20 = sld [smem:[#allocation15_spill]] }
   0x3   :  { %13414 = sst [smem:[#allocation17_spill]] %s13377_s1  ;;  %s13417_s26 = sld [smem:[#allocation16_spill]] }
   0x4   :  { %13415 = sst [smem:[#allocation18_spill]] %s13378_s6  ;;  %s13418_s21 = sld [smem:[#allocation17_spill]] }
   0x5   :  { %s13419_s23 = sld [smem:[#allocation18_spill]] }
   0x8   :  { %v90_v0 = vld [vmem:[%s13416_s20 + $0x80] sm:$0xff]  ;;  %v91_v1 = vld [vmem:[%s13416_s20 + $0x88] sm:$0xff]  ;;  %v92_v11 = vld [vmem:[%s13416_s20 + $0x90] sm:$0xff] }
   0x9   :  { %v74_v2 = vld [vmem:[%s13416_s20] sm:$0xff]  ;;  %v8861_v3 = vpack.c.bf16 %v91_v1, %v90_v0  ;;  %v75_v4 = vld [vmem:[%s13416_s20 + $0x8] sm:$0xff]  ;;  %v93_v13 = vld [vmem:[%s13416_s20 + $0x98] sm:$0xff] }
   0xa   :  { %v122_v5 = vld [vmem:[%s13416_s20 + $0x180] sm:$0xff]  ;;  %v123_v6 = vld [vmem:[%s13416_s20 + $0x188] sm:$0xff]  ;;  %v8863_v7 = vpack.c.bf16 %v75_v4, %v74_v2  ;;  %v76_v14 = vld [vmem:[%s13416_s20 + $0x10] sm:$0xff]  ;;  %v8865_v16 = vpack.c.bf16 %v93_v13, %v92_v11 }
   0xb   :  { %v8893_v8 = vpack.c.bf16 %v123_v6, %v122_v5  ;;  %v106_v9 = vld [vmem:[%s13416_s20 + $0x100] sm:$0xff]  ;;  %v107_v10 = vld [vmem:[%s13416_s20 + $0x108] sm:$0xff]  ;;  %8862 = vmatprep.subr.bf16.mxu0 %v8861_v3  ;;  %v77_v15 = vld [vmem:[%s13416_s20 + $0x18] sm:$0xff] }
   0xc   :  { %v8895_v12 = vpack.c.bf16 %v107_v10, %v106_v9  ;;  %8864 = vmatpush3.bf16.msra.mxu0 %v8863_v7  ;;  %v8867_v17 = vpack.c.bf16 %v77_v15, %v76_v14  ;;  %v124_v18 = vld [vmem:[%s13416_s20 + $0x190] sm:$0xff]  ;;  %v125_v19 = vld [vmem:[%s13416_s20 + $0x198] sm:$0xff]  ;;  %v94_v23 = vld [vmem:[%s13416_s20 + $0xa0] sm:$0xff] }
   0xd   :  { %8894 = vmatprep.subr.bf16.mxu1 %v8893_v8  ;;  %v108_v20 = vld [vmem:[%s13416_s20 + $0x110] sm:$0xff]  ;;  %v8897_v21 = vpack.c.bf16 %v125_v19, %v124_v18  ;;  %v109_v22 = vld [vmem:[%s13416_s20 + $0x118] sm:$0xff]  ;;  %v95_v24 = vld [vmem:[%s13416_s20 + $0xa8] sm:$0xff]  ;;  %8866 = vmatprep.subr.bf16.mxu0 %v8865_v16 }
   0xe   :  { %8896 = vmatpush3.bf16.msra.mxu1 %v8895_v12  ;;  %v8899_v25 = vpack.c.bf16 %v109_v22, %v108_v20  ;;  %v8869_v26 = vpack.c.bf16 %v95_v24, %v94_v23  ;;  %v78_v27 = vld [vmem:[%s13416_s20 + $0x20] sm:$0xff]  ;;  %v79_v28 = vld [vmem:[%s13416_s20 + $0x28] sm:$0xff]  ;;  %v96_v35 = vld [vmem:[%s13416_s20 + $0xb0] sm:$0xff] }
   0xf   :  { %v126_v29 = vld [vmem:[%s13416_s20 + $0x1a0] sm:$0xff]  ;;  %8898 = vmatprep.subr.bf16.mxu1 %v8897_v21  ;;  %v127_v30 = vld [vmem:[%s13416_s20 + $0x1a8] sm:$0xff]  ;;  %v8871_v33 = vpack.c.bf16 %v79_v28, %v78_v27  ;;  %v97_v36 = vld [vmem:[%s13416_s20 + $0xb8] sm:$0xff] }
  0x10   :  { %v110_v31 = vld [vmem:[%s13416_s20 + $0x120] sm:$0xff]  ;;  %v111_v32 = vld [vmem:[%s13416_s20 + $0x128] sm:$0xff]  ;;  %8868 = vmatpush3.bf16.msra.mxu0 %v8867_v17  ;;  %v8901_v34 = vpack.c.bf16 %v127_v30, %v126_v29  ;;  %v80_v37 = vld [vmem:[%s13416_s20 + $0x30] sm:$0xff]  ;;  %v8873_v39 = vpack.c.bf16 %v97_v36, %v96_v35 }
  0x11   :  { %8870 = vmatprep.subr.bf16.mxu0 %v8869_v26  ;;  %v8903_v38 = vpack.c.bf16 %v111_v32, %v110_v31  ;;  %v81_v40 = vld [vmem:[%s13416_s20 + $0x38] sm:$0xff]  ;;  %v128_v41 = vld [vmem:[%s13416_s20 + $0x1b0] sm:$0xff]  ;;  %v98_v46 = vld [vmem:[%s13416_s20 + $0xc0] sm:$0xff] }
  0x12   :  { %8900 = vmatpush3.bf16.msra.mxu1 %v8899_v25  ;;  %v129_v42 = vld [vmem:[%s13416_s20 + $0x1b8] sm:$0xff]  ;;  %v112_v44 = vld [vmem:[%s13416_s20 + $0x130] sm:$0xff]  ;;  %v99_v47 = vld [vmem:[%s13416_s20 + $0xc8] sm:$0xff]  ;;  %v8875_v48 = vpack.c.bf16 %v81_v40, %v80_v37 }
  0x13   :  { %8902 = vmatprep.subr.bf16.mxu1 %v8901_v34  ;;  %v8905_v43 = vpack.c.bf16 %v129_v42, %v128_v41  ;;  %v113_v45 = vld [vmem:[%s13416_s20 + $0x138] sm:$0xff]  ;;  %v130_v49 = vld [vmem:[%s13416_s20 + $0x1c0] sm:$0xff]  ;;  %v131_v50 = vld [vmem:[%s13416_s20 + $0x1c8] sm:$0xff]  ;;  %v8877_v52 = vpack.c.bf16 %v99_v47, %v98_v46 }
  0x14   :  { %8872 = vmatpush3.bf16.msra.mxu0 %v8871_v33  ;;  %v8907_v51 = vpack.c.bf16 %v113_v45, %v112_v44  ;;  %v82_v53 = vld [vmem:[%s13416_s20 + $0x40] sm:$0xff]  ;;  %v83_v54 = vld [vmem:[%s13416_s20 + $0x48] sm:$0xff]  ;;  %v8909_v56 = vpack.c.bf16 %v131_v50, %v130_v49  ;;  %v100_v58 = vld [vmem:[%s13416_s20 + $0xd0] sm:$0xff] }
  0x15   :  { %8874 = vmatprep.subr.bf16.mxu0 %v8873_v39  ;;  %v114_v55 = vld [vmem:[%s13416_s20 + $0x140] sm:$0xff]  ;;  %v115_v57 = vld [vmem:[%s13416_s20 + $0x148] sm:$0xff]  ;;  %v101_v59 = vld [vmem:[%s13416_s20 + $0xd8] sm:$0xff]  ;;  %v8879_v62 = vpack.c.bf16 %v83_v54, %v82_v53 }
  0x16   :  { %8904 = vmatpush3.bf16.msra.mxu1 %v8903_v38  ;;  %v132_v60 = vld [vmem:[%s13416_s20 + $0x1d0] sm:$0xff]  ;;  %v133_v61 = vld [vmem:[%s13416_s20 + $0x1d8] sm:$0xff]  ;;  %v8911_v63 = vpack.c.bf16 %v115_v57, %v114_v55  ;;  %v8881_v0 = vpack.c.bf16 %v101_v59, %v100_v58  ;;  %v102_v6 = vld [vmem:[%s13416_s20 + $0xe0] sm:$0xff] }
  0x17   :  { %8906 = vmatprep.subr.bf16.mxu1 %v8905_v43  ;;  %v84_v1 = vld [vmem:[%s13416_s20 + $0x50] sm:$0xff]  ;;  %v85_v2 = vld [vmem:[%s13416_s20 + $0x58] sm:$0xff]  ;;  %v8913_v4 = vpack.c.bf16 %v133_v61, %v132_v60  ;;  %v103_v7 = vld [vmem:[%s13416_s20 + $0xe8] sm:$0xff] }
  0x18   :  { %8876 = vmatpush3.bf16.msra.mxu0 %v8875_v48  ;;  %v116_v3 = vld [vmem:[%s13416_s20 + $0x150] sm:$0xff]  ;;  %v117_v5 = vld [vmem:[%s13416_s20 + $0x158] sm:$0xff]  ;;  %v134_v8 = vld [vmem:[%s13416_s20 + $0x1e0] sm:$0xff]  ;;  %v8883_v10 = vpack.c.bf16 %v85_v2, %v84_v1  ;;  %v8885_v14 = vpack.c.bf16 %v103_v7, %v102_v6 }
  0x19   :  { %8878 = vmatprep.subr.bf16.mxu0 %v8877_v52  ;;  %v135_v9 = vld [vmem:[%s13416_s20 + $0x1e8] sm:$0xff]  ;;  %v86_v11 = vld [vmem:[%s13416_s20 + $0x60] sm:$0xff]  ;;  %v8915_v13 = vpack.c.bf16 %v117_v5, %v116_v3  ;;  %v104_v19 = vld [vmem:[%s13416_s20 + $0xf0] sm:$0xff] }
  0x1a   :  { %8908 = vmatpush3.bf16.msra.mxu1 %v8907_v51  ;;  %v63_v12 = vld [vmem:[%s13417_s26 + $0x8] sm:$0xff]  ;;  %v118_v16 = vld [vmem:[%s13416_s20 + $0x160] sm:$0xff]  ;;  %v8917_v18 = vpack.c.bf16 %v135_v9, %v134_v8  ;;  %v105_v20 = vld [vmem:[%s13416_s20 + $0xf8] sm:$0xff] }
  0x1b   :  { %8910 = vmatprep.subr.bf16.mxu1 %v8909_v56  ;;  %v87_v15 = vld [vmem:[%s13416_s20 + $0x68] sm:$0xff]  ;;  %236 = vmatprep.mubr.f32.mxu0 %v63_v12  ;;  %v65_v21 = vld [vmem:[%s13417_s26 + $0x18] sm:$0xff]  ;;  %v136_v22 = vld [vmem:[%s13416_s20 + $0x1f0] sm:$0xff]  ;;  %v8889_v26 = vpack.c.bf16 %v105_v20, %v104_v19 }
  0x1c   :  { %8880 = vmatpush3.bf16.msra.mxu0 %v8879_v62  ;;  %v119_v17 = vld [vmem:[%s13416_s20 + $0x168] sm:$0xff]  ;;  %v137_v23 = vld [vmem:[%s13416_s20 + $0x1f8] sm:$0xff]  ;;  %311 = vmatprep.mubr.f32.mxu1 %v65_v21  ;;  %v8887_v24 = vpack.c.bf16 %v87_v15, %v86_v11  ;;  %v88_v27 = vld [vmem:[%s13416_s20 + $0x70] sm:$0xff] }
  0x1d   :  { %8882 = vmatprep.subr.bf16.mxu0 %v8881_v0  ;;  %v8919_v25 = vpack.c.bf16 %v119_v17, %v118_v16  ;;  %v89_v28 = vld [vmem:[%s13416_s20 + $0x78] sm:$0xff]  ;;  %v120_v29 = vld [vmem:[%s13416_s20 + $0x170] sm:$0xff]  ;;  %v8921_v30 = vpack.c.bf16 %v137_v23, %v136_v22  ;;  %v154_v32 = vld [vmem:[%s13416_s20 + $0x280] sm:$0xff] }
  0x1e   :  { %8912 = vmatpush3.bf16.msra.mxu1 %v8911_v63  ;;  %v121_v31 = vld [vmem:[%s13416_s20 + $0x178] sm:$0xff]  ;;  %v155_v33 = vld [vmem:[%s13416_s20 + $0x288] sm:$0xff]  ;;  %v8891_v34 = vpack.c.bf16 %v89_v28, %v88_v27  ;;  %v138_v37 = vld [vmem:[%s13416_s20 + $0x200] sm:$0xff] }
  0x1f   :  { %8914 = vmatprep.subr.bf16.mxu1 %v8913_v4  ;;  %v8923_v35 = vpack.c.bf16 %v121_v31, %v120_v29  ;;  %v8925_v36 = vpack.c.bf16 %v155_v33, %v154_v32  ;;  %v139_v38 = vld [vmem:[%s13416_s20 + $0x208] sm:$0xff]  ;;  %v156_v39 = vld [vmem:[%s13416_s20 + $0x290] sm:$0xff]  ;;  %v157_v40 = vld [vmem:[%s13416_s20 + $0x298] sm:$0xff] }
  0x20   :  { %8884 = vmatpush3.bf16.msra.mxu0 %v8883_v10  ;;  %v62_v41 = vld [vmem:[%s13417_s26] sm:$0xff]  ;;  %v8927_v42 = vpack.c.bf16 %v139_v38, %v138_v37  ;;  %v64_v43 = vld [vmem:[%s13417_s26 + $0x10] sm:$0xff]  ;;  %v8929_v44 = vpack.c.bf16 %v157_v40, %v156_v39  ;;  %v141_v46 = vld [vmem:[%s13416_s20 + $0x218] sm:$0xff] }
  0x21   :  { %8886 = vmatprep.subr.bf16.mxu0 %v8885_v14  ;;  %v140_v45 = vld [vmem:[%s13416_s20 + $0x210] sm:$0xff]  ;;  %v158_v47 = vld [vmem:[%s13416_s20 + $0x2a0] sm:$0xff]  ;;  %v159_v48 = vld [vmem:[%s13416_s20 + $0x2a8] sm:$0xff] }
  0x22   :  { %8916 = vmatpush3.bf16.msra.mxu1 %v8915_v13  ;;  %v69_v49 = vld [vmem:[%s13417_s26 + $0x38] sm:$0xff]  ;;  %v71_v50 = vld [vmem:[%s13417_s26 + $0x48] sm:$0xff]  ;;  %v8931_v51 = vpack.c.bf16 %v141_v46, %v140_v45  ;;  %v68_v52 = vld [vmem:[%s13417_s26 + $0x30] sm:$0xff]  ;;  %v8933_v53 = vpack.c.bf16 %v159_v48, %v158_v47 }
  0x23   :  { %8918 = vmatprep.subr.bf16.mxu1 %v8917_v18  ;;  %v142_v54 = vld [vmem:[%s13416_s20 + $0x220] sm:$0xff]  ;;  %v143_v55 = vld [vmem:[%s13416_s20 + $0x228] sm:$0xff]  ;;  %v160_v57 = vld [vmem:[%s13416_s20 + $0x2b0] sm:$0xff] }
  0x24   :  { %8888 = vmatpush3.bf16.msra.mxu0 %v8887_v24  ;;  %v70_v56 = vld [vmem:[%s13417_s26 + $0x40] sm:$0xff]  ;;  %v161_v58 = vld [vmem:[%s13416_s20 + $0x2b8] sm:$0xff]  ;;  %v67_v59 = vld [vmem:[%s13417_s26 + $0x28] sm:$0xff]  ;;  %v8935_v60 = vpack.c.bf16 %v143_v55, %v142_v54 }
  0x25   :  { %8890 = vmatprep.subr.bf16.mxu0 %v8889_v26  ;;  %v8937_v61 = vpack.c.bf16 %v161_v58, %v160_v57  ;;  %v144_v62 = vld [vmem:[%s13416_s20 + $0x230] sm:$0xff]  ;;  %v145_v63 = vld [vmem:[%s13416_s20 + $0x238] sm:$0xff]  ;;  %v162_v0 = vld [vmem:[%s13416_s20 + $0x2c0] sm:$0xff] }
  0x26   :  { %8920 = vmatpush3.bf16.msra.mxu1 %v8919_v25  ;;  %v163_v1 = vld [vmem:[%s13416_s20 + $0x2c8] sm:$0xff]  ;;  %v8939_v2 = vpack.c.bf16 %v145_v63, %v144_v62  ;;  %v146_v4 = vld [vmem:[%s13416_s20 + $0x240] sm:$0xff]  ;;  %v164_v6 = vld [vmem:[%s13416_s20 + $0x2d0] sm:$0xff] }
  0x27   :  { %8922 = vmatprep.subr.bf16.mxu1 %v8921_v30  ;;  %v8941_v3 = vpack.c.bf16 %v163_v1, %v162_v0  ;;  %v147_v5 = vld [vmem:[%s13416_s20 + $0x248] sm:$0xff]  ;;  %v165_v7 = vld [vmem:[%s13416_s20 + $0x2d8] sm:$0xff]  ;;  %v148_v10 = vld [vmem:[%s13416_s20 + $0x250] sm:$0xff] }
  0x28   :  { %8892 = vmatpush3.bf16.msra.mxu0 %v8891_v34  ;;  %v8943_v8 = vpack.c.bf16 %v147_v5, %v146_v4  ;;  %v8945_v9 = vpack.c.bf16 %v165_v7, %v164_v6  ;;  %v149_v11 = vld [vmem:[%s13416_s20 + $0x258] sm:$0xff]  ;;  %v166_v12 = vld [vmem:[%s13416_s20 + $0x2e0] sm:$0xff]  ;;  %v167_v13 = vld [vmem:[%s13416_s20 + $0x2e8] sm:$0xff] }
  0x29   :  { %8926 = vmatprep.subr.bf16.mxu0 %v8925_v36  ;;  %v8947_v14 = vpack.c.bf16 %v149_v11, %v148_v10  ;;  %v8949_v15 = vpack.c.bf16 %v167_v13, %v166_v12  ;;  %v150_v16 = vld [vmem:[%s13416_s20 + $0x260] sm:$0xff]  ;;  %v151_v17 = vld [vmem:[%s13416_s20 + $0x268] sm:$0xff]  ;;  %v168_v18 = vld [vmem:[%s13416_s20 + $0x2f0] sm:$0xff] }
  0x2a   :  { %8924 = vmatpush3.bf16.msra.mxu1 %v8923_v35  ;;  %v169_v19 = vld [vmem:[%s13416_s20 + $0x2f8] sm:$0xff]  ;;  %v8951_v20 = vpack.c.bf16 %v151_v17, %v150_v16  ;;  %v152_v22 = vld [vmem:[%s13416_s20 + $0x270] sm:$0xff]  ;;  %v66_v25 = vld [vmem:[%s13417_s26 + $0x20] sm:$0xff] }
  0x2b   :  { %237 = vmatmul.mubr.f32.vlgmr.msra.gmra.mrb[0].mxu0 %v62_v41  ;;  %v8953_v21 = vpack.c.bf16 %v169_v19, %v168_v18  ;;  %v153_v23 = vld [vmem:[%s13416_s20 + $0x278] sm:$0xff]  ;;  %v72_v27 = vld [vmem:[%s13417_s26 + $0x50] sm:$0xff]  ;;  %v170_v29 = vld [vmem:[%s13418_s21] sm:$0xff] }
  0x2c   :  { %8928 = vmatpush3.bf16.msra.mxu0 %v8927_v42  ;;  %241 = vmatprep.mubr.f32.mxu0 %v69_v49  ;;  %v8955_v24 = vpack.c.bf16 %v153_v23, %v152_v22  ;;  %v73_v26 = vld [vmem:[%s13417_s26 + $0x58] sm:$0xff]  ;;  %v171_v37 = vld [vmem:[%s13418_s21 + $0x8] sm:$0xff]  ;;  %v443_v7 = vld [vmem:[%s13419_s23] sm:$0xff]  ;;  %s9775_s26 = smov 64  }
  0x2d   :  { %312 = vmatmul.mubr.f32.vlgmr.msra.gmra.mrb[0].mxu1 %v64_v43  ;;  %8930 = vmatprep.subr.bf16.mxu0 %v8929_v44  ;;  %v448_v4 = vld [vmem:[%s13419_s23 + $0x28] sm:$0xff]  ;;  %v466_v6 = vld [vmem:[%s13419_s23 + $0xb8] sm:$0xff]  ;;  %v447_v11 = vld [vmem:[%s13419_s23 + $0x20] sm:$0xff] }
  0x2e   :  { %316 = vmatprep.mubr.f32.mxu1 %v71_v50  ;;  %v465_v12 = vld [vmem:[%s13419_s23 + $0xb0] sm:$0xff]  ;;  %v484_v16 = vld [vmem:[%s13419_s23 + $0x148] sm:$0xff]  ;;  %v502_v18 = vld [vmem:[%s13419_s23 + $0x1d8] sm:$0xff] }
  0x2f   :  { %242 = vmatmul.mubr.f32.gmra.mrb[2].mxu0 %v68_v52  ;;  %v8991_v13 = vpack.c.bf16 %v465_v12, %v447_v11  ;;  %v479_v19 = vld [vmem:[%s13419_s23 + $0x120] sm:$0xff]  ;;  %v500_v11 = vld [vmem:[%s13419_s23 + $0x1c8] sm:$0xff] }
  0x30   :  { %8932 = vmatpush3.bf16.msra.mxu0 %v8931_v51  ;;  %386 = vmatprep.mubr.f32.mxu0 %v67_v59  ;;  %v483_v23 = vld [vmem:[%s13419_s23 + $0x140] sm:$0xff] }
  0x31   :  { %317 = vmatmul.mubr.f32.gmra.mrb[2].mxu1 %v70_v56  ;;  %8934 = vmatprep.subr.bf16.mxu0 %v8933_v53 }
  0x34   :  { %8936 = vmatpush3.bf16.msra.mxu0 %v8935_v60 }
  0x35   :  { %8938 = vmatprep.subr.bf16.mxu0 %v8937_v61 }
  0x38   :  { %8940 = vmatpush3.bf16.msra.mxu0 %v8939_v2  ;;  %v444_v2 = vld [vmem:[%s13419_s23 + $0x8] sm:$0xff] }
  0x39   :  { %8942 = vmatprep.subr.bf16.mxu0 %v8941_v3  ;;  %v462_v3 = vld [vmem:[%s13419_s23 + $0x98] sm:$0xff] }
  0x3a   :  { %v8957_v5 = vpack.c.bf16 %v462_v3, %v444_v2 }
  0x3c   :  { %8944 = vmatpush3.bf16.msra.mxu0 %v8943_v8  ;;  %v461_v8 = vld [vmem:[%s13419_s23 + $0x90] sm:$0xff]  ;;  %8958 = vmatprep.subr.bf16.mxu1 %v8957_v5 }
  0x3d   :  { %8946 = vmatprep.subr.bf16.mxu0 %v8945_v9  ;;  %v8989_v9 = vpack.c.bf16 %v466_v6, %v448_v4  ;;  %v8959_v10 = vpack.c.bf16 %v461_v8, %v443_v7  ;;  %v7846_v4 = vld [vmem:[%s13379_s4] ss:$0 sm:$0xff]  ;;  %v445_v5 = vld [vmem:[%s13419_s23 + $0x10] sm:$0xff] }
  0x3e   :  { %v463_v7 = vld [vmem:[%s13419_s23 + $0xa0] sm:$0xff] }
  0x3f   :  { %8960 = vmatpush1.bf16.msra.mxu1 %v8959_v10  ;;  %v451_v8 = vld [vmem:[%s13419_s23 + $0x40] sm:$0xff] }
  0x40   :  { %8948 = vmatpush3.bf16.msra.mxu0 %v8947_v14  ;;  %v480_v14 = vld [vmem:[%s13419_s23 + $0x128] sm:$0xff]  ;;  %v7847_v10 = vld [vmem:[%s13380_s5] ss:$0 sm:$0xff] }
  0x41   :  { %8950 = vmatprep.subr.bf16.mxu0 %v8949_v15  ;;  %v498_v15 = vld [vmem:[%s13419_s23 + $0x1b8] sm:$0xff] }
  0x42   :  { %v8961_v17 = vpack.c.bf16 %v498_v15, %v480_v14  ;;  %v506_v14 = vld [vmem:[%s13419_s23 + $0x1f8] sm:$0xff] }
  0x44   :  { %8952 = vmatpush3.bf16.msra.mxu0 %v8951_v20  ;;  %v497_v20 = vld [vmem:[%s13419_s23 + $0x1b0] sm:$0xff]  ;;  %8962 = vmatprep.subr.bf16.mxu1 %v8961_v17 }
  0x45   :  { %8954 = vmatprep.subr.bf16.mxu0 %v8953_v21  ;;  %v8993_v21 = vpack.c.bf16 %v502_v18, %v484_v16  ;;  %v8963_v22 = vpack.c.bf16 %v497_v20, %v479_v19  ;;  %v8975_v16 = vpack.c.bf16 %v463_v7, %v445_v5  ;;  %v481_v18 = vld [vmem:[%s13419_s23 + $0x130] sm:$0xff]  ;;  %v499_v19 = vld [vmem:[%s13419_s23 + $0x1c0] sm:$0xff]  ;;  %v504_v5 = vld [vmem:[%s13419_s23 + $0x1e8] sm:$0xff] }
  0x46   :  { %v510_v7 = vld [vmem:[%s13419_s23 + $0x218] sm:$0xff] }
  0x47   :  { %8964 = vmatpush1.bf16.msra.mxu1 %v8963_v22 }
  0x48   :  { %8956 = vmatpush3.bf16.msra.mxu0 %v8955_v24  ;;  %v501_v24 = vld [vmem:[%s13419_s23 + $0x1d0] sm:$0xff] }
  0x49   :  { %8990 = vmatprep.subr.bf16.mxu0 %v8989_v9  ;;  %v469_v9 = vld [vmem:[%s13419_s23 + $0xd0] sm:$0xff] }
  0x4a   :  { %v9023_v17 = vpack.c.bf16 %v469_v9, %v451_v8 }
  0x4b   :  { %387 = vmatmul.mubr.f32.vlgmr.msra.gmra.mrb[4].mxu0 %v66_v25  ;;  %v8995_v25 = vpack.c.bf16 %v501_v24, %v483_v23  ;;  %v487_v23 = vld [vmem:[%s13419_s23 + $0x160] sm:$0xff]  ;;  %v505_v24 = vld [vmem:[%s13419_s23 + $0x1f0] sm:$0xff] }
  0x4c   :  { %391 = vmatprep.mubr.f32.mxu0 %v73_v26  ;;  %8992 = vmatpush1.bf16.msra.mxu0 %v8991_v13  ;;  %v516_v26 = vld [vmem:[%s13419_s23 + $0x248] sm:$0xff] }
  0x4d   :  { %8994 = vmatprep.subr.bf16.mxu0 %v8993_v21  ;;  %v488_v13 = vld [vmem:[%s13419_s23 + $0x168] sm:$0xff] }
  0x4f   :  { %392 = vmatmul.mubr.f32.gmra.mrb[6].mxu0 %v72_v27  ;;  %v534_v27 = vld [vmem:[%s13419_s23 + $0x2d8] sm:$0xff] }
  0x50   :  { %8996 = vmatpush1.bf16.msra.mxu0 %v8995_v25  ;;  %v518_v25 = vld [vmem:[%s13419_s23 + $0x258] sm:$0xff] }
  0xfe   :  { %v7996_v28 = vpop.f32.mrb[0].mxu0 }
  0xff   :  { %v7997_v30 = vpop.f32.mrb[1].mxu0 }
 0x100   :  { %v8034_v31 = vpop.f32.mrb[0].mxu1  ;;  %v7998_v32 = vadd.f32 %v7997_v30, %v7996_v28  ;;  %v520_v28 = vld [vmem:[%s13419_s23 + $0x268] sm:$0xff]  ;;  %v538_v30 = vld [vmem:[%s13419_s23 + $0x2f8] sm:$0xff] }
 0x101   :  { %v8035_v33 = vpop.f32.mrb[1].mxu1 }
 0x102   :  { %v8036_v34 = vadd.f32 %v8035_v33, %v8034_v31  ;;  %v239_v35 = vadd.f32 %v7998_v32, %v170_v29  ;;  %v7999_v36 = vpop.f32.mrb[2].mxu0  ;;  %v8965_v29 = vpack.c.bf16 %v534_v27, %v516_v26  ;;  %v515_v31 = vld [vmem:[%s13419_s23 + $0x240] sm:$0xff]  ;;  %v533_v32 = vld [vmem:[%s13419_s23 + $0x2d0] sm:$0xff]  ;;  %v8997_v33 = vpack.c.bf16 %v538_v30, %v520_v28  ;;  %v536_v27 = vld [vmem:[%s13419_s23 + $0x2e8] sm:$0xff] }
 0x103   :  { %v8000_v38 = vpop.f32.mrb[3].mxu0  ;;  %v9025_v26 = vpack.c.bf16 %v506_v14, %v488_v13  ;;  %v542_v28 = vld [vmem:[%s13419_s23 + $0x318] sm:$0xff]  ;;  %v8979_v30 = vpack.c.bf16 %v499_v19, %v481_v18 }
 0x104   :  { %v8037_v39 = vpop.f32.mrb[2].mxu1  ;;  %v314_v40 = vadd.f32 %v8036_v34, %v239_v35  ;;  %v8001_v41 = vadd.f32 %v8000_v38, %v7999_v36  ;;  %v8967_v34 = vpack.c.bf16 %v533_v32, %v515_v31  ;;  %v519_v35 = vld [vmem:[%s13419_s23 + $0x260] sm:$0xff]  ;;  %v537_v36 = vld [vmem:[%s13419_s23 + $0x2f0] sm:$0xff]  ;;  %8966 = vmatprep.subr.bf16.mxu1 %v8965_v29  ;;  %8998 = vmatprep.subr.bf16.mxu0 %v8997_v33  ;;  %v552_v38 = vld [vmem:[%s13419_s23 + $0x368] sm:$0xff] }
 0x105   :  { %v8038_v42 = vpop.f32.mrb[3].mxu1  ;;  %v9027_v31 = vpack.c.bf16 %v505_v24, %v487_v23  ;;  %v517_v32 = vld [vmem:[%s13419_s23 + $0x250] sm:$0xff]  ;;  %v535_v33 = vld [vmem:[%s13419_s23 + $0x2e0] sm:$0xff]  ;;  %v522_v13 = vld [vmem:[%s13419_s23 + $0x278] sm:$0xff] }
 0x106   :  { %v8039_v43 = vadd.f32 %v8038_v42, %v8037_v39  ;;  %v244_v44 = vadd.f32 %v8001_v41, %v171_v37  ;;  %v8999_v37 = vpack.c.bf16 %v537_v36, %v519_v35  ;;  %8968 = vmatpush1.bf16.msra.mxu1 %v8967_v34  ;;  %v570_v39 = vld [vmem:[%s13419_s23 + $0x3f8] sm:$0xff]  ;;  %v8981_v35 = vpack.c.bf16 %v536_v27, %v518_v25  ;;  %v539_v23 = vld [vmem:[%s13419_s23 + $0x300] sm:$0xff]  ;;  %v545_v27 = vld [vmem:[%s13419_s23 + $0x330] sm:$0xff] }
 0x107   :  { %v8969_v41 = vpack.c.bf16 %v570_v39, %v552_v38  ;;  %v574_v42 = vld [vmem:[%s13419_s23 + $0x418] sm:$0xff]  ;;  %v541_v38 = vld [vmem:[%s13419_s23 + $0x310] sm:$0xff] }
 0x108   :  { %v319_v45 = vadd.f32 %v8039_v43, %v244_v44  ;;  %9000 = vmatpush1.bf16.msra.mxu0 %v8999_v37  ;;  %v551_v43 = vld [vmem:[%s13419_s23 + $0x360] sm:$0xff]  ;;  %v569_v44 = vld [vmem:[%s13419_s23 + $0x3f0] sm:$0xff]  ;;  %v554_v39 = vld [vmem:[%s13419_s23 + $0x378] sm:$0xff] }
 0x109   :  { %8970 = vmatprep.subr.bf16.mxu1 %v8969_v41  ;;  %v523_v37 = vld [vmem:[%s13419_s23 + $0x280] sm:$0xff]  ;;  %v560_v41 = vld [vmem:[%s13419_s23 + $0x3a8] sm:$0xff]  ;;  %v546_v18 = vld [vmem:[%s13419_s23 + $0x338] sm:$0xff] }
 0x11e   :  { %v8072_v46 = vpop.f32.mrb[4].mxu0 }
 0x11f   :  { %v8073_v47 = vpop.f32.mrb[5].mxu0 }
 0x120   :  { %v8074_v48 = vadd.f32 %v8073_v47, %v8072_v46  ;;  %v8971_v46 = vpack.c.bf16 %v569_v44, %v551_v43  ;;  %v555_v47 = vld [vmem:[%s13419_s23 + $0x380] sm:$0xff]  ;;  %v8983_v43 = vpack.c.bf16 %v535_v33, %v517_v32  ;;  %v9031_v44 = vpack.c.bf16 %v541_v38, %v523_v37  ;;  %v557_v33 = vld [vmem:[%s13419_s23 + $0x390] sm:$0xff] }
 0x121   :  { %v563_v38 = vld [vmem:[%s13419_s23 + $0x3c0] sm:$0xff] }
 0x122   :  { %v10206_v49 = vadd.f32 %v8074_v48, %v314_v40  ;;  %v8075_v50 = vpop.f32.mrb[6].mxu0  ;;  %v556_v40 = vld [vmem:[%s13419_s23 + $0x388] sm:$0xff]  ;;  %v573_v48 = vld [vmem:[%s13419_s23 + $0x410] sm:$0xff]  ;;  %8972 = vmatpush1.bf16.msra.mxu1 %v8971_v46  ;;  %v571_v46 = vld [vmem:[%s13419_s23 + $0x400] sm:$0xff] }
 0x123   :  { %v8076_v51 = vpop.f32.mrb[7].mxu0 }
 0x124   :  { %v8077_v52 = vadd.f32 %v8076_v51, %v8075_v50  ;;  %v400_v53 = vsel %vm399_vm0, %v10206_v49, 0.0  ;;  %v9003_v50 = vpack.c.bf16 %v573_v48, %v555_v47  ;;  %v446_v51 = vld [vmem:[%s13419_s23 + $0x18] sm:$0xff] }
 0x125   :  { %401 = vadd.xlane.f32.xlu0 %v400_v53  ;;  %v452_v53 = vld [vmem:[%s13419_s23 + $0x48] sm:$0xff] }
 0x126   :  { %v10210_v54 = vadd.f32 %v8077_v52, %v319_v45  ;;  %v9001_v45 = vpack.c.bf16 %v574_v42, %v556_v40  ;;  %v464_v52 = vld [vmem:[%s13419_s23 + $0xa8] sm:$0xff]  ;;  %v578_v42 = vld [vmem:[%s13419_s23 + $0x438] sm:$0xff] }
 0x127   :  { %v572_v40 = vld [vmem:[%s13419_s23 + $0x408] sm:$0xff]  ;;  %v9033_v48 = vpack.c.bf16 %v578_v42, %v560_v41 }
 0x128   :  { %v403_v55 = vsel %vm399_vm0, %v10210_v54, 0.0  ;;  %9002 = vmatprep.subr.bf16.mxu0 %v9001_v45  ;;  %v553_v45 = vld [vmem:[%s13419_s23 + $0x370] sm:$0xff]  ;;  %v8985_v47 = vpack.c.bf16 %v572_v40, %v554_v39  ;;  %v454_v40 = vld [vmem:[%s13419_s23 + $0x58] sm:$0xff]  ;;  %v472_v41 = vld [vmem:[%s13419_s23 + $0xe8] sm:$0xff] }
 0x129   :  { %404 = vadd.xlane.f32.xlu0 %v403_v55  ;;  %9004 = vmatpush1.bf16.msra.mxu0 %v9003_v50  ;;  %v8973_v55 = vpack.c.bf16 %v464_v52, %v446_v51  ;;  %v559_v50 = vld [vmem:[%s13419_s23 + $0x3a0] sm:$0xff]  ;;  %v577_v51 = vld [vmem:[%s13419_s23 + $0x430] sm:$0xff]  ;;  %v450_v52 = vld [vmem:[%s13419_s23 + $0x38] sm:$0xff] }
 0x12a   :  { %v581_v39 = vld [vmem:[%s13419_s23 + $0x450] sm:$0xff]  ;;  %v460_v42 = vld [vmem:[%s13419_s23 + $0x88] sm:$0xff] }
 0x12b   :  { %8974 = vmatprep.subr.bf16.mxu1 %v8973_v55  ;;  %v456_v55 = vld [vmem:[%s13419_s23 + $0x68] sm:$0xff] }
 0x1b2   :  { %v402_v56 = vpop.xlane.xlu0 %401 }
 0x1b3   :  { %v407_v57 = vmul.f32 0.015625, %v402_v56  ;;  %v470_v56 = vld [vmem:[%s13419_s23 + $0xd8] sm:$0xff] }
 0x1b5   :  { %v10215_v58 = vsub.f32 %v10206_v49, %v407_v57  ;;  %v9021_v57 = vpack.c.bf16 %v470_v56, %v452_v53  ;;  %v468_v53 = vld [vmem:[%s13419_s23 + $0xc8] sm:$0xff]  ;;  %v474_v56 = vld [vmem:[%s13419_s23 + $0xf8] sm:$0xff] }
 0x1b6   :  { %v405_v59 = vpop.xlane.xlu0 %404 }
 0x1b7   :  { %v408_v60 = vmul.f32 0.015625, %v405_v59  ;;  %v411_v61 = vmul.f32 %v10215_v58, %v10215_v58  ;;  %v9773_v59 = vmov 0.0   ;;  %9022 = vmatprep.subr.bf16.mxu0 %v9021_v57  ;;  %v8987_v57 = vpack.c.bf16 %v571_v46, %v553_v45  ;;  %v453_v46 = vld [vmem:[%s13419_s23 + $0x50] sm:$0xff] }
 0x1b8   :  { %657 = vmatprep.mubr.f32.mxu1 %v9773_v59  ;;  %811 = vmatprep.mubr.f32.mxu0 %v9773_v59  ;;  %v9067_v45 = vpack.c.bf16 %v581_v39, %v563_v38 }
 0x1b9   :  { %v10220_v62 = vsub.f32 %v10210_v54, %v408_v60  ;;  %v413_v63 = vsel %vm399_vm0, %v411_v61, 0.0 }
 0x1ba   :  { %414 = vadd.xlane.f32.xlu1 %v413_v63 }
 0x1bb   :  { %v412_v0 = vmul.f32 %v10220_v62, %v10220_v62 }
 0x1bd   :  { %v416_v1 = vsel %vm399_vm0, %v412_v0, 0.0 }
 0x1be   :  { %417 = vadd.xlane.f32.xlu1 %v416_v1 }
 0x247   :  { %v415_v60 = vpop.xlane.xlu1 %414 }
 0x248   :  { %v419_v61 = vmul.f32 0.015625, %v415_v60  ;;  %v9035_v60 = vpack.c.bf16 %v577_v51, %v559_v50  ;;  %v471_v50 = vld [vmem:[%s13419_s23 + $0xe0] sm:$0xff] }
 0x249   :  { %v459_v51 = vld [vmem:[%s13419_s23 + $0x80] sm:$0xff] }
 0x24a   :  { %v421_v63 = vadd.f32 1e-05, %v419_v61  ;;  %v449_v61 = vld [vmem:[%s13419_s23 + $0x30] sm:$0xff] }
 0x24b   :  { %v418_v0 = vpop.xlane.xlu1 %417 }
 0x24c   :  { %9600 = vrsqrt.f32 %v421_v63  ;;  %v420_v1 = vmul.f32 0.015625, %v418_v0  ;;  %v9005_v63 = vpack.c.bf16 %v468_v53, %v450_v52  ;;  %v9053_v0 = vpack.c.bf16 %v474_v56, %v456_v55  ;;  %v477_v52 = vld [vmem:[%s13419_s23 + $0x110] sm:$0xff]  ;;  %v490_v53 = vld [vmem:[%s13419_s23 + $0x178] sm:$0xff]  ;;  %v508_v55 = vld [vmem:[%s13419_s23 + $0x208] sm:$0xff] }
 0x24d   :  { %v496_v56 = vld [vmem:[%s13419_s23 + $0x1a8] sm:$0xff] }
 0x24e   :  { %v422_v2 = vadd.f32 1e-05, %v420_v1  ;;  %v467_v1 = vld [vmem:[%s13419_s23 + $0xc0] sm:$0xff] }
 0x24f   :  { %v9007_v8 = vpack.c.bf16 %v467_v1, %v449_v61  ;;  %v9087_v61 = vpack.c.bf16 %v477_v52, %v459_v51  ;;  %v495_v1 = vld [vmem:[%s13419_s23 + $0x1a0] sm:$0xff] }
 0x250   :  { %9602 = vrsqrt.f32 %v422_v2  ;;  %v455_v2 = vld [vmem:[%s13419_s23 + $0x60] sm:$0xff] }
 0x256   :  { %v9601_v3 = vpop.eup %9600 }
 0x257   :  { %v425_v6 = vmul.f32 %v9601_v3, %v10215_v58  ;;  %v482_v58 = vld [vmem:[%s13419_s23 + $0x138] sm:$0xff]  ;;  %v473_v3 = vld [vmem:[%s13419_s23 + $0xf0] sm:$0xff] }
 0x258   :  { %v8977_v22 = vpack.c.bf16 %v500_v11, %v482_v58  ;;  %v9055_v9 = vpack.c.bf16 %v473_v3, %v455_v2  ;;  %v503_v58 = vld [vmem:[%s13419_s23 + $0x1e0] sm:$0xff]  ;;  %v513_v2 = vld [vmem:[%s13419_s23 + $0x230] sm:$0xff]  ;;  %v526_v3 = vld [vmem:[%s13419_s23 + $0x298] sm:$0xff] }
 0x259   :  { %v433_v12 = vmul.f32 %v7846_v4, %v425_v6  ;;  %v492_v6 = vld [vmem:[%s13419_s23 + $0x188] sm:$0xff]  ;;  %v491_v11 = vld [vmem:[%s13419_s23 + $0x180] sm:$0xff] }
 0x25a   :  { %v9603_v15 = vpop.eup %9602 }
 0x25b   :  { %v10373_v20 = vadd.f32 %v7847_v10, %v433_v12  ;;  %v426_v21 = vmul.f32 %v9603_v15, %v10220_v62  ;;  %v524_v62 = vld [vmem:[%s13419_s23 + $0x288] sm:$0xff]  ;;  %v509_v12 = vld [vmem:[%s13419_s23 + $0x210] sm:$0xff]  ;;  %v9057_v15 = vpack.c.bf16 %v510_v7, %v492_v6 }
 0x25c   :  { %v9029_v36 = vpack.c.bf16 %v542_v28, %v524_v62  ;;  %v558_v62 = vld [vmem:[%s13419_s23 + $0x398] sm:$0xff]  ;;  %v576_v28 = vld [vmem:[%s13419_s23 + $0x428] sm:$0xff] }
 0x25d   :  { %v434_v29 = vmul.f32 %v7846_v4, %v426_v21  ;;  %7848 = vmatmul.mubr.msk.f32.vlgmr.msra.gmra.mrb[4].mxu1 %vm399_vm0, %v10373_v20  ;;  %7852 = vmatmul.mubr.msk.f32.vlgmr.msra.gmra.mrb[8].mxu0 %vm399_vm0, %v10373_v20  ;;  %v486_v4 = vld [vmem:[%s13419_s23 + $0x158] sm:$0xff]  ;;  %v9059_v21 = vpack.c.bf16 %v509_v12, %v491_v11  ;;  %v544_v6 = vld [vmem:[%s13419_s23 + $0x328] sm:$0xff]  ;;  %v543_v11 = vld [vmem:[%s13419_s23 + $0x320] sm:$0xff] }
 0x25e   :  { %8976 = vmatpush1.bf16.msra.mxu1 %v8975_v16  ;;  %9024 = vmatpush1.bf16.msra.mxu0 %v9023_v17  ;;  %v9009_v14 = vpack.c.bf16 %v504_v5, %v486_v4  ;;  %v540_v16 = vld [vmem:[%s13419_s23 + $0x308] sm:$0xff]  ;;  %v9041_v4 = vpack.c.bf16 %v508_v55, %v490_v53  ;;  %v9045_v12 = vpack.c.bf16 %v544_v6, %v526_v3  ;;  %v565_v53 = vld [vmem:[%s13419_s23 + $0x3d0] sm:$0xff]  ;;  %v583_v55 = vld [vmem:[%s13419_s23 + $0x460] sm:$0xff] }
 0x25f   :  { %v10404_v34 = vadd.f32 %v7847_v10, %v434_v29  ;;  %663 = vmatprep.mubr.f32.mxu1 %v9773_v59  ;;  %8978 = vmatprep.subr.bf16.mxu1 %v8977_v22  ;;  %v485_v10 = vld [vmem:[%s13419_s23 + $0x150] sm:$0xff]  ;;  %v528_v17 = vld [vmem:[%s13419_s23 + $0x2a8] sm:$0xff]  ;;  %v9013_v24 = vpack.c.bf16 %v540_v16, %v522_v13  ;;  %v562_v16 = vld [vmem:[%s13419_s23 + $0x3b8] sm:$0xff] }
 0x260   :  { %817 = vmatprep.mubr.f32.mxu0 %v9773_v59  ;;  %9026 = vmatprep.subr.bf16.mxu0 %v9025_v26  ;;  %v9011_v19 = vpack.c.bf16 %v503_v58, %v485_v10  ;;  %v521_v22 = vld [vmem:[%s13419_s23 + $0x270] sm:$0xff]  ;;  %v9061_v25 = vpack.c.bf16 %v546_v18, %v528_v17  ;;  %v527_v26 = vld [vmem:[%s13419_s23 + $0x2a0] sm:$0xff]  ;;  %v564_v29 = vld [vmem:[%s13419_s23 + $0x3c8] sm:$0xff]  ;;  %v9091_v10 = vpack.c.bf16 %v513_v2, %v495_v1 }
 0x261   :  { %7849 = vmatmul.mubr.msk.f32.gmra.mrb[6].mxu1 %vm399_vm0, %v10404_v34  ;;  %7853 = vmatmul.mubr.msk.f32.gmra.mrb[10].mxu0 %vm399_vm0, %v10404_v34  ;;  %v9063_v32 = vpack.c.bf16 %v545_v27, %v527_v26  ;;  %v532_v7 = vld [vmem:[%s13419_s23 + $0x2c8] sm:$0xff]  ;;  %v525_v58 = vld [vmem:[%s13419_s23 + $0x290] sm:$0xff]  ;;  %v579_v26 = vld [vmem:[%s13419_s23 + $0x440] sm:$0xff] }
 0x262   :  { %8980 = vmatpush1.bf16.msra.mxu1 %v8979_v30  ;;  %9028 = vmatpush1.bf16.msra.mxu0 %v9027_v31  ;;  %v582_v30 = vld [vmem:[%s13419_s23 + $0x458] sm:$0xff]  ;;  %v9015_v31 = vpack.c.bf16 %v539_v23, %v521_v22  ;;  %v580_v17 = vld [vmem:[%s13419_s23 + $0x448] sm:$0xff]  ;;  %v561_v23 = vld [vmem:[%s13419_s23 + $0x3b0] sm:$0xff] }
 0x263   :  { %8982 = vmatprep.subr.bf16.mxu1 %v8981_v35  ;;  %9030 = vmatprep.subr.bf16.mxu0 %v9029_v36  ;;  %v575_v35 = vld [vmem:[%s13419_s23 + $0x420] sm:$0xff]  ;;  %v9017_v36 = vpack.c.bf16 %v576_v28, %v558_v62  ;;  %v9065_v37 = vpack.c.bf16 %v582_v30, %v564_v29  ;;  %v568_v18 = vld [vmem:[%s13419_s23 + $0x3e8] sm:$0xff]  ;;  %v585_v62 = vld [vmem:[%s13419_s23 + $0x470] sm:$0xff]  ;;  %v9051_v30 = vpack.c.bf16 %v579_v26, %v561_v23 }
 0x264   :  { %734 = vmatprep.mubr.f32.mxu1 %v9773_v59  ;;  %965 = vmatprep.mubr.f32.mxu0 %v9773_v59  ;;  %v567_v27 = vld [vmem:[%s13419_s23 + $0x3e0] sm:$0xff]  ;;  %v458_v28 = vld [vmem:[%s13419_s23 + $0x78] sm:$0xff]  ;;  %v476_v29 = vld [vmem:[%s13419_s23 + $0x108] sm:$0xff] }
 0x266   :  { %8984 = vmatpush1.bf16.msra.mxu1 %v8983_v43  ;;  %9032 = vmatpush1.bf16.msra.mxu0 %v9031_v44  ;;  %v478_v43 = vld [vmem:[%s13419_s23 + $0x118] sm:$0xff]  ;;  %v9019_v44 = vpack.c.bf16 %v575_v35, %v557_v33  ;;  %v457_v33 = vld [vmem:[%s13419_s23 + $0x70] sm:$0xff]  ;;  %v475_v35 = vld [vmem:[%s13419_s23 + $0x100] sm:$0xff] }
 0x267   :  { %8986 = vmatprep.subr.bf16.mxu1 %v8985_v47  ;;  %9034 = vmatprep.subr.bf16.mxu0 %v9033_v48  ;;  %v9037_v47 = vpack.c.bf16 %v472_v41, %v454_v40  ;;  %v9085_v48 = vpack.c.bf16 %v478_v43, %v460_v42  ;;  %v9071_v38 = vpack.c.bf16 %v475_v35, %v457_v33  ;;  %v493_v40 = vld [vmem:[%s13419_s23 + $0x190] sm:$0xff]  ;;  %v511_v41 = vld [vmem:[%s13419_s23 + $0x220] sm:$0xff]  ;;  %v530_v42 = vld [vmem:[%s13419_s23 + $0x2b8] sm:$0xff] }
 0x268   :  { %v548_v43 = vld [vmem:[%s13419_s23 + $0x348] sm:$0xff] }
 0x26a   :  { %8988 = vmatpush1.bf16.msra.mxu1 %v8987_v57  ;;  %9036 = vmatpush1.bf16.msra.mxu0 %v9035_v60  ;;  %v514_v57 = vld [vmem:[%s13419_s23 + $0x238] sm:$0xff]  ;;  %v9039_v60 = vpack.c.bf16 %v471_v50, %v453_v46  ;;  %v529_v46 = vld [vmem:[%s13419_s23 + $0x2b0] sm:$0xff]  ;;  %v584_v50 = vld [vmem:[%s13419_s23 + $0x468] sm:$0xff] }
 0x26b   :  { %9006 = vmatprep.subr.bf16.mxu1 %v9005_v63  ;;  %9054 = vmatprep.subr.bf16.mxu0 %v9053_v0  ;;  %v489_v63 = vld [vmem:[%s13419_s23 + $0x170] sm:$0xff]  ;;  %v507_v0 = vld [vmem:[%s13419_s23 + $0x200] sm:$0xff]  ;;  %v9089_v5 = vpack.c.bf16 %v514_v57, %v496_v56  ;;  %v9083_v56 = vpack.c.bf16 %v583_v55, %v565_v53 }
 0x26d   :  { %7850 = vmatmul.mubr.msk.f32.vlgmr.msra.gmra.mrb[8].mxu1 %vm399_vm0, %v10373_v20  ;;  %7856 = vmatmul.mubr.msk.f32.vlgmr.msra.gmra.mrb[12].mxu0 %vm399_vm0, %v10373_v20 }
 0x26e   :  { %9008 = vmatpush1.bf16.msra.mxu1 %v9007_v8  ;;  %9056 = vmatpush1.bf16.msra.mxu0 %v9055_v9  ;;  %v550_v8 = vld [vmem:[%s13419_s23 + $0x358] sm:$0xff]  ;;  %v9043_v9 = vpack.c.bf16 %v507_v0, %v489_v63 }
 0x26f   :  { %740 = vmatprep.mubr.f32.mxu1 %v9773_v59  ;;  %971 = vmatprep.mubr.f32.mxu0 %v9773_v59  ;;  %v9093_v13 = vpack.c.bf16 %v550_v8, %v532_v7 }
 0x270   :  { %9010 = vmatprep.subr.bf16.mxu1 %v9009_v14  ;;  %9058 = vmatprep.subr.bf16.mxu0 %v9057_v15  ;;  %v531_v14 = vld [vmem:[%s13419_s23 + $0x2c0] sm:$0xff]  ;;  %v549_v15 = vld [vmem:[%s13419_s23 + $0x350] sm:$0xff] }
 0x271   :  { %7851 = vmatmul.mubr.msk.f32.gmra.mrb[10].mxu1 %vm399_vm0, %v10404_v34  ;;  %7857 = vmatmul.mubr.msk.f32.gmra.mrb[14].mxu0 %vm399_vm0, %v10404_v34  ;;  %v9095_v22 = vpack.c.bf16 %v549_v15, %v531_v14 }
 0x272   :  { %9012 = vmatpush1.bf16.msra.mxu1 %v9011_v19  ;;  %9060 = vmatpush1.bf16.msra.mxu0 %v9059_v21  ;;  %v586_v19 = vld [vmem:[%s13419_s23 + $0x478] sm:$0xff]  ;;  %v9047_v21 = vpack.c.bf16 %v543_v11, %v525_v58 }
 0x273   :  { %9014 = vmatprep.subr.bf16.mxu1 %v9013_v24  ;;  %9062 = vmatprep.subr.bf16.mxu0 %v9061_v25  ;;  %v9049_v24 = vpack.c.bf16 %v580_v17, %v562_v16  ;;  %v9097_v25 = vpack.c.bf16 %v586_v19, %v568_v18 }
 0x274   :  { %888 = vmatprep.mubr.f32.mxu1 %v9773_v59  ;;  %1119 = vmatprep.mubr.f32.mxu0 %v9773_v59 }
 0x276   :  { %9016 = vmatpush1.bf16.msra.mxu1 %v9015_v31  ;;  %9064 = vmatpush1.bf16.msra.mxu0 %v9063_v32  ;;  %v9099_v31 = vpack.c.bf16 %v585_v62, %v567_v27  ;;  %v9069_v32 = vpack.c.bf16 %v476_v29, %v458_v28 }
 0x277   :  { %9018 = vmatprep.subr.bf16.mxu1 %v9017_v36  ;;  %9066 = vmatprep.subr.bf16.mxu0 %v9065_v37  ;;  %v494_v36 = vld [vmem:[%s13419_s23 + $0x198] sm:$0xff]  ;;  %v512_v37 = vld [vmem:[%s13419_s23 + $0x228] sm:$0xff] }
 0x278   :  { %v9073_v39 = vpack.c.bf16 %v512_v37, %v494_v36 }
 0x27a   :  { %9020 = vmatpush1.bf16.msra.mxu1 %v9019_v44  ;;  %9068 = vmatpush1.bf16.msra.mxu0 %v9067_v45  ;;  %v9075_v44 = vpack.c.bf16 %v511_v41, %v493_v40  ;;  %v9077_v45 = vpack.c.bf16 %v548_v43, %v530_v42 }
 0x27b   :  { %9038 = vmatprep.subr.bf16.mxu1 %v9037_v47  ;;  %9086 = vmatprep.subr.bf16.mxu0 %v9085_v48  ;;  %v547_v47 = vld [vmem:[%s13419_s23 + $0x340] sm:$0xff]  ;;  %v566_v48 = vld [vmem:[%s13419_s23 + $0x3d8] sm:$0xff] }
 0x27c   :  { %v9079_v51 = vpack.c.bf16 %v547_v47, %v529_v46  ;;  %v9081_v52 = vpack.c.bf16 %v584_v50, %v566_v48 }
 0x27d   :  { %7854 = vmatmul.mubr.msk.f32.vlgmr.msra.gmra.mrb[12].mxu1 %vm399_vm0, %v10373_v20  ;;  %7860 = vmatmul.mubr.msk.f32.vlgmr.msra.gmra.mrb[16].mxu0 %vm399_vm0, %v10373_v20 }
 0x27e   :  { %9040 = vmatpush1.bf16.msra.mxu1 %v9039_v60  ;;  %9088 = vmatpush1.bf16.msra.mxu0 %v9087_v61 }
 0x27f   :  { %894 = vmatprep.mubr.f32.mxu1 %v9773_v59  ;;  %1125 = vmatprep.mubr.f32.mxu0 %v9773_v59 }
 0x280   :  { %9042 = vmatprep.subr.bf16.mxu1 %v9041_v4  ;;  %9090 = vmatprep.subr.bf16.mxu0 %v9089_v5 }
 0x281   :  { %7855 = vmatmul.mubr.msk.f32.gmra.mrb[14].mxu1 %vm399_vm0, %v10404_v34  ;;  %7861 = vmatmul.mubr.msk.f32.gmra.mrb[18].mxu0 %vm399_vm0, %v10404_v34 }
 0x282   :  { %9044 = vmatpush1.bf16.msra.mxu1 %v9043_v9  ;;  %9092 = vmatpush1.bf16.msra.mxu0 %v9091_v10 }
 0x283   :  { %9046 = vmatprep.subr.bf16.mxu1 %v9045_v12  ;;  %9094 = vmatprep.subr.bf16.mxu0 %v9093_v13 }
 0x284   :  { %1042 = vmatprep.mubr.f32.mxu1 %v9773_v59  ;;  %1273 = vmatprep.mubr.f32.mxu0 %v9773_v59 }
 0x286   :  { %9048 = vmatpush1.bf16.msra.mxu1 %v9047_v21  ;;  %9096 = vmatpush1.bf16.msra.mxu0 %v9095_v22 }
 0x287   :  { %9050 = vmatprep.subr.bf16.mxu1 %v9049_v24  ;;  %9098 = vmatprep.subr.bf16.mxu0 %v9097_v25 }
 0x28a   :  { %9052 = vmatpush1.bf16.msra.mxu1 %v9051_v30  ;;  %9100 = vmatpush1.bf16.msra.mxu0 %v9099_v31  ;;  %v10815_v30 = vld [vmem:[%s13381_s2] ss:$0 sm:$0xff] }
 0x28b   :  { %9070 = vmatprep.subr.bf16.mxu1 %v9069_v32  ;;  %8632 = vmatprep.subr.mxu0 %v9773_v59 }
 0x28d   :  { %7858 = vmatmul.mubr.msk.f32.vlgmr.msra.gmra.mrb[16].mxu1 %vm399_vm0, %v10373_v20  ;;  %7864 = vmatmul.mubr.msk.f32.vlgmr.msra.gmra.mrb[20].mxu0 %vm399_vm0, %v10373_v20 }
 0x28e   :  { %9072 = vmatpush1.bf16.msra.mxu1 %v9071_v38  ;;  %1048 = vmatprep.mubr.f32.mxu1 %v9773_v59 }
 0x28f   :  { %1279 = vmatprep.mubr.f32.mxu0 %v9773_v59  ;;  %9074 = vmatprep.subr.bf16.mxu1 %v9073_v39 }
 0x291   :  { %7859 = vmatmul.mubr.msk.f32.gmra.mrb[18].mxu1 %vm399_vm0, %v10404_v34  ;;  %7865 = vmatmul.mubr.msk.f32.gmra.mrb[22].mxu0 %vm399_vm0, %v10404_v34 }
 0x292   :  { %9076 = vmatpush1.bf16.msra.mxu1 %v9075_v44  ;;  %1196 = vmatprep.mubr.f32.mxu1 %v9773_v59 }
 0x293   :  { %9078 = vmatprep.subr.bf16.mxu1 %v9077_v45  ;;  %8634 = vmatprep.mubr.msk.f32.mxu0 %vm9774_vm1, %v9773_v59 }
 0x296   :  { %9080 = vmatpush1.bf16.msra.mxu1 %v9079_v51 }
 0x297   :  { %9082 = vmatprep.subr.bf16.mxu1 %v9081_v52 }
 0x29a   :  { %9084 = vmatpush1.bf16.msra.mxu1 %v9083_v56 }
 0x29b   :  { %8602 = vmatprep.subr.mxu1 %v9773_v59 }
 0x29d   :  { %7862 = vmatmul.mubr.msk.f32.vlgmr.msra.gmra.mrb[20].mxu1 %vm399_vm0, %v10373_v20 }
 0x29e   :  { %1202 = vmatprep.mubr.f32.mxu1 %v9773_v59 }
 0x2a1   :  { %7863 = vmatmul.mubr.msk.f32.gmra.mrb[22].mxu1 %vm399_vm0, %v10404_v34 }
 0x2a2   :  { %8604 = vmatprep.mubr.msk.f32.mxu1 %vm9774_vm1, %v9773_v59 }
 0x330   :  { %v10730_v57 = vpop.f32.mrb[4].mxu1  ;;  %v10732_v60 = vpop.f32.mrb[8].mxu0 }
 0x331   :  { %v10734_v61 = vpop.f32.mrb[5].mxu1  ;;  %v10736_v63 = vpop.f32.mrb[9].mxu0 }
 0x334   :  { %v10738_v20 = vpop.f32.mrb[6].mxu1  ;;  %v10740_v0 = vpop.f32.mrb[10].mxu0 }
 0x335   :  { %v10742_v34 = vpop.f32.mrb[7].mxu1  ;;  %v10744_v1 = vpop.f32.mrb[11].mxu0 }
 0x340   :  { %v10746_v2 = vpop.f32.mrb[8].mxu1  ;;  %v10748_v3 = vpop.f32.mrb[12].mxu0 }
 0x341   :  { %v10750_v4 = vpop.f32.mrb[9].mxu1  ;;  %v10752_v5 = vpop.f32.mrb[13].mxu0 }
 0x344   :  { %v10754_v6 = vpop.f32.mrb[10].mxu1  ;;  %v10756_v7 = vpop.f32.mrb[14].mxu0 }
 0x345   :  { %v10758_v8 = vpop.f32.mrb[11].mxu1  ;;  %v10760_v9 = vpop.f32.mrb[15].mxu0 }
 0x350   :  { %v890_v10 = vpop.f32.mrb[12].mxu1  ;;  %v10762_v58 = vpop.f32.mrb[16].mxu0 }
 0x351   :  { %v10764_v11 = vpop.f32.mrb[13].mxu1  ;;  %v10766_v12 = vpop.f32.mrb[17].mxu0  ;;  %8603 = vmatpush3.xpose.msk.msra.mxu1 %vm399_vm0, %v890_v10 }
 0x352   :  { %8607 = vmatprep.subr.mxu1 %v9773_v59 }
 0x354   :  { %v896_v13 = vpop.f32.mrb[14].mxu1  ;;  %v10770_v14 = vpop.f32.mrb[18].mxu0  ;;  %8605 = vmatmul.mubr.msk.f32.vlgmr.msra.gmra.mrb[24].mxu1 %vm399_vm0, %v10730_v57 }
 0x355   :  { %v10774_v15 = vpop.f32.mrb[15].mxu1  ;;  %v10776_v16 = vpop.f32.mrb[19].mxu0  ;;  %8608 = vmatpush3.xpose.msk.msra.mxu1 %vm399_vm0, %v896_v13  ;;  %8609 = vmatprep.mubr.msk.f32.mxu1 %vm9774_vm1, %v9773_v59 }
 0x356   :  { %8612 = vmatprep.subr.mxu1 %v9773_v59 }
 0x358   :  { %8610 = vmatmul.mubr.msk.f32.vlgmr.msra.gmra.mrb[26].mxu1 %vm399_vm0, %v10738_v20 }
 0x359   :  { %8613 = vmatpush3.msra.mxu1 %v10762_v58  ;;  %8614 = vmatprep.mubr.msk.f32.mxu1 %vm9774_vm1, %v9773_v59 }
 0x35a   :  { %8617 = vmatprep.subr.mxu1 %v9773_v59 }
 0x360   :  { %v10788_v17 = vpop.f32.mrb[16].mxu1  ;;  %v10790_v18 = vpop.f32.mrb[20].mxu0 }
 0x361   :  { %v10792_v19 = vpop.f32.mrb[17].mxu1  ;;  %v10794_v21 = vpop.f32.mrb[21].mxu0 }
 0x364   :  { %v10796_v22 = vpop.f32.mrb[18].mxu1  ;;  %v10798_v23 = vpop.f32.mrb[22].mxu0 }
 0x365   :  { %v10800_v24 = vpop.f32.mrb[19].mxu1  ;;  %v10802_v25 = vpop.f32.mrb[23].mxu0 }
 0x370   :  { %v10804_v26 = vpop.f32.mrb[20].mxu1 }
 0x371   :  { %v10806_v27 = vpop.f32.mrb[21].mxu1 }
 0x374   :  { %v10808_v62 = vpop.f32.mrb[22].mxu1 }
 0x375   :  { %v10810_v28 = vpop.f32.mrb[23].mxu1 }
 0x427   :  { %v1359_v29 = vpop.f32.mrb[24].mxu1 }
 0x428   :  { %v1439_v31 = vmul.f32 0.125, %v1359_v29  ;;  %v8606_v32 = vpop.f32.mrb[25].mxu1 }
 0x42a   :  { %v1447_v33 = vadd.f32 %v10815_v30, %v1439_v31 }
 0x42b   :  { %v1435_v35 = vpop.f32.mrb[26].mxu1 }
 0x42c   :  { %v1440_v36 = vmul.f32 0.125, %v1435_v35  ;;  %v8611_v37 = vpop.f32.mrb[27].mxu1  ;;  %v1450_v38 = vsel %vm1449_vm2, %v1447_v33, -inf }
 0x42d   :  { %1451 = vmax.xlane.f32.xlu0 %v1450_v38 }
 0x42e   :  { %v1448_v39 = vadd.f32 %v10815_v30, %v1440_v36 }
 0x430   :  { %v1453_v40 = vsel %vm1449_vm2, %v1448_v39, -inf }
 0x431   :  { %1454 = vmax.xlane.f32.xlu1 %v1453_v40 }
 0x4ba   :  { %v1452_v41 = vpop.xlane.xlu0 %1451 }
 0x4bb   :  { %v1456_v42 = vsub.f32 %v1447_v33, %v1452_v41 }
 0x4bd   :  { %v1458_v43 = vmul.f32 1.442695, %v1456_v42 }
 0x4be   :  { %v1455_v44 = vpop.xlane.xlu1 %1454 }
 0x4bf   :  { %9604 = vpow2.f32 %v1458_v43  ;;  %v1457_v45 = vsub.f32 %v1448_v39, %v1455_v44 }
 0x4c1   :  { %v1460_v46 = vmul.f32 1.442695, %v1457_v45 }
 0x4c3   :  { %9606 = vpow2.f32 %v1460_v46 }
 0x4c9   :  { %v9605_v47 = vpop.eup %9604 }
 0x4ca   :  { %v1462_v48 = vsel %vm1449_vm2, %v9605_v47, 0.0 }
 0x4cb   :  { %1463 = vadd.xlane.f32.xlu0 %v1462_v48 }
 0x4cd   :  { %v9607_v50 = vpop.eup %9606 }
 0x4ce   :  { %v1465_v51 = vsel %vm1449_vm2, %v9607_v50, 0.0 }
 0x4cf   :  { %1466 = vadd.xlane.f32.xlu1 %v1465_v51 }
 0x4e0   :  { %1620 = vrot.lane.b32.xlu1 %v10730_v57, %s9775_s26 }
 0x4e1   :  { %1622 = vrot.lane.b32.xlu0 %v890_v10, %s9775_s26 }
 0x4e4   :  { %1700 = vrot.lane.b32.xlu1 %v896_v13, %s9775_s26 }
 0x4e8   :  { %1698 = vrot.lane.b32.xlu1 %v10738_v20, %s9775_s26 }
 0x558   :  { %v1464_v52 = vpop.xlane.xlu0 %1463 }
 0x559   :  { %9608 = vrcp.f32 %v1464_v52 }
 0x55c   :  { %v1467_v53 = vpop.xlane.xlu1 %1466  ;;  %v1623_v20 = vpop.permute.xlu0 %1622 }
 0x55d   :  { %9610 = vrcp.f32 %v1467_v53 }
 0x560   :  { %v1621_v57 = vpop.permute.xlu1 %1620 }
 0x563   :  { %v9609_v55 = vpop.eup %9608 }
 0x564   :  { %v1469_v56 = vmul.f32 %v9609_v55, %v9605_v47  ;;  %v1701_v13 = vpop.permute.xlu1 %1700 }
 0x566   :  { %8615 = vmatmul.mubr.msk.f32.vlgmr.msra.gmra.mrb[28].mxu1 %vm1449_vm2, %v1469_v56 }
 0x567   :  { %v9611_v29 = vpop.eup %9610  ;;  %8618 = vmatpush3.msra.mxu1 %v10770_v14  ;;  %8619 = vmatprep.mubr.msk.f32.mxu1 %vm9774_vm1, %v9773_v59 }
 0x568   :  { %v1471_v10 = vmul.f32 %v9611_v29, %v9607_v50  ;;  %8622 = vmatprep.subr.mxu1 %v9773_v59  ;;  %v1699_v31 = vpop.permute.xlu1 %1698 }
 0x56a   :  { %8620 = vmatmul.mubr.msk.f32.vlgmr.msra.gmra.mrb[30].mxu1 %vm1449_vm2, %v1471_v10 }
 0x56b   :  { %8624 = vmatprep.mubr.msk.f32.mxu1 %vm9774_vm1, %v9773_v59 }
 0x56e   :  { %8623 = vmatpush3.xpose.msk.msra.mxu1 %vm399_vm0, %v1623_v20 }
 0x56f   :  { %8627 = vmatprep.subr.mxu1 %v9773_v59 }
 0x571   :  { %8625 = vmatmul.mubr.msk.f32.vlgmr.msra.gmra.mrb[32].mxu1 %vm399_vm0, %v1621_v57 }
 0x572   :  { %8628 = vmatpush3.xpose.msk.msra.mxu1 %vm399_vm0, %v1701_v13  ;;  %8629 = vmatprep.mubr.msk.f32.mxu1 %vm9774_vm1, %v9773_v59 }
 0x573   :  { %8637 = vmatprep.subr.mxu1 %v9773_v59 }
 0x575   :  { %8630 = vmatmul.mubr.msk.f32.vlgmr.msra.gmra.mrb[34].mxu1 %vm399_vm0, %v1699_v31 }
 0x576   :  { %8639 = vmatprep.mubr.msk.f32.mxu1 %vm9774_vm1, %v9773_v59 }
 0x639   :  { %v1541_v32 = vpop.f32.mrb[28].mxu1 }
 0x63a   :  { %1618 = vst.msk [vmem:[#allocation2] sm:$0xff] %vm399_vm0, %v1541_v32  ;;  %v8616_v33 = vpop.f32.mrb[29].mxu1 }
 0x63d   :  { %v1614_v35 = vpop.f32.mrb[30].mxu1 }
 0x63e   :  { %1619 = vst.msk [vmem:[#allocation2 + $0x30] sm:$0xff] %vm399_vm0, %v1614_v35  ;;  %v8621_v36 = vpop.f32.mrb[31].mxu1 }
 0x644   :  { %v1694_v37 = vpop.f32.mrb[32].mxu1 }
 0x645   :  { %v1776_v38 = vmul.f32 0.125, %v1694_v37  ;;  %v8626_v39 = vpop.f32.mrb[33].mxu1 }
 0x647   :  { %v1778_v40 = vadd.f32 %v10815_v30, %v1776_v38 }
 0x648   :  { %v1772_v41 = vpop.f32.mrb[34].mxu1 }
 0x649   :  { %v1777_v42 = vmul.f32 0.125, %v1772_v41  ;;  %v8631_v43 = vpop.f32.mrb[35].mxu1  ;;  %v1780_v44 = vsel %vm1449_vm2, %v1778_v40, -inf }
 0x64a   :  { %1781 = vmax.xlane.f32.xlu0 %v1780_v44 }
 0x64b   :  { %v1779_v45 = vadd.f32 %v10815_v30, %v1777_v42 }
 0x64d   :  { %v1783_v46 = vsel %vm1449_vm2, %v1779_v45, -inf }
 0x64e   :  { %1784 = vmax.xlane.f32.xlu1 %v1783_v46 }
 0x65f   :  { %1880 = vrot.lane.b32.xlu1 %v10770_v14, %s9775_s26 }
 0x6d7   :  { %v1782_v47 = vpop.xlane.xlu0 %1781 }
 0x6d8   :  { %v1786_v48 = vsub.f32 %v1778_v40, %v1782_v47 }
 0x6da   :  { %v1788_v50 = vmul.f32 1.442695, %v1786_v48 }
 0x6db   :  { %v1785_v51 = vpop.xlane.xlu1 %1784 }
 0x6dc   :  { %9612 = vpow2.f32 %v1788_v50  ;;  %v1787_v52 = vsub.f32 %v1779_v45, %v1785_v51 }
 0x6de   :  { %v1790_v53 = vmul.f32 1.442695, %v1787_v52 }
 0x6df   :  { %v1881_v55 = vpop.permute.xlu1 %1880 }
 0x6e0   :  { %9614 = vpow2.f32 %v1790_v53  ;;  %8638 = vmatpush3.msra.mxu1 %v1881_v55 }
 0x6e1   :  { %8647 = vmatprep.subr.mxu1 %v9773_v59 }
 0x6e6   :  { %v9613_v56 = vpop.eup %9612 }
 0x6e7   :  { %v1792_v29 = vsel %vm1449_vm2, %v9613_v56, 0.0 }
 0x6e8   :  { %1793 = vadd.xlane.f32.xlu0 %v1792_v29 }
 0x6ea   :  { %v9615_v57 = vpop.eup %9614 }
 0x6eb   :  { %v1795_v10 = vsel %vm1449_vm2, %v9615_v57, 0.0 }
 0x6ec   :  { %1796 = vadd.xlane.f32.xlu0 %v1795_v10 }
 0x702   :  { %1803 = vrot.lane.b32.xlu0 %v10762_v58, %s9775_s26 }
 0x775   :  { %v1794_v14 = vpop.xlane.xlu0 %1793 }
 0x776   :  { %9616 = vrcp.f32 %v1794_v14 }
 0x779   :  { %v1797_v20 = vpop.xlane.xlu0 %1796 }
 0x77a   :  { %9618 = vrcp.f32 %v1797_v20 }
 0x77d   :  { %v1804_v13 = vpop.permute.xlu0 %1803 }
 0x77e   :  { %8633 = vmatpush3.msra.mxu0 %v1804_v13 }
 0x77f   :  { %8642 = vmatprep.subr.mxu0 %v9773_v59 }
 0x780   :  { %v9617_v31 = vpop.eup %9616 }
 0x781   :  { %v1799_v32 = vmul.f32 %v9617_v31, %v9613_v56 }
 0x783   :  { %8635 = vmatmul.mubr.msk.f32.vlgmr.msra.gmra.mrb[24].mxu0 %vm1449_vm2, %v1799_v32 }
 0x784   :  { %v9619_v33 = vpop.eup %9618  ;;  %8644 = vmatprep.mubr.msk.f32.mxu0 %vm9774_vm1, %v9773_v59 }
 0x785   :  { %v1801_v35 = vmul.f32 %v9619_v33, %v9615_v57  ;;  %8643 = vmatpush3.xpose.msk.msra.mxu0 %vm399_vm0, %v10764_v11 }
 0x786   :  { %8652 = vmatprep.subr.mxu0 %v9773_v59 }
 0x787   :  { %8640 = vmatmul.mubr.msk.f32.vlgmr.msra.gmra.mrb[36].mxu1 %vm1449_vm2, %v1801_v35 }
 0x788   :  { %8648 = vmatpush3.xpose.msk.msra.mxu1 %vm399_vm0, %v10774_v15  ;;  %8645 = vmatmul.mubr.msk.f32.vlgmr.msra.gmra.mrb[26].mxu0 %vm399_vm0, %v10734_v61 }
 0x789   :  { %8653 = vmatpush3.msra.mxu0 %v10766_v12  ;;  %8649 = vmatprep.mubr.msk.f32.mxu1 %vm9774_vm1, %v9773_v59 }
 0x78a   :  { %8657 = vmatprep.subr.mxu1 %v9773_v59  ;;  %8654 = vmatprep.mubr.msk.f32.mxu0 %vm9774_vm1, %v9773_v59 }
 0x78b   :  { %8650 = vmatmul.mubr.msk.f32.vlgmr.msra.gmra.mrb[38].mxu1 %vm399_vm0, %v10742_v34  ;;  %8662 = vmatprep.subr.mxu0 %v9773_v59 }
 0x78c   :  { %8658 = vmatpush3.msra.mxu1 %v10776_v16  ;;  %8659 = vmatprep.mubr.msk.f32.mxu1 %vm9774_vm1, %v9773_v59 }
 0x78d   :  { %8667 = vmatprep.subr.mxu1 %v9773_v59 }
 0x856   :  { %v10885_v58 = vpop.f32.mrb[24].mxu0 }
 0x857   :  { %v8636_v36 = vpop.f32.mrb[25].mxu0 }
 0x85a   :  { %v10887_v37 = vpop.f32.mrb[36].mxu1 }
 0x85b   :  { %v8641_v38 = vpop.f32.mrb[37].mxu1  ;;  %v2039_v39 = vpop.f32.mrb[26].mxu0 }
 0x85c   :  { %v2119_v40 = vmul.f32 0.125, %v2039_v39  ;;  %v8646_v41 = vpop.f32.mrb[27].mxu0 }
 0x85e   :  { %v2115_v42 = vpop.f32.mrb[38].mxu1  ;;  %v2121_v43 = vadd.f32 %v10815_v30, %v2119_v40 }
 0x85f   :  { %v2120_v44 = vmul.f32 0.125, %v2115_v42  ;;  %v8651_v45 = vpop.f32.mrb[39].mxu1 }
 0x860   :  { %v2123_v46 = vsel %vm1449_vm2, %v2121_v43, -inf }
 0x861   :  { %2124 = vmax.xlane.f32.xlu1 %v2123_v46  ;;  %v2122_v47 = vadd.f32 %v10815_v30, %v2120_v44 }
 0x863   :  { %v2126_v48 = vsel %vm1449_vm2, %v2122_v47, -inf }
 0x864   :  { %2127 = vmax.xlane.f32.xlu0 %v2126_v48 }
 0x872   :  { %2293 = vrot.lane.b32.xlu1 %v10734_v61, %s9775_s26 }
 0x876   :  { %2373 = vrot.lane.b32.xlu1 %v10774_v15, %s9775_s26 }
 0x8ee   :  { %v2125_v50 = vpop.xlane.xlu1 %2124 }
 0x8ef   :  { %v2129_v51 = vsub.f32 %v2121_v43, %v2125_v50 }
 0x8f1   :  { %v2131_v52 = vmul.f32 1.442695, %v2129_v51  ;;  %v2128_v53 = vpop.xlane.xlu0 %2127 }
 0x8f2   :  { %v2130_v55 = vsub.f32 %v2122_v47, %v2128_v53  ;;  %v2294_v61 = vpop.permute.xlu1 %2293 }
 0x8f3   :  { %9620 = vpow2.f32 %v2131_v52 }
 0x8f4   :  { %v2133_v56 = vmul.f32 1.442695, %v2130_v55 }
 0x8f6   :  { %9622 = vpow2.f32 %v2133_v56  ;;  %v2374_v15 = vpop.permute.xlu1 %2373 }
 0x8fd   :  { %v9621_v29 = vpop.eup %9620 }
 0x8fe   :  { %v2135_v57 = vsel %vm1449_vm2, %v9621_v29, 0.0 }
 0x8ff   :  { %2136 = vadd.xlane.f32.xlu0 %v2135_v57 }
 0x900   :  { %v9623_v10 = vpop.eup %9622 }
 0x901   :  { %v2138_v14 = vsel %vm1449_vm2, %v9623_v10, 0.0 }
 0x902   :  { %2139 = vadd.xlane.f32.xlu1 %v2138_v14 }
 0x913   :  { %2371 = vrot.lane.b32.xlu1 %v10742_v34, %s9775_s26 }
 0x915   :  { %2295 = vrot.lane.b32.xlu0 %v10764_v11, %s9775_s26 }
 0x98c   :  { %v2137_v20 = vpop.xlane.xlu0 %2136 }
 0x98d   :  { %9624 = vrcp.f32 %v2137_v20 }
 0x98f   :  { %v2140_v13 = vpop.xlane.xlu1 %2139 }
 0x990   :  { %9626 = vrcp.f32 %v2140_v13  ;;  %v2296_v35 = vpop.permute.xlu0 %2295 }
 0x993   :  { %v2372_v34 = vpop.permute.xlu1 %2371 }
 0x997   :  { %v9625_v31 = vpop.eup %9624 }
 0x998   :  { %v2142_v32 = vmul.f32 %v9625_v31, %v9621_v29 }
 0x99a   :  { %v9627_v33 = vpop.eup %9626  ;;  %8655 = vmatmul.mubr.msk.f32.vlgmr.msra.gmra.mrb[28].mxu0 %vm1449_vm2, %v2142_v32 }
 0x99b   :  { %v2144_v36 = vmul.f32 %v9627_v33, %v9623_v10  ;;  %8663 = vmatpush3.xpose.msk.msra.mxu0 %vm399_vm0, %v2296_v35  ;;  %8664 = vmatprep.mubr.msk.f32.mxu0 %vm9774_vm1, %v9773_v59 }
 0x99c   :  { %8672 = vmatprep.subr.mxu0 %v9773_v59 }
 0x99d   :  { %8660 = vmatmul.mubr.msk.f32.vlgmr.msra.gmra.mrb[40].mxu1 %vm1449_vm2, %v2144_v36 }
 0x99e   :  { %8668 = vmatpush3.xpose.msk.msra.mxu1 %vm399_vm0, %v2374_v15  ;;  %8665 = vmatmul.mubr.msk.f32.vlgmr.msra.gmra.mrb[30].mxu0 %vm399_vm0, %v2294_v61 }
 0x99f   :  { %8669 = vmatprep.mubr.msk.f32.mxu1 %vm9774_vm1, %v9773_v59  ;;  %8677 = vmatprep.subr.mxu1 %v9773_v59 }
 0x9a0   :  { %8674 = vmatprep.mubr.msk.f32.mxu0 %vm9774_vm1, %v9773_v59 }
 0x9a1   :  { %8670 = vmatmul.mubr.msk.f32.vlgmr.msra.gmra.mrb[42].mxu1 %vm399_vm0, %v2372_v34 }
 0x9a2   :  { %8679 = vmatprep.mubr.msk.f32.mxu1 %vm9774_vm1, %v9773_v59 }
 0xa6d   :  { %v2214_v11 = vpop.f32.mrb[28].mxu0 }
 0xa6e   :  { %2291 = vst.msk [vmem:[#allocation2 + $0x8] sm:$0xff] %vm399_vm0, %v2214_v11  ;;  %v8656_v38 = vpop.f32.mrb[29].mxu0 }
 0xa70   :  { %v2287_v39 = vpop.f32.mrb[40].mxu1 }
 0xa71   :  { %2292 = vst.msk [vmem:[#allocation2 + $0x38] sm:$0xff] %vm399_vm0, %v2287_v39  ;;  %v8661_v40 = vpop.f32.mrb[41].mxu1  ;;  %v2367_v41 = vpop.f32.mrb[30].mxu0 }
 0xa72   :  { %v2449_v42 = vmul.f32 0.125, %v2367_v41  ;;  %v8666_v43 = vpop.f32.mrb[31].mxu0 }
 0xa74   :  { %v2445_v44 = vpop.f32.mrb[42].mxu1  ;;  %v2451_v45 = vadd.f32 %v10815_v30, %v2449_v42 }
 0xa75   :  { %v2450_v46 = vmul.f32 0.125, %v2445_v44  ;;  %v8671_v47 = vpop.f32.mrb[43].mxu1 }
 0xa76   :  { %v2453_v48 = vsel %vm1449_vm2, %v2451_v45, -inf }
 0xa77   :  { %2454 = vmax.xlane.f32.xlu0 %v2453_v48  ;;  %v2452_v50 = vadd.f32 %v10815_v30, %v2450_v46 }
 0xa79   :  { %v2456_v51 = vsel %vm1449_vm2, %v2452_v50, -inf }
 0xa7a   :  { %2457 = vmax.xlane.f32.xlu1 %v2456_v51 }
 0xa8b   :  { %2553 = vrot.lane.b32.xlu1 %v10776_v16, %s9775_s26 }
 0xb04   :  { %v2455_v52 = vpop.xlane.xlu0 %2454 }
 0xb05   :  { %v2459_v53 = vsub.f32 %v2451_v45, %v2455_v52 }
 0xb07   :  { %v2461_v55 = vmul.f32 1.442695, %v2459_v53  ;;  %v2458_v56 = vpop.xlane.xlu1 %2457 }
 0xb08   :  { %v2460_v29 = vsub.f32 %v2452_v50, %v2458_v56 }
 0xb09   :  { %9628 = vpow2.f32 %v2461_v55 }
 0xb0a   :  { %v2463_v57 = vmul.f32 1.442695, %v2460_v29 }
 0xb0b   :  { %v2554_v10 = vpop.permute.xlu1 %2553 }
 0xb0c   :  { %9630 = vpow2.f32 %v2463_v57  ;;  %8678 = vmatpush3.msra.mxu1 %v2554_v10 }
 0xb0d   :  { %8687 = vmatprep.subr.mxu1 %v9773_v59 }
 0xb13   :  { %v9629_v14 = vpop.eup %9628 }
 0xb14   :  { %v2465_v61 = vsel %vm1449_vm2, %v9629_v14, 0.0 }
 0xb15   :  { %2466 = vadd.xlane.f32.xlu0 %v2465_v61 }
 0xb16   :  { %v9631_v15 = vpop.eup %9630 }
 0xb17   :  { %v2468_v20 = vsel %vm1449_vm2, %v9631_v15, 0.0 }
 0xb19   :  { %2469 = vadd.xlane.f32.xlu0 %v2468_v20 }
 0xb2f   :  { %2476 = vrot.lane.b32.xlu0 %v10766_v12, %s9775_s26 }
 0xba2   :  { %v2467_v16 = vpop.xlane.xlu0 %2466 }
 0xba3   :  { %9632 = vrcp.f32 %v2467_v16 }
 0xba6   :  { %v2470_v13 = vpop.xlane.xlu0 %2469 }
 0xba7   :  { %9634 = vrcp.f32 %v2470_v13 }
 0xbaa   :  { %v2477_v31 = vpop.permute.xlu0 %2476 }
 0xbab   :  { %8673 = vmatpush3.msra.mxu0 %v2477_v31 }
 0xbac   :  { %8682 = vmatprep.subr.mxu0 %v9773_v59 }
 0xbad   :  { %v9633_v32 = vpop.eup %9632 }
 0xbae   :  { %v2472_v33 = vmul.f32 %v9633_v32, %v9629_v14 }
 0xbb0   :  { %8675 = vmatmul.mubr.msk.f32.vlgmr.msra.gmra.mrb[32].mxu0 %vm1449_vm2, %v2472_v33 }
 0xbb1   :  { %v9635_v35 = vpop.eup %9634  ;;  %8684 = vmatprep.mubr.msk.f32.mxu0 %vm9774_vm1, %v9773_v59 }
 0xbb2   :  { %v2474_v36 = vmul.f32 %v9635_v35, %v9631_v15  ;;  %8683 = vmatpush3.xpose.msk.msra.mxu0 %vm399_vm0, %v10748_v3 }
 0xbb3   :  { %8692 = vmatprep.subr.mxu0 %v9773_v59 }
 0xbb4   :  { %8680 = vmatmul.mubr.msk.f32.vlgmr.msra.gmra.mrb[44].mxu1 %vm1449_vm2, %v2474_v36 }
 0xbb5   :  { %8688 = vmatpush3.xpose.msk.msra.mxu1 %vm399_vm0, %v10756_v7  ;;  %8685 = vmatmul.mubr.msk.f32.vlgmr.msra.gmra.mrb[34].mxu0 %vm399_vm0, %v10746_v2 }
 0xbb6   :  { %8693 = vmatpush3.msra.mxu0 %v10804_v26  ;;  %8689 = vmatprep.mubr.msk.f32.mxu1 %vm9774_vm1, %v9773_v59 }
 0xbb7   :  { %8697 = vmatprep.subr.mxu1 %v9773_v59  ;;  %8694 = vmatprep.mubr.msk.f32.mxu0 %vm9774_vm1, %v9773_v59 }
 0xbb8   :  { %8690 = vmatmul.mubr.msk.f32.vlgmr.msra.gmra.mrb[46].mxu1 %vm399_vm0, %v10754_v6  ;;  %8702 = vmatprep.subr.mxu0 %v9773_v59 }
 0xbb9   :  { %8698 = vmatpush3.msra.mxu1 %v10808_v62  ;;  %8699 = vmatprep.mubr.msk.f32.mxu1 %vm9774_vm1, %v9773_v59 }
 0xbba   :  { %8707 = vmatprep.subr.mxu1 %v9773_v59 }
 0xc83   :  { %v10957_v12 = vpop.f32.mrb[32].mxu0 }
 0xc84   :  { %v8676_v34 = vpop.f32.mrb[33].mxu0 }
 0xc87   :  { %v10959_v11 = vpop.f32.mrb[44].mxu1 }
 0xc88   :  { %v8681_v38 = vpop.f32.mrb[45].mxu1  ;;  %v2711_v39 = vpop.f32.mrb[34].mxu0 }
 0xc89   :  { %v2791_v40 = vmul.f32 0.125, %v2711_v39  ;;  %v8686_v41 = vpop.f32.mrb[35].mxu0 }
 0xc8b   :  { %v2787_v42 = vpop.f32.mrb[46].mxu1  ;;  %v2793_v43 = vadd.f32 %v10815_v30, %v2791_v40 }
 0xc8c   :  { %v2792_v44 = vmul.f32 0.125, %v2787_v42  ;;  %v8691_v45 = vpop.f32.mrb[47].mxu1 }
 0xc8d   :  { %v2795_v46 = vsel %vm1449_vm2, %v2793_v43, -inf }
 0xc8e   :  { %2796 = vmax.xlane.f32.xlu1 %v2795_v46  ;;  %v2794_v47 = vadd.f32 %v10815_v30, %v2792_v44 }
 0xc90   :  { %v2798_v48 = vsel %vm1449_vm2, %v2794_v47, -inf }
 0xc91   :  { %2799 = vmax.xlane.f32.xlu0 %v2798_v48 }
 0xc9f   :  { %2965 = vrot.lane.b32.xlu1 %v10746_v2, %s9775_s26 }
 0xca3   :  { %3045 = vrot.lane.b32.xlu1 %v10756_v7, %s9775_s26 }
 0xd1b   :  { %v2797_v50 = vpop.xlane.xlu1 %2796 }
 0xd1c   :  { %v2801_v51 = vsub.f32 %v2793_v43, %v2797_v50 }
 0xd1e   :  { %v2803_v52 = vmul.f32 1.442695, %v2801_v51  ;;  %v2800_v53 = vpop.xlane.xlu0 %2799 }
 0xd1f   :  { %v2802_v55 = vsub.f32 %v2794_v47, %v2800_v53  ;;  %v2966_v2 = vpop.permute.xlu1 %2965 }
 0xd20   :  { %9636 = vpow2.f32 %v2803_v52 }
 0xd21   :  { %v2805_v56 = vmul.f32 1.442695, %v2802_v55 }
 0xd23   :  { %9638 = vpow2.f32 %v2805_v56  ;;  %v3046_v7 = vpop.permute.xlu1 %3045 }
 0xd2a   :  { %v9637_v29 = vpop.eup %9636 }
 0xd2b   :  { %v2807_v57 = vsel %vm1449_vm2, %v9637_v29, 0.0 }
 0xd2c   :  { %2808 = vadd.xlane.f32.xlu0 %v2807_v57 }
 0xd2d   :  { %v9639_v10 = vpop.eup %9638 }
 0xd2e   :  { %v2810_v14 = vsel %vm1449_vm2, %v9639_v10, 0.0 }
 0xd2f   :  { %2811 = vadd.xlane.f32.xlu1 %v2810_v14 }
 0xd40   :  { %3043 = vrot.lane.b32.xlu1 %v10754_v6, %s9775_s26 }
 0xd42   :  { %2967 = vrot.lane.b32.xlu0 %v10748_v3, %s9775_s26 }
 0xdb9   :  { %v2809_v61 = vpop.xlane.xlu0 %2808 }
 0xdba   :  { %9640 = vrcp.f32 %v2809_v61 }
 0xdbc   :  { %v2812_v15 = vpop.xlane.xlu1 %2811 }
 0xdbd   :  { %9642 = vrcp.f32 %v2812_v15  ;;  %v2968_v31 = vpop.permute.xlu0 %2967 }
 0xdc0   :  { %v3044_v3 = vpop.permute.xlu1 %3043 }
 0xdc4   :  { %v9641_v20 = vpop.eup %9640 }
 0xdc5   :  { %v2814_v16 = vmul.f32 %v9641_v20, %v9637_v29 }
 0xdc7   :  { %v9643_v13 = vpop.eup %9642  ;;  %8695 = vmatmul.mubr.msk.f32.vlgmr.msra.gmra.mrb[36].mxu0 %vm1449_vm2, %v2814_v16 }
 0xdc8   :  { %v2816_v32 = vmul.f32 %v9643_v13, %v9639_v10  ;;  %8703 = vmatpush3.xpose.msk.msra.mxu0 %vm399_vm0, %v2968_v31  ;;  %8704 = vmatprep.mubr.msk.f32.mxu0 %vm9774_vm1, %v9773_v59 }
 0xdc9   :  { %8712 = vmatprep.subr.mxu0 %v9773_v59 }
 0xdca   :  { %8700 = vmatmul.mubr.msk.f32.vlgmr.msra.gmra.mrb[48].mxu1 %vm1449_vm2, %v2816_v32 }
 0xdcb   :  { %8708 = vmatpush3.xpose.msk.msra.mxu1 %vm399_vm0, %v3046_v7  ;;  %8705 = vmatmul.mubr.msk.f32.vlgmr.msra.gmra.mrb[38].mxu0 %vm399_vm0, %v2966_v2 }
 0xdcc   :  { %8709 = vmatprep.mubr.msk.f32.mxu1 %vm9774_vm1, %v9773_v59  ;;  %8717 = vmatprep.subr.mxu1 %v9773_v59 }
 0xdcd   :  { %8714 = vmatprep.mubr.msk.f32.mxu0 %vm9774_vm1, %v9773_v59 }
 0xdce   :  { %8710 = vmatmul.mubr.msk.f32.vlgmr.msra.gmra.mrb[50].mxu1 %vm399_vm0, %v3044_v3 }
 0xdcf   :  { %8719 = vmatprep.mubr.msk.f32.mxu1 %vm9774_vm1, %v9773_v59 }
 0xe9a   :  { %v2886_v6 = vpop.f32.mrb[36].mxu0 }
 0xe9b   :  { %2963 = vst.msk [vmem:[#allocation2 + $0x10] sm:$0xff] %vm399_vm0, %v2886_v6  ;;  %v8696_v33 = vpop.f32.mrb[37].mxu0 }
 0xe9d   :  { %v2959_v35 = vpop.f32.mrb[48].mxu1 }
 0xe9e   :  { %2964 = vst.msk [vmem:[#allocation2 + $0x40] sm:$0xff] %vm399_vm0, %v2959_v35  ;;  %v8701_v36 = vpop.f32.mrb[49].mxu1  ;;  %v3039_v34 = vpop.f32.mrb[38].mxu0 }
 0xe9f   :  { %v3121_v38 = vmul.f32 0.125, %v3039_v34  ;;  %v8706_v39 = vpop.f32.mrb[39].mxu0 }
 0xea1   :  { %v3117_v40 = vpop.f32.mrb[50].mxu1  ;;  %v3123_v41 = vadd.f32 %v10815_v30, %v3121_v38 }
 0xea2   :  { %v3122_v42 = vmul.f32 0.125, %v3117_v40  ;;  %v8711_v43 = vpop.f32.mrb[51].mxu1 }
 0xea3   :  { %v3125_v44 = vsel %vm1449_vm2, %v3123_v41, -inf }
 0xea4   :  { %3126 = vmax.xlane.f32.xlu0 %v3125_v44  ;;  %v3124_v45 = vadd.f32 %v10815_v30, %v3122_v42 }
 0xea6   :  { %v3128_v46 = vsel %vm1449_vm2, %v3124_v45, -inf }
 0xea7   :  { %3129 = vmax.xlane.f32.xlu1 %v3128_v46 }
 0xeb8   :  { %3225 = vrot.lane.b32.xlu1 %v10808_v62, %s9775_s26 }
 0xf31   :  { %v3127_v47 = vpop.xlane.xlu0 %3126 }
 0xf32   :  { %v3131_v48 = vsub.f32 %v3123_v41, %v3127_v47 }
 0xf34   :  { %v3133_v50 = vmul.f32 1.442695, %v3131_v48  ;;  %v3130_v51 = vpop.xlane.xlu1 %3129 }
 0xf35   :  { %v3132_v52 = vsub.f32 %v3124_v45, %v3130_v51 }
 0xf36   :  { %9644 = vpow2.f32 %v3133_v50 }
 0xf37   :  { %v3135_v53 = vmul.f32 1.442695, %v3132_v52 }
 0xf38   :  { %v3226_v55 = vpop.permute.xlu1 %3225 }
 0xf39   :  { %9646 = vpow2.f32 %v3135_v53  ;;  %8718 = vmatpush3.msra.mxu1 %v3226_v55 }
 0xf3a   :  { %8727 = vmatprep.subr.mxu1 %v9773_v59 }
 0xf40   :  { %v9645_v56 = vpop.eup %9644 }
 0xf41   :  { %v3137_v29 = vsel %vm1449_vm2, %v9645_v56, 0.0 }
 0xf42   :  { %3138 = vadd.xlane.f32.xlu0 %v3137_v29 }
 0xf43   :  { %v9647_v57 = vpop.eup %9646 }
 0xf44   :  { %v3140_v10 = vsel %vm1449_vm2, %v9647_v57, 0.0 }
 0xf46   :  { %3141 = vadd.xlane.f32.xlu0 %v3140_v10 }
 0xf5c   :  { %3148 = vrot.lane.b32.xlu0 %v10804_v26, %s9775_s26 }
 0xfcf   :  { %v3139_v62 = vpop.xlane.xlu0 %3138 }
 0xfd0   :  { %9648 = vrcp.f32 %v3139_v62 }
 0xfd3   :  { %v3142_v14 = vpop.xlane.xlu0 %3141 }
 0xfd4   :  { %9650 = vrcp.f32 %v3142_v14 }
 0xfd7   :  { %v3149_v2 = vpop.permute.xlu0 %3148 }
 0xfd8   :  { %8713 = vmatpush3.msra.mxu0 %v3149_v2 }
 0xfd9   :  { %8722 = vmatprep.subr.mxu0 %v9773_v59 }
 0xfda   :  { %v9649_v7 = vpop.eup %9648 }
 0xfdb   :  { %v3144_v61 = vmul.f32 %v9649_v7, %v9645_v56 }
 0xfdd   :  { %8715 = vmatmul.mubr.msk.f32.vlgmr.msra.gmra.mrb[40].mxu0 %vm1449_vm2, %v3144_v61 }
 0xfde   :  { %v9651_v15 = vpop.eup %9650  ;;  %8724 = vmatprep.mubr.msk.f32.mxu0 %vm9774_vm1, %v9773_v59 }
 0xfdf   :  { %v3146_v20 = vmul.f32 %v9651_v15, %v9647_v57  ;;  %8723 = vmatpush3.xpose.msk.msra.mxu0 %vm399_vm0, %v10752_v5 }
 0xfe0   :  { %8732 = vmatprep.subr.mxu0 %v9773_v59 }
 0xfe1   :  { %8720 = vmatmul.mubr.msk.f32.vlgmr.msra.gmra.mrb[52].mxu1 %vm1449_vm2, %v3146_v20 }
 0xfe2   :  { %8728 = vmatpush3.xpose.msk.msra.mxu1 %vm399_vm0, %v10760_v9  ;;  %8725 = vmatmul.mubr.msk.f32.vlgmr.msra.gmra.mrb[42].mxu0 %vm399_vm0, %v10750_v4 }
 0xfe3   :  { %8733 = vmatpush3.msra.mxu0 %v10806_v27  ;;  %8729 = vmatprep.mubr.msk.f32.mxu1 %vm9774_vm1, %v9773_v59 }
 0xfe4   :  { %8737 = vmatprep.subr.mxu1 %v9773_v59  ;;  %8734 = vmatprep.mubr.msk.f32.mxu0 %vm9774_vm1, %v9773_v59 }
 0xfe5   :  { %8730 = vmatmul.mubr.msk.f32.vlgmr.msra.gmra.mrb[54].mxu1 %vm399_vm0, %v10758_v8  ;;  %8742 = vmatprep.subr.mxu0 %v9773_v59 }
 0xfe6   :  { %8738 = vmatpush3.msra.mxu1 %v10810_v28  ;;  %8739 = vmatprep.mubr.msk.f32.mxu1 %vm9774_vm1, %v9773_v59 }
 0xfe7   :  { %8747 = vmatprep.subr.mxu1 %v9773_v59 }
0x10b0   :  { %v11029_v26 = vpop.f32.mrb[40].mxu0 }
0x10b1   :  { %v8716_v16 = vpop.f32.mrb[41].mxu0 }
0x10b4   :  { %v11031_v13 = vpop.f32.mrb[52].mxu1 }
0x10b5   :  { %v8721_v31 = vpop.f32.mrb[53].mxu1  ;;  %v3383_v32 = vpop.f32.mrb[42].mxu0 }
0x10b6   :  { %v3463_v3 = vmul.f32 0.125, %v3383_v32  ;;  %v8726_v6 = vpop.f32.mrb[43].mxu0 }
0x10b8   :  { %v3459_v33 = vpop.f32.mrb[54].mxu1  ;;  %v3465_v35 = vadd.f32 %v10815_v30, %v3463_v3 }
0x10b9   :  { %v3464_v36 = vmul.f32 0.125, %v3459_v33  ;;  %v8731_v34 = vpop.f32.mrb[55].mxu1 }
0x10ba   :  { %v3467_v38 = vsel %vm1449_vm2, %v3465_v35, -inf }
0x10bb   :  { %3468 = vmax.xlane.f32.xlu1 %v3467_v38  ;;  %v3466_v39 = vadd.f32 %v10815_v30, %v3464_v36 }
0x10bd   :  { %v3470_v40 = vsel %vm1449_vm2, %v3466_v39, -inf }
0x10be   :  { %3471 = vmax.xlane.f32.xlu0 %v3470_v40 }
0x10cc   :  { %3637 = vrot.lane.b32.xlu1 %v10750_v4, %s9775_s26 }
0x10d0   :  { %3717 = vrot.lane.b32.xlu1 %v10760_v9, %s9775_s26 }
0x1148   :  { %v3469_v41 = vpop.xlane.xlu1 %3468 }
0x1149   :  { %v3473_v42 = vsub.f32 %v3465_v35, %v3469_v41 }
0x114b   :  { %v3475_v43 = vmul.f32 1.442695, %v3473_v42  ;;  %v3472_v44 = vpop.xlane.xlu0 %3471 }
0x114c   :  { %v3474_v45 = vsub.f32 %v3466_v39, %v3472_v44  ;;  %v3638_v4 = vpop.permute.xlu1 %3637 }
0x114d   :  { %9652 = vpow2.f32 %v3475_v43 }
0x114e   :  { %v3477_v46 = vmul.f32 1.442695, %v3474_v45 }
0x1150   :  { %9654 = vpow2.f32 %v3477_v46  ;;  %v3718_v9 = vpop.permute.xlu1 %3717 }
0x1157   :  { %v9653_v47 = vpop.eup %9652 }
0x1158   :  { %v3479_v48 = vsel %vm1449_vm2, %v9653_v47, 0.0 }
0x1159   :  { %3480 = vadd.xlane.f32.xlu0 %v3479_v48 }
0x115a   :  { %v9655_v50 = vpop.eup %9654 }
0x115b   :  { %v3482_v51 = vsel %vm1449_vm2, %v9655_v50, 0.0 }
0x115c   :  { %3483 = vadd.xlane.f32.xlu1 %v3482_v51 }
0x116d   :  { %3715 = vrot.lane.b32.xlu1 %v10758_v8, %s9775_s26 }
0x116f   :  { %3639 = vrot.lane.b32.xlu0 %v10752_v5, %s9775_s26 }
0x11e6   :  { %v3481_v52 = vpop.xlane.xlu0 %3480 }
0x11e7   :  { %9656 = vrcp.f32 %v3481_v52 }
0x11e9   :  { %v3484_v53 = vpop.xlane.xlu1 %3483 }
0x11ea   :  { %9658 = vrcp.f32 %v3484_v53  ;;  %v3640_v57 = vpop.permute.xlu0 %3639 }
0x11ed   :  { %v3716_v5 = vpop.permute.xlu1 %3715 }
0x11f1   :  { %v9657_v55 = vpop.eup %9656 }
0x11f2   :  { %v3486_v56 = vmul.f32 %v9657_v55, %v9653_v47 }
0x11f4   :  { %v9659_v29 = vpop.eup %9658  ;;  %8735 = vmatmul.mubr.msk.f32.vlgmr.msra.gmra.mrb[44].mxu0 %vm1449_vm2, %v3486_v56 }
0x11f5   :  { %v3488_v10 = vmul.f32 %v9659_v29, %v9655_v50  ;;  %8743 = vmatpush3.xpose.msk.msra.mxu0 %vm399_vm0, %v3640_v57  ;;  %8744 = vmatprep.mubr.msk.f32.mxu0 %vm9774_vm1, %v9773_v59 }
0x11f6   :  { %8752 = vmatprep.subr.mxu0 %v9773_v59 }
0x11f7   :  { %8740 = vmatmul.mubr.msk.f32.vlgmr.msra.gmra.mrb[56].mxu1 %vm1449_vm2, %v3488_v10 }
0x11f8   :  { %8748 = vmatpush3.xpose.msk.msra.mxu1 %vm399_vm0, %v3718_v9  ;;  %8745 = vmatmul.mubr.msk.f32.vlgmr.msra.gmra.mrb[46].mxu0 %vm399_vm0, %v3638_v4 }
0x11f9   :  { %8749 = vmatprep.mubr.msk.f32.mxu1 %vm9774_vm1, %v9773_v59  ;;  %8757 = vmatprep.subr.mxu1 %v9773_v59 }
0x11fa   :  { %8754 = vmatprep.mubr.msk.f32.mxu0 %vm9774_vm1, %v9773_v59 }
0x11fb   :  { %8750 = vmatmul.mubr.msk.f32.vlgmr.msra.gmra.mrb[58].mxu1 %vm399_vm0, %v3716_v5 }
0x11fc   :  { %8759 = vmatprep.mubr.msk.f32.mxu1 %vm9774_vm1, %v9773_v59 }
0x12c7   :  { %v3558_v8 = vpop.f32.mrb[44].mxu0 }
0x12c8   :  { %3635 = vst.msk [vmem:[#allocation2 + $0x18] sm:$0xff] %vm399_vm0, %v3558_v8  ;;  %v8736_v62 = vpop.f32.mrb[45].mxu0 }
0x12ca   :  { %v3631_v14 = vpop.f32.mrb[56].mxu1 }
0x12cb   :  { %3636 = vst.msk [vmem:[#allocation2 + $0x48] sm:$0xff] %vm399_vm0, %v3631_v14  ;;  %v8741_v2 = vpop.f32.mrb[57].mxu1  ;;  %v3711_v7 = vpop.f32.mrb[46].mxu0 }
0x12cc   :  { %v3793_v61 = vmul.f32 0.125, %v3711_v7  ;;  %v8746_v15 = vpop.f32.mrb[47].mxu0 }
0x12ce   :  { %v3789_v20 = vpop.f32.mrb[58].mxu1  ;;  %v3795_v16 = vadd.f32 %v10815_v30, %v3793_v61 }
0x12cf   :  { %v3794_v31 = vmul.f32 0.125, %v3789_v20  ;;  %v8751_v32 = vpop.f32.mrb[59].mxu1 }
0x12d0   :  { %v3797_v3 = vsel %vm1449_vm2, %v3795_v16, -inf }
0x12d1   :  { %3798 = vmax.xlane.f32.xlu0 %v3797_v3  ;;  %v3796_v6 = vadd.f32 %v10815_v30, %v3794_v31 }
0x12d3   :  { %v3800_v33 = vsel %vm1449_vm2, %v3796_v6, -inf }
0x12d4   :  { %3801 = vmax.xlane.f32.xlu1 %v3800_v33 }
0x12e5   :  { %3897 = vrot.lane.b32.xlu1 %v10810_v28, %s9775_s26 }
0x135e   :  { %v3799_v35 = vpop.xlane.xlu0 %3798 }
0x135f   :  { %v3803_v36 = vsub.f32 %v3795_v16, %v3799_v35 }
0x1361   :  { %v3805_v34 = vmul.f32 1.442695, %v3803_v36  ;;  %v3802_v38 = vpop.xlane.xlu1 %3801 }
0x1362   :  { %v3804_v39 = vsub.f32 %v3796_v6, %v3802_v38 }
0x1363   :  { %9660 = vpow2.f32 %v3805_v34 }
0x1364   :  { %v3807_v40 = vmul.f32 1.442695, %v3804_v39 }
0x1365   :  { %v3898_v41 = vpop.permute.xlu1 %3897 }
0x1366   :  { %9662 = vpow2.f32 %v3807_v40  ;;  %8758 = vmatpush3.msra.mxu1 %v3898_v41 }
0x1367   :  { %8767 = vmatprep.subr.mxu1 %v9773_v59 }
0x136d   :  { %v9661_v42 = vpop.eup %9660 }
0x136e   :  { %v3809_v43 = vsel %vm1449_vm2, %v9661_v42, 0.0 }
0x136f   :  { %3810 = vadd.xlane.f32.xlu0 %v3809_v43 }
0x1370   :  { %v9663_v44 = vpop.eup %9662 }
0x1371   :  { %v3812_v45 = vsel %vm1449_vm2, %v9663_v44, 0.0 }
0x1373   :  { %3813 = vadd.xlane.f32.xlu0 %v3812_v45 }
0x1389   :  { %3820 = vrot.lane.b32.xlu0 %v10806_v27, %s9775_s26 }
0x13fc   :  { %v3811_v28 = vpop.xlane.xlu0 %3810 }
0x13fd   :  { %9664 = vrcp.f32 %v3811_v28 }
0x1400   :  { %v3814_v46 = vpop.xlane.xlu0 %3813 }
0x1401   :  { %9666 = vrcp.f32 %v3814_v46 }
0x1404   :  { %v3821_v47 = vpop.permute.xlu0 %3820 }
0x1405   :  { %8753 = vmatpush3.msra.mxu0 %v3821_v47  ;;  %v11140_v47 = vld [vmem:[%s13381_s2] ss:$0 sm:$0xff] }
0x1406   :  { %8762 = vmatprep.subr.mxu0 %v9773_v59 }
0x1407   :  { %v9665_v48 = vpop.eup %9664 }
0x1408   :  { %v3816_v50 = vmul.f32 %v9665_v48, %v9661_v42 }
0x140a   :  { %8755 = vmatmul.mubr.msk.f32.vlgmr.msra.gmra.mrb[48].mxu0 %vm1449_vm2, %v3816_v50 }
0x140b   :  { %v9667_v51 = vpop.eup %9666  ;;  %8764 = vmatprep.mubr.msk.f32.mxu0 %vm9774_vm1, %v9773_v59 }
0x140c   :  { %v3818_v4 = vmul.f32 %v9667_v51, %v9663_v44  ;;  %8763 = vmatpush3.xpose.msk.msra.mxu0 %vm399_vm0, %v10788_v17 }
0x140d   :  { %8772 = vmatprep.subr.mxu0 %v9773_v59 }
0x140e   :  { %8760 = vmatmul.mubr.msk.f32.vlgmr.msra.gmra.mrb[60].mxu1 %vm1449_vm2, %v3818_v4 }
0x140f   :  { %8768 = vmatpush3.xpose.msk.msra.mxu1 %vm399_vm0, %v10796_v22  ;;  %8765 = vmatmul.mubr.msk.f32.vlgmr.msra.gmra.mrb[50].mxu0 %vm399_vm0, %v10732_v60 }
0x1410   :  { %8773 = vmatpush3.msra.mxu0 %v10790_v18  ;;  %8769 = vmatprep.mubr.msk.f32.mxu1 %vm9774_vm1, %v9773_v59 }
0x1411   :  { %8777 = vmatprep.subr.mxu1 %v9773_v59  ;;  %8774 = vmatprep.mubr.msk.f32.mxu0 %vm9774_vm1, %v9773_v59 }
0x1412   :  { %8770 = vmatmul.mubr.msk.f32.vlgmr.msra.gmra.mrb[62].mxu1 %vm399_vm0, %v10740_v0  ;;  %8782 = vmatprep.subr.mxu0 %v9773_v59 }
0x1413   :  { %8778 = vmatpush3.msra.mxu1 %v10798_v23  ;;  %8779 = vmatprep.mubr.msk.f32.mxu1 %vm9774_vm1, %v9773_v59 }
0x1414   :  { %8787 = vmatprep.subr.mxu1 %v9773_v59 }
0x14dd   :  { %v11101_v27 = vpop.f32.mrb[48].mxu0 }
0x14de   :  { %v8756_v9 = vpop.f32.mrb[49].mxu0 }
0x14e1   :  { %v11103_v52 = vpop.f32.mrb[60].mxu1 }
0x14e2   :  { %v8761_v53 = vpop.f32.mrb[61].mxu1  ;;  %v4055_v55 = vpop.f32.mrb[50].mxu0 }
0x14e3   :  { %v4135_v56 = vmul.f32 0.125, %v4055_v55  ;;  %v8766_v29 = vpop.f32.mrb[51].mxu0 }
0x14e5   :  { %v4131_v57 = vpop.f32.mrb[62].mxu1  ;;  %v4137_v10 = vadd.f32 %v10815_v30, %v4135_v56 }
0x14e6   :  { %v4136_v5 = vmul.f32 0.125, %v4131_v57  ;;  %v8771_v8 = vpop.f32.mrb[63].mxu1 }
0x14e7   :  { %v4139_v62 = vsel %vm1449_vm2, %v4137_v10, -inf }
0x14e8   :  { %4140 = vmax.xlane.f32.xlu1 %v4139_v62  ;;  %v4138_v14 = vadd.f32 %v10815_v30, %v4136_v5 }
0x14ea   :  { %v4142_v2 = vsel %vm1449_vm2, %v4138_v14, -inf }
0x14eb   :  { %4143 = vmax.xlane.f32.xlu0 %v4142_v2 }
0x14f9   :  { %4309 = vrot.lane.b32.xlu1 %v10732_v60, %s9775_s26 }
0x14fd   :  { %4389 = vrot.lane.b32.xlu1 %v10796_v22, %s9775_s26 }
0x1575   :  { %v4141_v7 = vpop.xlane.xlu1 %4140 }
0x1576   :  { %v4145_v61 = vsub.f32 %v4137_v10, %v4141_v7 }
0x1578   :  { %v4147_v15 = vmul.f32 1.442695, %v4145_v61  ;;  %v4144_v20 = vpop.xlane.xlu0 %4143 }
0x1579   :  { %v4146_v16 = vsub.f32 %v4138_v14, %v4144_v20  ;;  %v4310_v60 = vpop.permute.xlu1 %4309 }
0x157a   :  { %9668 = vpow2.f32 %v4147_v15 }
0x157b   :  { %v4149_v31 = vmul.f32 1.442695, %v4146_v16 }
0x157d   :  { %9670 = vpow2.f32 %v4149_v31  ;;  %v4390_v22 = vpop.permute.xlu1 %4389 }
0x1584   :  { %v9669_v32 = vpop.eup %9668 }
0x1585   :  { %v4151_v30 = vsel %vm1449_vm2, %v9669_v32, 0.0 }
0x1586   :  { %4152 = vadd.xlane.f32.xlu0 %v4151_v30 }
0x1587   :  { %v9671_v3 = vpop.eup %9670 }
0x1588   :  { %v4154_v6 = vsel %vm1449_vm2, %v9671_v3, 0.0 }
0x1589   :  { %4155 = vadd.xlane.f32.xlu1 %v4154_v6 }
0x159a   :  { %4387 = vrot.lane.b32.xlu1 %v10740_v0, %s9775_s26 }
0x159c   :  { %4311 = vrot.lane.b32.xlu0 %v10788_v17, %s9775_s26 }
0x1613   :  { %v4153_v33 = vpop.xlane.xlu0 %4152 }
0x1614   :  { %9672 = vrcp.f32 %v4153_v33 }
0x1616   :  { %v4156_v35 = vpop.xlane.xlu1 %4155 }
0x1617   :  { %9674 = vrcp.f32 %v4156_v35  ;;  %v4312_v39 = vpop.permute.xlu0 %4311 }
0x161a   :  { %v4388_v0 = vpop.permute.xlu1 %4387 }
0x161e   :  { %v9673_v36 = vpop.eup %9672 }
0x161f   :  { %v4158_v34 = vmul.f32 %v9673_v36, %v9669_v32 }
0x1621   :  { %v9675_v38 = vpop.eup %9674  ;;  %8775 = vmatmul.mubr.msk.f32.vlgmr.msra.gmra.mrb[52].mxu0 %vm1449_vm2, %v4158_v34 }
0x1622   :  { %v4160_v40 = vmul.f32 %v9675_v38, %v9671_v3  ;;  %8783 = vmatpush3.xpose.msk.msra.mxu0 %vm399_vm0, %v4312_v39  ;;  %8784 = vmatprep.mubr.msk.f32.mxu0 %vm9774_vm1, %v9773_v59 }
0x1623   :  { %8792 = vmatprep.subr.mxu0 %v9773_v59 }
0x1624   :  { %8780 = vmatmul.mubr.msk.f32.vlgmr.msra.gmra.mrb[64].mxu1 %vm1449_vm2, %v4160_v40 }
0x1625   :  { %8788 = vmatpush3.xpose.msk.msra.mxu1 %vm399_vm0, %v4390_v22  ;;  %8785 = vmatmul.mubr.msk.f32.vlgmr.msra.gmra.mrb[54].mxu0 %vm399_vm0, %v4310_v60 }
0x1626   :  { %8789 = vmatprep.mubr.msk.f32.mxu1 %vm9774_vm1, %v9773_v59  ;;  %8797 = vmatprep.subr.mxu1 %v9773_v59 }
0x1627   :  { %8794 = vmatprep.mubr.msk.f32.mxu0 %vm9774_vm1, %v9773_v59 }
0x1628   :  { %8790 = vmatmul.mubr.msk.f32.vlgmr.msra.gmra.mrb[66].mxu1 %vm399_vm0, %v4388_v0 }
0x1629   :  { %8799 = vmatprep.mubr.msk.f32.mxu1 %vm9774_vm1, %v9773_v59 }
0x16f4   :  { %v4230_v17 = vpop.f32.mrb[52].mxu0 }
0x16f5   :  { %4307 = vst.msk [vmem:[#allocation2 + $0x20] sm:$0xff] %vm399_vm0, %v4230_v17  ;;  %v8776_v41 = vpop.f32.mrb[53].mxu0 }
0x16f7   :  { %v4303_v42 = vpop.f32.mrb[64].mxu1 }
0x16f8   :  { %4308 = vst.msk [vmem:[#allocation2 + $0x50] sm:$0xff] %vm399_vm0, %v4303_v42  ;;  %v8781_v43 = vpop.f32.mrb[65].mxu1  ;;  %v4383_v44 = vpop.f32.mrb[54].mxu0 }
0x16f9   :  { %v4465_v45 = vmul.f32 0.125, %v4383_v44  ;;  %v8786_v28 = vpop.f32.mrb[55].mxu0 }
0x16fb   :  { %v4461_v46 = vpop.f32.mrb[66].mxu1  ;;  %v4467_v48 = vadd.f32 %v11140_v47, %v4465_v45 }
0x16fc   :  { %v4466_v50 = vmul.f32 0.125, %v4461_v46  ;;  %v8791_v51 = vpop.f32.mrb[67].mxu1 }
0x16fd   :  { %v4469_v4 = vsel %vm1449_vm2, %v4467_v48, -inf }
0x16fe   :  { %4470 = vmax.xlane.f32.xlu0 %v4469_v4  ;;  %v4468_v9 = vadd.f32 %v11140_v47, %v4466_v50 }
0x1700   :  { %v4472_v53 = vsel %vm1449_vm2, %v4468_v9, -inf }
0x1701   :  { %4473 = vmax.xlane.f32.xlu1 %v4472_v53 }
0x1712   :  { %4569 = vrot.lane.b32.xlu1 %v10798_v23, %s9775_s26 }
0x178b   :  { %v4471_v55 = vpop.xlane.xlu0 %4470 }
0x178c   :  { %v4475_v56 = vsub.f32 %v4467_v48, %v4471_v55 }
0x178e   :  { %v4477_v29 = vmul.f32 1.442695, %v4475_v56  ;;  %v4474_v57 = vpop.xlane.xlu1 %4473 }
0x178f   :  { %v4476_v10 = vsub.f32 %v4468_v9, %v4474_v57 }
0x1790   :  { %9676 = vpow2.f32 %v4477_v29 }
0x1791   :  { %v4479_v5 = vmul.f32 1.442695, %v4476_v10 }
0x1792   :  { %v4570_v8 = vpop.permute.xlu1 %4569 }
0x1793   :  { %9678 = vpow2.f32 %v4479_v5  ;;  %8798 = vmatpush3.msra.mxu1 %v4570_v8 }
0x1794   :  { %8807 = vmatprep.subr.mxu1 %v9773_v59 }
0x179a   :  { %v9677_v62 = vpop.eup %9676 }
0x179b   :  { %v4481_v14 = vsel %vm1449_vm2, %v9677_v62, 0.0 }
0x179c   :  { %4482 = vadd.xlane.f32.xlu0 %v4481_v14 }
0x179d   :  { %v9679_v2 = vpop.eup %9678 }
0x179e   :  { %v4484_v7 = vsel %vm1449_vm2, %v9679_v2, 0.0 }
0x17a0   :  { %4485 = vadd.xlane.f32.xlu0 %v4484_v7 }
0x17b6   :  { %4492 = vrot.lane.b32.xlu0 %v10790_v18, %s9775_s26 }
0x1829   :  { %v4483_v23 = vpop.xlane.xlu0 %4482 }
0x182a   :  { %9680 = vrcp.f32 %v4483_v23 }
0x182d   :  { %v4486_v61 = vpop.xlane.xlu0 %4485 }
0x182e   :  { %9682 = vrcp.f32 %v4486_v61 }
0x1831   :  { %v4493_v15 = vpop.permute.xlu0 %4492 }
0x1832   :  { %8793 = vmatpush3.msra.mxu0 %v4493_v15 }
0x1833   :  { %8802 = vmatprep.subr.mxu0 %v9773_v59 }
0x1834   :  { %v9681_v20 = vpop.eup %9680 }
0x1835   :  { %v4488_v16 = vmul.f32 %v9681_v20, %v9677_v62 }
0x1837   :  { %8795 = vmatmul.mubr.msk.f32.vlgmr.msra.gmra.mrb[56].mxu0 %vm1449_vm2, %v4488_v16 }
0x1838   :  { %v9683_v31 = vpop.eup %9682  ;;  %8804 = vmatprep.mubr.msk.f32.mxu0 %vm9774_vm1, %v9773_v59 }
0x1839   :  { %v4490_v32 = vmul.f32 %v9683_v31, %v9679_v2  ;;  %8803 = vmatpush3.xpose.msk.msra.mxu0 %vm399_vm0, %v10792_v19 }
0x183a   :  { %8812 = vmatprep.subr.mxu0 %v9773_v59 }
0x183b   :  { %8800 = vmatmul.mubr.msk.f32.vlgmr.msra.gmra.mrb[68].mxu1 %vm1449_vm2, %v4490_v32 }
0x183c   :  { %8808 = vmatpush3.xpose.msk.msra.mxu1 %vm399_vm0, %v10800_v24  ;;  %8805 = vmatmul.mubr.msk.f32.vlgmr.msra.gmra.mrb[58].mxu0 %vm399_vm0, %v10736_v63 }
0x183d   :  { %8813 = vmatpush3.msra.mxu0 %v10794_v21  ;;  %8809 = vmatprep.mubr.msk.f32.mxu1 %vm9774_vm1, %v9773_v59 }
0x183e   :  { %8817 = vmatprep.subr.mxu1 %v9773_v59  ;;  %8814 = vmatprep.mubr.msk.f32.mxu0 %vm9774_vm1, %v9773_v59 }
0x183f   :  { %8810 = vmatmul.mubr.msk.f32.vlgmr.msra.gmra.mrb[70].mxu1 %vm399_vm0, %v10744_v1  ;;  %8822 = vmatprep.subr.mxu0 %v9773_v59 }
0x1840   :  { %8818 = vmatpush3.msra.mxu1 %v10802_v25  ;;  %8819 = vmatprep.mubr.msk.f32.mxu1 %vm9774_vm1, %v9773_v59 }
0x1841   :  { %8827 = vmatprep.subr.mxu1 %v9773_v59 }
0x190a   :  { %v11178_v18 = vpop.f32.mrb[56].mxu0 }
0x190b   :  { %v8796_v30 = vpop.f32.mrb[57].mxu0 }
0x190e   :  { %v11180_v3 = vpop.f32.mrb[68].mxu1 }
0x190f   :  { %v8801_v6 = vpop.f32.mrb[69].mxu1  ;;  %v4727_v60 = vpop.f32.mrb[58].mxu0 }
0x1910   :  { %v4807_v22 = vmul.f32 0.125, %v4727_v60  ;;  %v8806_v33 = vpop.f32.mrb[59].mxu0 }
0x1912   :  { %v4803_v35 = vpop.f32.mrb[70].mxu1  ;;  %v4809_v36 = vadd.f32 %v11140_v47, %v4807_v22 }
0x1913   :  { %v4808_v34 = vmul.f32 0.125, %v4803_v35  ;;  %v8811_v38 = vpop.f32.mrb[71].mxu1 }
0x1914   :  { %v4811_v39 = vsel %vm1449_vm2, %v4809_v36, -inf  ;;  %v5388_v38 = vld [vmem:[%s13382_s7 + $0x188] sm:$0xff] }
0x1915   :  { %4812 = vmax.xlane.f32.xlu1 %v4811_v39  ;;  %v4810_v40 = vadd.f32 %v11140_v47, %v4808_v34  ;;  %v5387_v34 = vld [vmem:[%s13382_s7 + $0x180] sm:$0xff] }
0x1916   :  { %v9133_v39 = vpack.c.bf16 %v5388_v38, %v5387_v34 }
0x1917   :  { %v4814_v0 = vsel %vm1449_vm2, %v4810_v40, -inf }
0x1918   :  { %4815 = vmax.xlane.f32.xlu0 %v4814_v0  ;;  %v5356_v0 = vld [vmem:[%s13382_s7 + $0x88] sm:$0xff] }
0x1926   :  { %4981 = vrot.lane.b32.xlu1 %v10736_v63, %s9775_s26 }
0x192a   :  { %5061 = vrot.lane.b32.xlu1 %v10800_v24, %s9775_s26 }
0x19a2   :  { %v4813_v17 = vpop.xlane.xlu1 %4812 }
0x19a3   :  { %v4817_v41 = vsub.f32 %v4809_v36, %v4813_v17 }
0x19a5   :  { %v4819_v42 = vmul.f32 1.442695, %v4817_v41  ;;  %v4816_v43 = vpop.xlane.xlu0 %4815 }
0x19a6   :  { %v4818_v44 = vsub.f32 %v4810_v40, %v4816_v43  ;;  %v4982_v63 = vpop.permute.xlu1 %4981  ;;  %v5357_v43 = vld [vmem:[%s13382_s7 + $0x90] sm:$0xff] }
0x19a7   :  { %9684 = vpow2.f32 %v4819_v42 }
0x19a8   :  { %v4821_v45 = vmul.f32 1.442695, %v4818_v44  ;;  %v5358_v44 = vld [vmem:[%s13382_s7 + $0x98] sm:$0xff] }
0x19aa   :  { %9686 = vpow2.f32 %v4821_v45  ;;  %v5062_v24 = vpop.permute.xlu1 %5061 }
0x19b1   :  { %v9685_v28 = vpop.eup %9684 }
0x19b2   :  { %v4823_v46 = vsel %vm1449_vm2, %v9685_v28, 0.0 }
0x19b3   :  { %4824 = vadd.xlane.f32.xlu0 %v4823_v46  ;;  %v5341_v46 = vld [vmem:[%s13382_s7 + $0x10] sm:$0xff] }
0x19b4   :  { %v9687_v48 = vpop.eup %9686 }
0x19b5   :  { %v4826_v50 = vsel %vm1449_vm2, %v9687_v48, 0.0 }
0x19b6   :  { %4827 = vadd.xlane.f32.xlu1 %v4826_v50 }
0x19c7   :  { %5059 = vrot.lane.b32.xlu1 %v10744_v1, %s9775_s26 }
0x19c9   :  { %4983 = vrot.lane.b32.xlu0 %v10792_v19, %s9775_s26 }
0x1a40   :  { %v4825_v51 = vpop.xlane.xlu0 %4824 }
0x1a41   :  { %9688 = vrcp.f32 %v4825_v51  ;;  %v5371_v51 = vld [vmem:[%s13382_s7 + $0x100] sm:$0xff] }
0x1a43   :  { %v4828_v4 = vpop.xlane.xlu1 %4827 }
0x1a44   :  { %9690 = vrcp.f32 %v4828_v4  ;;  %v4984_v56 = vpop.permute.xlu0 %4983  ;;  %v5372_v4 = vld [vmem:[%s13382_s7 + $0x108] sm:$0xff] }
0x1a47   :  { %v5060_v1 = vpop.permute.xlu1 %5059 }
0x1a4b   :  { %v9689_v9 = vpop.eup %9688 }
0x1a4c   :  { %v4830_v53 = vmul.f32 %v9689_v9, %v9685_v28  ;;  %v5359_v9 = vld [vmem:[%s13382_s7 + $0xa0] sm:$0xff] }
0x1a4e   :  { %v9691_v55 = vpop.eup %9690  ;;  %8815 = vmatmul.mubr.msk.f32.vlgmr.msra.gmra.mrb[60].mxu0 %vm1449_vm2, %v4830_v53  ;;  %v5360_v53 = vld [vmem:[%s13382_s7 + $0xa8] sm:$0xff] }
0x1a4f   :  { %v4832_v29 = vmul.f32 %v9691_v55, %v9687_v48  ;;  %8823 = vmatpush3.xpose.msk.msra.mxu0 %vm399_vm0, %v4984_v56  ;;  %8824 = vmatprep.mubr.msk.f32.mxu0 %vm9774_vm1, %v9773_v59  ;;  %v5342_v48 = vld [vmem:[%s13382_s7 + $0x18] sm:$0xff]  ;;  %v5389_v55 = vld [vmem:[%s13382_s7 + $0x190] sm:$0xff] }
0x1a50   :  { %8832 = vmatprep.subr.mxu0 %v9773_v59  ;;  %v5390_v56 = vld [vmem:[%s13382_s7 + $0x198] sm:$0xff] }
0x1a51   :  { %8820 = vmatmul.mubr.msk.f32.vlgmr.msra.gmra.mrb[72].mxu1 %vm1449_vm2, %v4832_v29 }
0x1a52   :  { %8828 = vmatpush3.xpose.msk.msra.mxu1 %vm399_vm0, %v5062_v24  ;;  %8825 = vmatmul.mubr.msk.f32.vlgmr.msra.gmra.mrb[62].mxu0 %vm399_vm0, %v4982_v63  ;;  %v9105_v24 = vpack.c.bf16 %v5358_v44, %v5357_v43 }
0x1a53   :  { %8829 = vmatprep.mubr.msk.f32.mxu1 %vm9774_vm1, %v9773_v59  ;;  %8837 = vmatprep.subr.mxu1 %v9773_v59 }
0x1a54   :  { %8834 = vmatprep.mubr.msk.f32.mxu0 %vm9774_vm1, %v9773_v59 }
0x1a55   :  { %8830 = vmatmul.mubr.msk.f32.vlgmr.msra.gmra.mrb[74].mxu1 %vm399_vm0, %v5060_v1 }
0x1a56   :  { %8839 = vmatprep.mubr.msk.f32.mxu1 %vm9774_vm1, %v9773_v59 }
0x1b21   :  { %v4902_v19 = vpop.f32.mrb[60].mxu0 }
0x1b22   :  { %4979 = vst.msk [vmem:[#allocation2 + $0x28] sm:$0xff] %vm399_vm0, %v4902_v19  ;;  %v8816_v57 = vpop.f32.mrb[61].mxu0  ;;  %v9107_v19 = vpack.c.bf16 %v5342_v48, %v5341_v46  ;;  %v5367_v46 = vld [vmem:[%s13382_s7 + $0xe0] sm:$0xff]  ;;  %v5368_v48 = vld [vmem:[%s13382_s7 + $0xe8] sm:$0xff] }
0x1b23   :  { %v9135_v57 = vpack.c.bf16 %v5372_v4, %v5371_v51  ;;  %v5351_v4 = vld [vmem:[%s13382_s7 + $0x60] sm:$0xff] }
0x1b24   :  { %v4975_v10 = vpop.f32.mrb[72].mxu1 }
0x1b25   :  { %4980 = vst.msk [vmem:[#allocation2 + $0x58] sm:$0xff] %vm399_vm0, %v4975_v10  ;;  %v8821_v5 = vpop.f32.mrb[73].mxu1  ;;  %v5055_v8 = vpop.f32.mrb[62].mxu0  ;;  %v5343_v10 = vld [vmem:[%s13382_s7 + $0x20] sm:$0xff] }
0x1b26   :  { %v5137_v62 = vmul.f32 0.125, %v5055_v8  ;;  %v8826_v14 = vpop.f32.mrb[63].mxu0  ;;  %v5344_v5 = vld [vmem:[%s13382_s7 + $0x28] sm:$0xff] }
0x1b27   :  { %v9109_v14 = vpack.c.bf16 %v5360_v53, %v5359_v9  ;;  %v5352_v9 = vld [vmem:[%s13382_s7 + $0x68] sm:$0xff]  ;;  %v9125_v53 = vpack.c.bf16 %v5368_v48, %v5367_v46 }
0x1b28   :  { %v5133_v2 = vpop.f32.mrb[74].mxu1  ;;  %v5139_v7 = vadd.f32 %v11140_v47, %v5137_v62  ;;  %v5428_v46 = vld [vmem:[%s13382_s7 + $0x2c8] sm:$0xff] }
0x1b29   :  { %v5138_v23 = vmul.f32 0.125, %v5133_v2  ;;  %v8831_v61 = vpop.f32.mrb[75].mxu1  ;;  %v9137_v2 = vpack.c.bf16 %v5390_v56, %v5389_v55  ;;  %v5381_v56 = vld [vmem:[%s13382_s7 + $0x150] sm:$0xff] }
0x1b2a   :  { %v5141_v15 = vsel %vm1449_vm2, %v5139_v7, -inf  ;;  %v5361_v61 = vld [vmem:[%s13382_s7 + $0xb0] sm:$0xff] }
0x1b2b   :  { %5142 = vmax.xlane.f32.xlu0 %v5141_v15  ;;  %v5140_v20 = vadd.f32 %v11140_v47, %v5138_v23  ;;  %v5374_v23 = vld [vmem:[%s13382_s7 + $0x118] sm:$0xff] }
0x1b2c   :  { %v5362_v15 = vld [vmem:[%s13382_s7 + $0xb8] sm:$0xff] }
0x1b2d   :  { %v5144_v16 = vsel %vm1449_vm2, %v5140_v20, -inf }
0x1b2e   :  { %5145 = vmax.xlane.f32.xlu1 %v5144_v16  ;;  %v5392_v16 = vld [vmem:[%s13382_s7 + $0x1a8] sm:$0xff] }
0x1b3f   :  { %5241 = vrot.lane.b32.xlu1 %v10802_v25, %s9775_s26 }
0x1b43   :  { %2631 = vrot.lane.b32.xlu1 %v10957_v12, %s9775_s26 }
0x1b47   :  { %1958 = vrot.lane.b32.xlu1 %v10885_v58, %s9775_s26 }
0x1b4b   :  { %1960 = vrot.lane.b32.xlu1 %v10887_v37, %s9775_s26 }
0x1b4f   :  { %3303 = vrot.lane.b32.xlu1 %v11029_v26, %s9775_s26 }
0x1b53   :  { %4647 = vrot.lane.b32.xlu1 %v11178_v18, %s9775_s26 }
0x1b57   :  { %3305 = vrot.lane.b32.xlu1 %v11031_v13, %s9775_s26 }
0x1b5b   :  { %4649 = vrot.lane.b32.xlu1 %v11180_v3, %s9775_s26 }
0x1bb8   :  { %v5143_v25 = vpop.xlane.xlu0 %5142 }
0x1bb9   :  { %v5147_v12 = vsub.f32 %v5139_v7, %v5143_v25  ;;  %v5373_v7 = vld [vmem:[%s13382_s7 + $0x110] sm:$0xff]  ;;  %v9111_v25 = vpack.c.bf16 %v5344_v5, %v5343_v10  ;;  %v5400_v10 = vld [vmem:[%s13382_s7 + $0x1e8] sm:$0xff]  ;;  %v9127_v5 = vpack.c.bf16 %v5352_v9, %v5351_v4  ;;  %v5430_v4 = vld [vmem:[%s13382_s7 + $0x2d8] sm:$0xff] }
0x1bbb   :  { %v5149_v47 = vmul.f32 1.442695, %v5147_v12  ;;  %v5146_v31 = vpop.xlane.xlu1 %5145  ;;  %v9139_v12 = vpack.c.bf16 %v5374_v23, %v5373_v7  ;;  %v5354_v7 = vld [vmem:[%s13382_s7 + $0x78] sm:$0xff]  ;;  %v5383_v23 = vld [vmem:[%s13382_s7 + $0x160] sm:$0xff] }
0x1bbc   :  { %v5148_v58 = vsub.f32 %v5140_v20, %v5146_v31  ;;  %v5391_v20 = vld [vmem:[%s13382_s7 + $0x1a0] sm:$0xff]  ;;  %v5346_v31 = vld [vmem:[%s13382_s7 + $0x38] sm:$0xff] }
0x1bbd   :  { %9692 = vpow2.f32 %v5149_v47  ;;  %v5345_v47 = vld [vmem:[%s13382_s7 + $0x30] sm:$0xff] }
0x1bbe   :  { %v5151_v32 = vmul.f32 1.442695, %v5148_v58  ;;  %v9113_v58 = vpack.c.bf16 %v5362_v15, %v5361_v61  ;;  %v5384_v61 = vld [vmem:[%s13382_s7 + $0x168] sm:$0xff]  ;;  %v5401_v15 = vld [vmem:[%s13382_s7 + $0x1f0] sm:$0xff] }
0x1bbf   :  { %v5242_v37 = vpop.permute.xlu1 %5241 }
0x1bc0   :  { %9694 = vpow2.f32 %v5151_v32  ;;  %8838 = vmatpush3.msra.mxu1 %v5242_v37  ;;  %v9141_v32 = vpack.c.bf16 %v5392_v16, %v5391_v20  ;;  %v5375_v37 = vld [vmem:[%s13382_s7 + $0x120] sm:$0xff]  ;;  %v5402_v20 = vld [vmem:[%s13382_s7 + $0x1f8] sm:$0xff] }
0x1bc1   :  { %9134 = vmatprep.subr.bf16.mxu1 %v9133_v39  ;;  %v5378_v39 = vld [vmem:[%s13382_s7 + $0x138] sm:$0xff] }
0x1bc3   :  { %v2632_v26 = vpop.permute.xlu1 %2631 }
0x1bc4   :  { %2637 = vst.msk [vmem:[#allocation2 + $0x8] sm:$0xff] %vm1964_vm3, %v2632_v26  ;;  %v5376_v26 = vld [vmem:[%s13382_s7 + $0x128] sm:$0xff] }
0x1bc7   :  { %v9693_v18 = vpop.eup %9692  ;;  %v1959_v30 = vpop.permute.xlu1 %1958 }
0x1bc8   :  { %1965 = vst.msk [vmem:[#allocation2] sm:$0xff] %vm1964_vm3, %v1959_v30  ;;  %v5153_v13 = vsel %vm1449_vm2, %v9693_v18, 0.0  ;;  %v5364_v30 = vld [vmem:[%s13382_s7 + $0xc8] sm:$0xff] }
0x1bc9   :  { %5154 = vadd.xlane.f32.xlu0 %v5153_v13  ;;  %v5393_v13 = vld [vmem:[%s13382_s7 + $0x1b0] sm:$0xff] }
0x1bca   :  { %v9695_v3 = vpop.eup %9694 }
0x1bcb   :  { %v1961_v6 = vpop.permute.xlu1 %1960  ;;  %v5156_v60 = vsel %vm1449_vm2, %v9695_v3, 0.0  ;;  %v5328_v29 = vld [vmem:[#allocation2 + $0x8] sm:$0xff] }
0x1bcc   :  { %1966 = vst.msk [vmem:[#allocation2 + $0x30] sm:$0xff] %vm1964_vm3, %v1961_v6  ;;  %v9115_v6 = vpack.c.bf16 %v5346_v31, %v5345_v47  ;;  %v5385_v47 = vld [vmem:[%s13382_s7 + $0x170] sm:$0xff]  ;;  %v5386_v31 = vld [vmem:[%s13382_s7 + $0x178] sm:$0xff] }
0x1bcd   :  { %5157 = vadd.xlane.f32.xlu0 %v5156_v60  ;;  %v9143_v60 = vpack.c.bf16 %v5376_v26, %v5375_v37 }
0x1bcf   :  { %v3304_v22 = vpop.permute.xlu1 %3303 }
0x1bd0   :  { %3309 = vst.msk [vmem:[#allocation2 + $0x10] sm:$0xff] %vm1964_vm3, %v3304_v22  ;;  %v5347_v22 = vld [vmem:[%s13382_s7 + $0x40] sm:$0xff] }
0x1bd3   :  { %v4648_v33 = vpop.permute.xlu1 %4647  ;;  %v5333_v26 = vld [vmem:[#allocation2 + $0x30] sm:$0xff] }
0x1bd4   :  { %4653 = vst.msk [vmem:[#allocation2 + $0x20] sm:$0xff] %vm1964_vm3, %v4648_v33  ;;  %v5348_v33 = vld [vmem:[%s13382_s7 + $0x48] sm:$0xff] }
0x1bd7   :  { %v3306_v35 = vpop.permute.xlu1 %3305 }
0x1bd8   :  { %3310 = vst.msk [vmem:[#allocation2 + $0x40] sm:$0xff] %vm1964_vm3, %v3306_v35  ;;  %v5377_v35 = vld [vmem:[%s13382_s7 + $0x130] sm:$0xff] }
0x1bdb   :  { %v4650_v36 = vpop.permute.xlu1 %4649 }
0x1bdc   :  { %4654 = vst.msk [vmem:[#allocation2 + $0x50] sm:$0xff] %vm1964_vm3, %v4650_v36 }
0x1be3   :  { %5164 = vrot.lane.b32.xlu0 %v10794_v21, %s9775_s26  ;;  %v5355_v21 = vld [vmem:[%s13382_s7 + $0x80] sm:$0xff] }
0x1be4   :  { %v9101_v41 = vpack.c.bf16 %v5356_v0, %v5355_v21  ;;  %v5366_v21 = vld [vmem:[%s13382_s7 + $0xd8] sm:$0xff]  ;;  %v5395_v0 = vld [vmem:[%s13382_s7 + $0x1c0] sm:$0xff] }
0x1be7   :  { %2633 = vrot.lane.b32.xlu0 %v10959_v11, %s9775_s26  ;;  %v5339_v11 = vld [vmem:[%s13382_s7] sm:$0xff] }
0x1beb   :  { %3975 = vrot.lane.b32.xlu0 %v11101_v27, %s9775_s26  ;;  %v5340_v27 = vld [vmem:[%s13382_s7 + $0x8] sm:$0xff] }
0x1bec   :  { %v9103_v28 = vpack.c.bf16 %v5340_v27, %v5339_v11  ;;  %v5349_v11 = vld [vmem:[%s13382_s7 + $0x50] sm:$0xff]  ;;  %v5350_v27 = vld [vmem:[%s13382_s7 + $0x58] sm:$0xff] }
0x1c56   :  { %v5155_v40 = vpop.xlane.xlu0 %5154 }
0x1c57   :  { %9696 = vrcp.f32 %v5155_v40  ;;  %v5365_v40 = vld [vmem:[%s13382_s7 + $0xd0] sm:$0xff] }
0x1c58   :  { %v9121_v43 = vpack.c.bf16 %v5366_v21, %v5365_v40  ;;  %v5424_v40 = vld [vmem:[%s13382_s7 + $0x2a8] sm:$0xff] }
0x1c5a   :  { %v5158_v17 = vpop.xlane.xlu0 %5157 }
0x1c5b   :  { %9698 = vrcp.f32 %v5158_v17  ;;  %v5396_v17 = vld [vmem:[%s13382_s7 + $0x1c8] sm:$0xff] }
0x1c5c   :  { %v9149_v44 = vpack.c.bf16 %v5396_v17, %v5395_v0  ;;  %v5407_v17 = vld [vmem:[%s13382_s7 + $0x220] sm:$0xff] }
0x1c5e   :  { %v5165_v42 = vpop.permute.xlu0 %5164 }
0x1c5f   :  { %8833 = vmatpush3.msra.mxu0 %v5165_v42  ;;  %v9147_v42 = vpack.c.bf16 %v5378_v39, %v5377_v35  ;;  %v5423_v39 = vld [vmem:[%s13382_s7 + $0x2a0] sm:$0xff] }
0x1c60   :  { %9102 = vmatprep.subr.bf16.mxu0 %v9101_v41  ;;  %v9119_v41 = vpack.c.bf16 %v5348_v33, %v5347_v22  ;;  %v5421_v22 = vld [vmem:[%s13382_s7 + $0x290] sm:$0xff]  ;;  %v5422_v33 = vld [vmem:[%s13382_s7 + $0x298] sm:$0xff]  ;;  %v9173_v0 = vpack.c.bf16 %v5424_v40, %v5423_v39 }
0x1c61   :  { %v9697_v45 = vpop.eup %9696  ;;  %v5337_v39 = vld [vmem:[#allocation2 + $0x50] sm:$0xff] }
0x1c62   :  { %v5160_v50 = vmul.f32 %v9697_v45, %v9693_v18  ;;  %v2634_v63 = vpop.permute.xlu0 %2633  ;;  %v5363_v18 = vld [vmem:[%s13382_s7 + $0xc0] sm:$0xff] }
0x1c63   :  { %2638 = vst.msk [vmem:[#allocation2 + $0x38] sm:$0xff] %vm1964_vm3, %v2634_v63  ;;  %v9117_v34 = vpack.c.bf16 %v5364_v30, %v5363_v18  ;;  %v5379_v45 = vld [vmem:[%s13382_s7 + $0x140] sm:$0xff]  ;;  %v5398_v63 = vld [vmem:[%s13382_s7 + $0x1d8] sm:$0xff]  ;;  %v5329_v18 = vld [vmem:[#allocation2 + $0x10] sm:$0xff] }
0x1c64   :  { %8835 = vmatmul.mubr.msk.f32.vlgmr.msra.gmra.mrb[64].mxu0 %vm1449_vm2, %v5160_v50  ;;  %v5397_v50 = vld [vmem:[%s13382_s7 + $0x1d0] sm:$0xff]  ;;  %v5419_v30 = vld [vmem:[%s13382_s7 + $0x280] sm:$0xff] }
0x1c65   :  { %v9699_v1 = vpop.eup %9698  ;;  %9104 = vmatpush3.bf16.msra.mxu0 %v9103_v28  ;;  %5506 = vmatprep.mubr.f32.mxu0 %v5328_v29  ;;  %v5380_v28 = vld [vmem:[%s13382_s7 + $0x148] sm:$0xff]  ;;  %v9153_v55 = vpack.c.bf16 %v5398_v63, %v5397_v50  ;;  %v5382_v29 = vld [vmem:[%s13382_s7 + $0x158] sm:$0xff]  ;;  %v5411_v63 = vld [vmem:[%s13382_s7 + $0x240] sm:$0xff] }
0x1c66   :  { %v5162_v8 = vmul.f32 %v9699_v1, %v9695_v3  ;;  %v3976_v62 = vpop.permute.xlu0 %3975  ;;  %9106 = vmatprep.subr.bf16.mxu0 %v9105_v24  ;;  %v5394_v3 = vld [vmem:[%s13382_s7 + $0x1b8] sm:$0xff]  ;;  %v9123_v24 = vpack.c.bf16 %v5350_v27, %v5349_v11  ;;  %v9151_v51 = vpack.c.bf16 %v5380_v28, %v5379_v45  ;;  %v5369_v1 = vld [vmem:[%s13382_s7 + $0xf0] sm:$0xff]  ;;  %v5427_v28 = vld [vmem:[%s13382_s7 + $0x2c0] sm:$0xff] }
0x1c67   :  { %3981 = vst.msk [vmem:[#allocation2 + $0x18] sm:$0xff] %vm1964_vm3, %v3976_v62  ;;  %v9145_v38 = vpack.c.bf16 %v5394_v3, %v5393_v13  ;;  %v5353_v62 = vld [vmem:[%s13382_s7 + $0x70] sm:$0xff]  ;;  %v5420_v13 = vld [vmem:[%s13382_s7 + $0x288] sm:$0xff]  ;;  %v5403_v3 = vld [vmem:[%s13382_s7 + $0x200] sm:$0xff]  ;;  %v9181_v50 = vpack.c.bf16 %v5428_v46, %v5427_v28 }
0x1c68   :  { %8840 = vmatmul.mubr.msk.f32.vlgmr.msra.gmra.mrb[76].mxu1 %vm1449_vm2, %v5162_v8  ;;  %v9155_v8 = vpack.c.bf16 %v5382_v29, %v5381_v56  ;;  %v9131_v16 = vpack.c.bf16 %v5354_v7, %v5353_v62  ;;  %v5426_v11 = vld [vmem:[%s13382_s7 + $0x2b8] sm:$0xff]  ;;  %v5433_v62 = vld [vmem:[%s13382_s7 + $0x2f0] sm:$0xff] }
0x1c69   :  { %9108 = vmatpush3.bf16.msra.mxu0 %v9107_v19  ;;  %9136 = vmatpush3.bf16.msra.mxu1 %v9135_v57  ;;  %v5370_v19 = vld [vmem:[%s13382_s7 + $0xf8] sm:$0xff]  ;;  %v5399_v57 = vld [vmem:[%s13382_s7 + $0x1e0] sm:$0xff]  ;;  %v5417_v7 = vld [vmem:[%s13382_s7 + $0x270] sm:$0xff] }
0x1c6a   :  { %9110 = vmatprep.subr.bf16.mxu0 %v9109_v14  ;;  %9138 = vmatprep.subr.bf16.mxu1 %v9137_v2  ;;  %v9129_v14 = vpack.c.bf16 %v5370_v19, %v5369_v1  ;;  %v9157_v2 = vpack.c.bf16 %v5400_v10, %v5399_v57  ;;  %v5334_v37 = vld [vmem:[#allocation2 + $0x38] sm:$0xff]  ;;  %v5431_v1 = vld [vmem:[%s13382_s7 + $0x2e0] sm:$0xff]  ;;  %v5432_v19 = vld [vmem:[%s13382_s7 + $0x2e8] sm:$0xff] }
0x1c6b   :  { %v5410_v45 = vld [vmem:[%s13382_s7 + $0x238] sm:$0xff]  ;;  %v9189_v57 = vpack.c.bf16 %v5432_v19, %v5431_v1  ;;  %v5415_v10 = vld [vmem:[%s13382_s7 + $0x260] sm:$0xff]  ;;  %v5714_v19 = vld [vmem:[%s13384_s11 + $0x8] sm:$0xff] }
0x1c6c   :  { %v5414_v56 = vld [vmem:[%s13382_s7 + $0x258] sm:$0xff] }
0x1c6d   :  { %9112 = vmatpush3.bf16.msra.mxu0 %v9111_v25  ;;  %9140 = vmatpush3.bf16.msra.mxu1 %v9139_v12  ;;  %v9159_v25 = vpack.c.bf16 %v5384_v61, %v5383_v23  ;;  %v9161_v12 = vpack.c.bf16 %v5402_v20, %v5401_v15  ;;  %v5418_v23 = vld [vmem:[%s13382_s7 + $0x278] sm:$0xff] }
0x1c6e   :  { %9114 = vmatprep.subr.bf16.mxu0 %v9113_v58  ;;  %9142 = vmatprep.subr.bf16.mxu1 %v9141_v32  ;;  %v5330_v36 = vld [vmem:[#allocation2 + $0x18] sm:$0xff]  ;;  %v9163_v58 = vpack.c.bf16 %v5386_v31, %v5385_v47  ;;  %v5327_v32 = vld [vmem:[#allocation2] sm:$0xff]  ;;  %v9195_v61 = vpack.c.bf16 %v5418_v23, %v5417_v7 }
0x1c6f   :  { %5581 = vmatprep.mubr.f32.mxu1 %v5330_v36  ;;  %v9169_v36 = vpack.c.bf16 %v5422_v33, %v5421_v22  ;;  %v5717_v23 = vld [vmem:[%s13384_s11 + $0x20] sm:$0xff] }
0x1c71   :  { %9116 = vmatpush3.bf16.msra.mxu0 %v9115_v6  ;;  %9144 = vmatpush3.bf16.msra.mxu1 %v9143_v60  ;;  %v9165_v6 = vpack.c.bf16 %v5420_v13, %v5419_v30  ;;  %v5404_v60 = vld [vmem:[%s13382_s7 + $0x208] sm:$0xff] }
0x1c72   :  { %9118 = vmatprep.subr.bf16.mxu0 %v9117_v34  ;;  %9146 = vmatprep.subr.bf16.mxu1 %v9145_v38  ;;  %v9167_v35 = vpack.c.bf16 %v5404_v60, %v5403_v3  ;;  %v5405_v34 = vld [vmem:[%s13382_s7 + $0x210] sm:$0xff]  ;;  %v5406_v38 = vld [vmem:[%s13382_s7 + $0x218] sm:$0xff] }
0x1c73   :  { %v9171_v21 = vpack.c.bf16 %v5406_v38, %v5405_v34  ;;  %v5335_v34 = vld [vmem:[#allocation2 + $0x40] sm:$0xff] }
0x1c75   :  { %9120 = vmatpush3.bf16.msra.mxu0 %v9119_v41  ;;  %9148 = vmatpush3.bf16.msra.mxu1 %v9147_v42  ;;  %v5408_v41 = vld [vmem:[%s13382_s7 + $0x228] sm:$0xff]  ;;  %v5425_v42 = vld [vmem:[%s13382_s7 + $0x2b0] sm:$0xff] }
0x1c76   :  { %9122 = vmatprep.subr.bf16.mxu0 %v9121_v43  ;;  %9150 = vmatprep.subr.bf16.mxu1 %v9149_v44  ;;  %v9175_v27 = vpack.c.bf16 %v5408_v41, %v5407_v17  ;;  %v9177_v43 = vpack.c.bf16 %v5426_v11, %v5425_v42  ;;  %v5409_v44 = vld [vmem:[%s13382_s7 + $0x230] sm:$0xff] }
0x1c77   :  { %v9179_v48 = vpack.c.bf16 %v5410_v45, %v5409_v44 }
0x1c79   :  { %9124 = vmatpush3.bf16.msra.mxu0 %v9123_v24  ;;  %9152 = vmatpush3.bf16.msra.mxu1 %v9151_v51  ;;  %v5412_v24 = vld [vmem:[%s13382_s7 + $0x248] sm:$0xff]  ;;  %v5429_v51 = vld [vmem:[%s13382_s7 + $0x2d0] sm:$0xff] }
0x1c7a   :  { %9126 = vmatprep.subr.bf16.mxu0 %v9125_v53  ;;  %9154 = vmatprep.subr.bf16.mxu1 %v9153_v55  ;;  %v9183_v9 = vpack.c.bf16 %v5412_v24, %v5411_v63  ;;  %v9185_v53 = vpack.c.bf16 %v5430_v4, %v5429_v51  ;;  %v5413_v55 = vld [vmem:[%s13382_s7 + $0x250] sm:$0xff] }
0x1c7b   :  { %v9187_v29 = vpack.c.bf16 %v5414_v56, %v5413_v55 }
0x1c7d   :  { %9128 = vmatpush3.bf16.msra.mxu0 %v9127_v5  ;;  %9156 = vmatpush3.bf16.msra.mxu1 %v9155_v8  ;;  %v5416_v5 = vld [vmem:[%s13382_s7 + $0x268] sm:$0xff] }
0x1c7e   :  { %9130 = vmatprep.subr.bf16.mxu0 %v9129_v14  ;;  %9158 = vmatprep.subr.bf16.mxu1 %v9157_v2  ;;  %v9191_v8 = vpack.c.bf16 %v5416_v5, %v5415_v10  ;;  %v5434_v14 = vld [vmem:[%s13382_s7 + $0x2f8] sm:$0xff]  ;;  %v5718_v10 = vld [vmem:[%s13384_s11 + $0x28] sm:$0xff] }
0x1c7f   :  { %v9193_v2 = vpack.c.bf16 %v5434_v14, %v5433_v62  ;;  %v5713_v62 = vld [vmem:[%s13384_s11] sm:$0xff] }
0x1c80   :  { %v5729_v14 = vld [vmem:[%s13384_s11 + $0x80] sm:$0xff] }
0x1c81   :  { %9132 = vmatpush3.bf16.msra.mxu0 %v9131_v16  ;;  %9160 = vmatpush3.bf16.msra.mxu1 %v9159_v25  ;;  %v9199_v7 = vpack.c.bf16 %v5729_v14, %v5713_v62  ;;  %v5731_v62 = vld [vmem:[%s13384_s11 + $0x90] sm:$0xff] }
0x1c82   :  { %9162 = vmatprep.subr.bf16.mxu1 %v9161_v12  ;;  %9166 = vmatprep.subr.bf16.mxu0 %v9165_v6 }
0x1c84   :  { %5507 = vmatmul.mubr.f32.vlgmr.msra.gmra.mrb[66].mxu0 %v5327_v32 }
0x1c85   :  { %5511 = vmatprep.mubr.f32.mxu0 %v5334_v37  ;;  %9164 = vmatpush3.bf16.msra.mxu1 %v9163_v58  ;;  %v7939_v58 = vld [vmem:[%s13383_s8] ss:$0 sm:$0xff] }
0x1c86   :  { %9168 = vmatpush3.bf16.msra.mxu0 %v9167_v35  ;;  %v5331_v35 = vld [vmem:[#allocation2 + $0x20] sm:$0xff] }
0x1c87   :  { %9170 = vmatprep.subr.bf16.mxu0 %v9169_v36 }
0x1c88   :  { %5512 = vmatmul.mubr.f32.gmra.mrb[68].mxu0 %v5333_v26  ;;  %5582 = vmatmul.mubr.f32.vlgmr.msra.gmra.mrb[78].mxu1 %v5329_v18 }
0x1c8a   :  { %9172 = vmatpush3.bf16.msra.mxu0 %v9171_v21 }
0x1c8b   :  { %9174 = vmatprep.subr.bf16.mxu0 %v9173_v0 }
0x1c8e   :  { %9176 = vmatpush3.bf16.msra.mxu0 %v9175_v27 }
0x1c8f   :  { %9178 = vmatprep.subr.bf16.mxu0 %v9177_v43 }
0x1c92   :  { %9180 = vmatpush3.bf16.msra.mxu0 %v9179_v48 }
0x1c93   :  { %9182 = vmatprep.subr.bf16.mxu0 %v9181_v50 }
0x1c96   :  { %9184 = vmatpush3.bf16.msra.mxu0 %v9183_v9 }
0x1c97   :  { %9186 = vmatprep.subr.bf16.mxu0 %v9185_v53 }
0x1c9a   :  { %9188 = vmatpush3.bf16.msra.mxu0 %v9187_v29 }
0x1c9b   :  { %9190 = vmatprep.subr.bf16.mxu0 %v9189_v57  ;;  %v5730_v57 = vld [vmem:[%s13384_s11 + $0x88] sm:$0xff] }
0x1c9c   :  { %v9197_v5 = vpack.c.bf16 %v5730_v57, %v5714_v19  ;;  %v7940_v57 = vld [vmem:[%s13385_s9] ss:$0 sm:$0xff] }
0x1c9e   :  { %9192 = vmatpush3.bf16.msra.mxu0 %v9191_v8  ;;  %v5734_v8 = vld [vmem:[%s13384_s11 + $0xa8] sm:$0xff]  ;;  %9198 = vmatprep.subr.bf16.mxu1 %v9197_v5  ;;  %v7941_v5 = vld [vmem:[%s13386_s10] ss:$0 sm:$0xff] }
0x1c9f   :  { %9194 = vmatprep.subr.bf16.mxu0 %v9193_v2  ;;  %v9229_v2 = vpack.c.bf16 %v5734_v8, %v5718_v10  ;;  %9200 = vmatpush1.bf16.msra.mxu1 %v9199_v7  ;;  %v5715_v8 = vld [vmem:[%s13384_s11 + $0x10] sm:$0xff]  ;;  %v5737_v7 = vld [vmem:[%s13384_s11 + $0xc0] sm:$0xff] }
0x1ca2   :  { %9196 = vmatpush3.bf16.msra.mxu0 %v9195_v61  ;;  %v5733_v61 = vld [vmem:[%s13384_s11 + $0xa0] sm:$0xff] }
0x1ca3   :  { %9230 = vmatprep.subr.bf16.mxu0 %v9229_v2  ;;  %v5721_v2 = vld [vmem:[%s13384_s11 + $0x40] sm:$0xff] }
0x1d37   :  { %v5236_v15 = vpop.f32.mrb[64].mxu0 }
0x1d38   :  { %5319 = vrot.lane.b32.xlu0 %v5236_v15, %s9775_s26  ;;  %v8836_v20 = vpop.f32.mrb[65].mxu0  ;;  %v9231_v15 = vpack.c.bf16 %v5733_v61, %v5717_v23  ;;  %v5748_v23 = vld [vmem:[%s13384_s11 + $0x118] sm:$0xff] }
0x1d39   :  { %v5746_v20 = vld [vmem:[%s13384_s11 + $0x108] sm:$0xff]  ;;  %v5764_v61 = vld [vmem:[%s13384_s11 + $0x198] sm:$0xff] }
0x1d3b   :  { %v5313_v16 = vpop.f32.mrb[76].mxu1 }
0x1d3c   :  { %3977 = vrot.lane.b32.xlu0 %v11103_v52, %s9775_s26  ;;  %v8841_v25 = vpop.f32.mrb[77].mxu1 }
0x1d3d   :  { %v5750_v25 = vld [vmem:[%s13384_s11 + $0x128] sm:$0xff] }
0x1d40   :  { %5321 = vrot.lane.b32.xlu0 %v5313_v16, %s9775_s26  ;;  %v5762_v16 = vld [vmem:[%s13384_s11 + $0x188] sm:$0xff] }
0x1d57   :  { %v8206_v12 = vpop.f32.mrb[66].mxu0 }
0x1d58   :  { %v8207_v47 = vpop.f32.mrb[67].mxu0 }
0x1d59   :  { %v8208_v31 = vadd.f32 %v8207_v47, %v8206_v12  ;;  %v9201_v12 = vpack.c.bf16 %v5762_v16, %v5746_v20  ;;  %v5766_v47 = vld [vmem:[%s13384_s11 + $0x1a8] sm:$0xff]  ;;  %v9215_v16 = vpack.c.bf16 %v5731_v62, %v5715_v8 }
0x1d5a   :  { %v5758_v8 = vld [vmem:[%s13384_s11 + $0x168] sm:$0xff] }
0x1d5b   :  { %v8209_v32 = vpop.f32.mrb[68].mxu0  ;;  %v8244_v37 = vpop.f32.mrb[78].mxu1  ;;  %v5509_v30 = vadd.f32 %v8208_v31, %v7939_v58  ;;  %v5745_v31 = vld [vmem:[%s13384_s11 + $0x100] sm:$0xff]  ;;  %9202 = vmatprep.subr.bf16.mxu1 %v9201_v12  ;;  %v5747_v12 = vld [vmem:[%s13384_s11 + $0x110] sm:$0xff]  ;;  %v5774_v62 = vld [vmem:[%s13384_s11 + $0x1e8] sm:$0xff] }
0x1d5c   :  { %v8210_v26 = vpop.f32.mrb[69].mxu0  ;;  %v8245_v18 = vpop.f32.mrb[79].mxu1 }
0x1d5d   :  { %v8211_v13 = vadd.f32 %v8210_v26, %v8209_v32  ;;  %v8246_v3 = vadd.f32 %v8245_v18, %v8244_v37  ;;  %v9233_v32 = vpack.c.bf16 %v5766_v47, %v5750_v25  ;;  %v5749_v26 = vld [vmem:[%s13384_s11 + $0x120] sm:$0xff]  ;;  %v9263_v25 = vpack.c.bf16 %v5737_v7, %v5721_v2  ;;  %v5763_v47 = vld [vmem:[%s13384_s11 + $0x190] sm:$0xff] }
0x1d5e   :  { %v5765_v18 = vld [vmem:[%s13384_s11 + $0x1a0] sm:$0xff]  ;;  %v5751_v7 = vld [vmem:[%s13384_s11 + $0x130] sm:$0xff] }
0x1d5f   :  { %v5584_v6 = vadd.f32 %v8246_v3, %v5509_v30  ;;  %v5514_v11 = vadd.f32 %v8211_v13, %v7939_v58  ;;  %v5761_v58 = vld [vmem:[%s13384_s11 + $0x180] sm:$0xff]  ;;  %v9235_v30 = vpack.c.bf16 %v5765_v18, %v5749_v26  ;;  %v5778_v13 = vld [vmem:[%s13384_s11 + $0x208] sm:$0xff]  ;;  %v5780_v18 = vld [vmem:[%s13384_s11 + $0x218] sm:$0xff] }
0x1d60   :  { %v9203_v37 = vpack.c.bf16 %v5761_v58, %v5745_v31  ;;  %v5794_v3 = vld [vmem:[%s13384_s11 + $0x288] sm:$0xff]  ;;  %v9217_v58 = vpack.c.bf16 %v5764_v61, %v5748_v23  ;;  %v5769_v26 = vld [vmem:[%s13384_s11 + $0x1c0] sm:$0xff]  ;;  %v5767_v23 = vld [vmem:[%s13384_s11 + $0x1b0] sm:$0xff] }
0x1d61   :  { %v5757_v61 = vld [vmem:[%s13384_s11 + $0x160] sm:$0xff] }
0x1d62   :  { %9204 = vmatpush1.bf16.msra.mxu1 %v9203_v37  ;;  %v5753_v37 = vld [vmem:[%s13384_s11 + $0x140] sm:$0xff] }
0x1daa   :  { %v5320_v60 = vpop.permute.xlu0 %5319 }
0x1dab   :  { %5325 = vst.msk [vmem:[#allocation2 + $0x28] sm:$0xff] %vm1964_vm3, %v5320_v60  ;;  %v9205_v60 = vpack.c.bf16 %v5794_v3, %v5778_v13  ;;  %v5786_v13 = vld [vmem:[%s13384_s11 + $0x248] sm:$0xff] }
0x1dac   :  { %v5802_v3 = vld [vmem:[%s13384_s11 + $0x2c8] sm:$0xff] }
0x1dad   :  { %9206 = vmatprep.subr.bf16.mxu1 %v9205_v60  ;;  %v9219_v60 = vpack.c.bf16 %v5763_v47, %v5747_v12  ;;  %v5790_v12 = vld [vmem:[%s13384_s11 + $0x268] sm:$0xff] }
0x1dae   :  { %v3978_v52 = vpop.permute.xlu0 %3977  ;;  %v5806_v47 = vld [vmem:[%s13384_s11 + $0x2e8] sm:$0xff] }
0x1daf   :  { %3982 = vst.msk [vmem:[#allocation2 + $0x48] sm:$0xff] %vm1964_vm3, %v3978_v52  ;;  %v5798_v52 = vld [vmem:[%s13384_s11 + $0x2a8] sm:$0xff] }
0x1db2   :  { %v5322_v22 = vpop.permute.xlu0 %5321  ;;  %v5332_v33 = vld [vmem:[#allocation2 + $0x28] sm:$0xff] }
0x1db3   :  { %5326 = vst.msk [vmem:[#allocation2 + $0x58] sm:$0xff] %vm1964_vm3, %v5322_v22  ;;  %5656 = vmatprep.mubr.f32.mxu0 %v5332_v33  ;;  %v5777_v22 = vld [vmem:[%s13384_s11 + $0x200] sm:$0xff] }
0x1db4   :  { %5657 = vmatmul.mubr.f32.vlgmr.msra.gmra.mrb[70].mxu0 %v5331_v35  ;;  %v5793_v33 = vld [vmem:[%s13384_s11 + $0x280] sm:$0xff] }
0x1db5   :  { %9232 = vmatpush1.bf16.msra.mxu0 %v9231_v15  ;;  %v5770_v15 = vld [vmem:[%s13384_s11 + $0x1c8] sm:$0xff] }
0x1db6   :  { %v5336_v36 = vld [vmem:[#allocation2 + $0x48] sm:$0xff]  ;;  %9234 = vmatprep.subr.bf16.mxu0 %v9233_v32 }
0x1db7   :  { %5586 = vmatprep.mubr.f32.mxu1 %v5336_v36  ;;  %v9207_v36 = vpack.c.bf16 %v5793_v33, %v5777_v22  ;;  %v5779_v22 = vld [vmem:[%s13384_s11 + $0x210] sm:$0xff] }
0x1db8   :  { %5587 = vmatmul.mubr.f32.gmra.mrb[80].mxu1 %v5335_v34  ;;  %v5781_v34 = vld [vmem:[%s13384_s11 + $0x220] sm:$0xff]  ;;  %v5795_v33 = vld [vmem:[%s13384_s11 + $0x290] sm:$0xff] }
0x1db9   :  { %5995 = vmatprep.mubr.f32.mxu1 %v9773_v59  ;;  %9236 = vmatpush1.bf16.msra.mxu0 %v9235_v30  ;;  %v5796_v30 = vld [vmem:[%s13384_s11 + $0x298] sm:$0xff] }
0x1dba   :  { %v5338_v38 = vld [vmem:[#allocation2 + $0x58] sm:$0xff]  ;;  %9208 = vmatpush1.bf16.msra.mxu1 %v9207_v36  ;;  %v9221_v36 = vpack.c.bf16 %v5796_v30, %v5780_v18  ;;  %v9301_v30 = vpack.c.bf16 %v5806_v47, %v5790_v12  ;;  %v5759_v47 = vld [vmem:[%s13384_s11 + $0x170] sm:$0xff] }
0x1dbb   :  { %5661 = vmatprep.mubr.f32.mxu0 %v5338_v38  ;;  %v5797_v38 = vld [vmem:[%s13384_s11 + $0x2a0] sm:$0xff] }
0x1dbc   :  { %5662 = vmatmul.mubr.f32.gmra.mrb[72].mxu0 %v5337_v39  ;;  %v9239_v39 = vpack.c.bf16 %v5797_v38, %v5781_v34  ;;  %v9269_v34 = vpack.c.bf16 %v5802_v3, %v5786_v13  ;;  %v5785_v38 = vld [vmem:[%s13384_s11 + $0x240] sm:$0xff] }
0x1dbd   :  { %6149 = vmatprep.mubr.f32.mxu0 %v9773_v59  ;;  %v5789_v13 = vld [vmem:[%s13384_s11 + $0x260] sm:$0xff] }
0x1dbe   :  { %v5805_v3 = vld [vmem:[%s13384_s11 + $0x2e0] sm:$0xff] }
0x1e87   :  { %v8282_v40 = vpop.f32.mrb[70].mxu0 }
0x1e88   :  { %v8283_v21 = vpop.f32.mrb[71].mxu0 }
0x1e89   :  { %v8284_v0 = vadd.f32 %v8283_v21, %v8282_v40  ;;  %v5810_v40 = vld [vmem:[%s13384_s11 + $0x308] sm:$0xff] }
0x1e8a   :  { %v5826_v21 = vld [vmem:[%s13384_s11 + $0x388] sm:$0xff] }
0x1e8b   :  { %v5659_v17 = vadd.f32 %v8284_v0, %v5584_v6  ;;  %v8247_v41 = vpop.f32.mrb[80].mxu1  ;;  %v5782_v6 = vld [vmem:[%s13384_s11 + $0x228] sm:$0xff] }
0x1e8c   :  { %v8248_v42 = vpop.f32.mrb[81].mxu1  ;;  %v9237_v35 = vpack.c.bf16 %v5798_v52, %v5782_v6  ;;  %v5814_v0 = vld [vmem:[%s13384_s11 + $0x328] sm:$0xff]  ;;  %v9267_v52 = vpack.c.bf16 %v5769_v26, %v5753_v37  ;;  %v5783_v37 = vld [vmem:[%s13384_s11 + $0x230] sm:$0xff] }
0x1e8d   :  { %v11554_v27 = vadd.f32 %v5659_v17, %v10206_v49  ;;  %v8249_v43 = vadd.f32 %v8248_v42, %v8247_v41  ;;  %v9209_v17 = vpack.c.bf16 %v5826_v21, %v5810_v40  ;;  %v5830_v41 = vld [vmem:[%s13384_s11 + $0x3a8] sm:$0xff]  ;;  %v5809_v42 = vld [vmem:[%s13384_s11 + $0x300] sm:$0xff]  ;;  %v5812_v40 = vld [vmem:[%s13384_s11 + $0x318] sm:$0xff] }
0x1e8e   :  { %9238 = vmatprep.subr.bf16.mxu0 %v9237_v35  ;;  %v5818_v21 = vld [vmem:[%s13384_s11 + $0x348] sm:$0xff]  ;;  %v5799_v26 = vld [vmem:[%s13384_s11 + $0x2b0] sm:$0xff] }
0x1e8f   :  { %13420 = vst [vmem:[#allocation3_spill] sm:$0xff] %v11554_v27  ;;  %v5589_v44 = vadd.f32 %v8249_v43, %v5514_v11  ;;  %v8285_v45 = vpop.f32.mrb[72].mxu0  ;;  %v5671_v28 = vsel %vm399_vm0, %v11554_v27, 0.0  ;;  %9240 = vmatpush1.bf16.msra.mxu0 %v9239_v39  ;;  %v5825_v11 = vld [vmem:[%s13384_s11 + $0x380] sm:$0xff]  ;;  %v9241_v43 = vpack.c.bf16 %v5830_v41, %v5814_v0  ;;  %9210 = vmatprep.subr.bf16.mxu1 %v9209_v17  ;;  %v5834_v0 = vld [vmem:[%s13384_s11 + $0x3c8] sm:$0xff] }
0x1e90   :  { %v8286_v46 = vpop.f32.mrb[73].mxu0  ;;  %5672 = vadd.xlane.f32.xlu0 %v5671_v28  ;;  %v5829_v28 = vld [vmem:[%s13384_s11 + $0x3a0] sm:$0xff]  ;;  %v9223_v41 = vpack.c.bf16 %v5795_v33, %v5779_v22  ;;  %v5838_v22 = vld [vmem:[%s13384_s11 + $0x3e8] sm:$0xff]  ;;  %v9255_v33 = vpack.c.bf16 %v5799_v26, %v5783_v37  ;;  %v5808_v37 = vld [vmem:[%s13384_s11 + $0x2f8] sm:$0xff] }
0x1e91   :  { %v8287_v48 = vadd.f32 %v8286_v46, %v8285_v45  ;;  %v5813_v45 = vld [vmem:[%s13384_s11 + $0x320] sm:$0xff]  ;;  %9242 = vmatprep.subr.bf16.mxu0 %v9241_v43  ;;  %v5827_v43 = vld [vmem:[%s13384_s11 + $0x390] sm:$0xff] }
0x1e92   :  { %v9243_v46 = vpack.c.bf16 %v5829_v28, %v5813_v45  ;;  %v5801_v39 = vld [vmem:[%s13384_s11 + $0x2c0] sm:$0xff]  ;;  %v9273_v28 = vpack.c.bf16 %v5834_v0, %v5818_v21  ;;  %v5724_v21 = vld [vmem:[%s13384_s11 + $0x58] sm:$0xff] }
0x1e93   :  { %v5664_v50 = vadd.f32 %v8287_v48, %v5589_v44  ;;  %v9211_v44 = vpack.c.bf16 %v5825_v11, %v5809_v42  ;;  %v5716_v48 = vld [vmem:[%s13384_s11 + $0x18] sm:$0xff]  ;;  %v9271_v42 = vpack.c.bf16 %v5801_v39, %v5785_v38  ;;  %v5811_v11 = vld [vmem:[%s13384_s11 + $0x310] sm:$0xff] }
0x1e94   :  { %9244 = vmatpush1.bf16.msra.mxu0 %v9243_v46  ;;  %v5817_v46 = vld [vmem:[%s13384_s11 + $0x340] sm:$0xff]  ;;  %v5740_v0 = vld [vmem:[%s13384_s11 + $0xd8] sm:$0xff] }
0x1e95   :  { %v11559_v63 = vadd.f32 %v5664_v50, %v10210_v54  ;;  %9212 = vmatpush1.bf16.msra.mxu1 %v9211_v44  ;;  %v5732_v50 = vld [vmem:[%s13384_s11 + $0x98] sm:$0xff] }
0x1e97   :  { %13421 = vst [vmem:[#allocation4_spill] sm:$0xff] %v11559_v63  ;;  %v5674_v24 = vsel %vm399_vm0, %v11559_v63, 0.0 }
0x1e98   :  { %5675 = vadd.xlane.f32.xlu1 %v5674_v24  ;;  %v5722_v24 = vld [vmem:[%s13384_s11 + $0x48] sm:$0xff] }
0x1f1d   :  { %v5673_v51 = vpop.xlane.xlu0 %5672 }
0x1f1e   :  { %v5677_v49 = vmul.f32 0.015625, %v5673_v51  ;;  %v9213_v51 = vpack.c.bf16 %v5732_v50, %v5716_v48  ;;  %v5833_v48 = vld [vmem:[%s13384_s11 + $0x3c0] sm:$0xff]  ;;  %v5720_v50 = vld [vmem:[%s13384_s11 + $0x38] sm:$0xff] }
0x1f20   :  { %v11564_v4 = vsub.f32 %v11554_v27, %v5677_v49  ;;  %v5738_v49 = vld [vmem:[%s13384_s11 + $0xc8] sm:$0xff]  ;;  %9214 = vmatprep.subr.bf16.mxu1 %v9213_v51 }
0x1f21   :  { %v5726_v51 = vld [vmem:[%s13384_s11 + $0x68] sm:$0xff] }
0x1f22   :  { %v5681_v9 = vmul.f32 %v11564_v4, %v11564_v4 }
0x1f24   :  { %v5683_v53 = vsel %vm399_vm0, %v5681_v9, 0.0  ;;  %v9261_v9 = vpack.c.bf16 %v5738_v49, %v5722_v24  ;;  %v5736_v24 = vld [vmem:[%s13384_s11 + $0xb8] sm:$0xff]  ;;  %v5742_v49 = vld [vmem:[%s13384_s11 + $0xe8] sm:$0xff] }
0x1f25   :  { %v5676_v55 = vpop.xlane.xlu1 %5675  ;;  %5684 = vadd.xlane.f32.xlu0 %v5683_v53 }
0x1f26   :  { %v5678_v56 = vmul.f32 0.015625, %v5676_v55  ;;  %9262 = vmatprep.subr.bf16.mxu0 %v9261_v9  ;;  %v9227_v9 = vpack.c.bf16 %v5827_v43, %v5811_v11  ;;  %v9277_v43 = vpack.c.bf16 %v5740_v0, %v5724_v21  ;;  %v6855_v21 = vld [vmem:[%s13387_s13 + $0xa0] sm:$0xff]  ;;  %v6856_v0 = vld [vmem:[%s13387_s13 + $0xa8] sm:$0xff] }
0x1f28   :  { %v11570_v54 = vsub.f32 %v11559_v63, %v5678_v56 }
0x1f2a   :  { %v5682_v29 = vmul.f32 %v11570_v54, %v11570_v54 }
0x1f2c   :  { %v5686_v1 = vsel %vm399_vm0, %v5682_v29, 0.0 }
0x1f2d   :  { %5687 = vadd.xlane.f32.xlu0 %v5686_v1 }
0x1fb2   :  { %v5685_v53 = vpop.xlane.xlu0 %5684 }
0x1fb3   :  { %v5689_v55 = vmul.f32 0.015625, %v5685_v53  ;;  %v9275_v53 = vpack.c.bf16 %v5833_v48, %v5817_v46  ;;  %v5756_v48 = vld [vmem:[%s13384_s11 + $0x158] sm:$0xff] }
0x1fb5   :  { %v5691_v56 = vadd.f32 1e-05, %v5689_v55  ;;  %v5719_v55 = vld [vmem:[%s13384_s11 + $0x30] sm:$0xff] }
0x1fb7   :  { %9700 = vrsqrt.f32 %v5691_v56  ;;  %v9245_v56 = vpack.c.bf16 %v5736_v24, %v5720_v50  ;;  %v5772_v50 = vld [vmem:[%s13384_s11 + $0x1d8] sm:$0xff] }
0x1fba   :  { %v5688_v29 = vpop.xlane.xlu0 %5687 }
0x1fbb   :  { %v5690_v1 = vmul.f32 0.015625, %v5688_v29  ;;  %v9293_v29 = vpack.c.bf16 %v5742_v49, %v5726_v51  ;;  %v9281_v51 = vpack.c.bf16 %v5772_v50, %v5756_v48  ;;  %v5755_v49 = vld [vmem:[%s13384_s11 + $0x150] sm:$0xff]  ;;  %v6842_v48 = vld [vmem:[%s13387_s13 + $0x38] sm:$0xff] }
0x1fbd   :  { %v5692_v19 = vadd.f32 1e-05, %v5690_v1  ;;  %v5735_v1 = vld [vmem:[%s13384_s11 + $0xb0] sm:$0xff] }
0x1fbf   :  { %9702 = vrsqrt.f32 %v5692_v19  ;;  %v5725_v19 = vld [vmem:[%s13384_s11 + $0x60] sm:$0xff] }
0x1fc1   :  { %v9701_v10 = vpop.eup %9700 }
0x1fc2   :  { %v5695_v14 = vmul.f32 %v9701_v10, %v11564_v4  ;;  %v5754_v4 = vld [vmem:[%s13384_s11 + $0x148] sm:$0xff]  ;;  %v5752_v10 = vld [vmem:[%s13384_s11 + $0x138] sm:$0xff] }
0x1fc3   :  { %v9265_v32 = vpack.c.bf16 %v5770_v15, %v5754_v4  ;;  %v5773_v4 = vld [vmem:[%s13384_s11 + $0x1e0] sm:$0xff]  ;;  %v5784_v15 = vld [vmem:[%s13384_s11 + $0x238] sm:$0xff] }
0x1fc4   :  { %v5703_v20 = vmul.f32 %v7940_v57, %v5695_v14  ;;  %v9247_v14 = vpack.c.bf16 %v5735_v1, %v5719_v55  ;;  %v5804_v55 = vld [vmem:[%s13384_s11 + $0x2d8] sm:$0xff]  ;;  %v5787_v1 = vld [vmem:[%s13384_s11 + $0x250] sm:$0xff] }
0x1fc6   :  { %v11720_v31 = vadd.f32 %v7941_v5, %v5703_v20 }
0x1fc8   :  { %7942 = vmatmul.mubr.msk.f32.vlgmr.msra.gmra.mrb[82].mxu1 %vm399_vm0, %v11720_v31  ;;  %7946 = vmatmul.mubr.msk.f32.vlgmr.msra.gmra.mrb[74].mxu0 %vm399_vm0, %v11720_v31 }
0x1fc9   :  { %v9703_v6 = vpop.eup %9702  ;;  %9216 = vmatpush1.bf16.msra.mxu1 %v9215_v16  ;;  %9264 = vmatpush1.bf16.msra.mxu0 %v9263_v25  ;;  %v9297_v16 = vpack.c.bf16 %v5774_v62, %v5758_v8  ;;  %v5800_v25 = vld [vmem:[%s13384_s11 + $0x2b8] sm:$0xff]  ;;  %v5819_v62 = vld [vmem:[%s13384_s11 + $0x350] sm:$0xff] }
0x1fca   :  { %v5696_v35 = vmul.f32 %v9703_v6, %v11570_v54  ;;  %9218 = vmatprep.subr.bf16.mxu1 %v9217_v58  ;;  %9266 = vmatprep.subr.bf16.mxu0 %v9265_v32  ;;  %v5828_v54 = vld [vmem:[%s13384_s11 + $0x398] sm:$0xff]  ;;  %v9251_v58 = vpack.c.bf16 %v5767_v23, %v5751_v7  ;;  %v9299_v32 = vpack.c.bf16 %v5773_v4, %v5757_v61  ;;  %v5727_v4 = vld [vmem:[%s13384_s11 + $0x70] sm:$0xff] }
0x1fcb   :  { %6001 = vmatprep.mubr.f32.mxu1 %v9773_v59  ;;  %6155 = vmatprep.mubr.f32.mxu0 %v9773_v59  ;;  %v9225_v45 = vpack.c.bf16 %v5828_v54, %v5812_v40  ;;  %v9253_v18 = vpack.c.bf16 %v5800_v25, %v5784_v15  ;;  %v5816_v6 = vld [vmem:[%s13384_s11 + $0x338] sm:$0xff]  ;;  %v5821_v40 = vld [vmem:[%s13384_s11 + $0x360] sm:$0xff]  ;;  %v5743_v15 = vld [vmem:[%s13384_s11 + $0xf0] sm:$0xff] }
0x1fcc   :  { %v5704_v17 = vmul.f32 %v7940_v57, %v5696_v35  ;;  %v5741_v57 = vld [vmem:[%s13384_s11 + $0xe0] sm:$0xff]  ;;  %v9303_v35 = vpack.c.bf16 %v5805_v3, %v5789_v13  ;;  %v5744_v7 = vld [vmem:[%s13384_s11 + $0xf8] sm:$0xff]  ;;  %v9311_v25 = vpack.c.bf16 %v5743_v15, %v5727_v4  ;;  %v5807_v13 = vld [vmem:[%s13384_s11 + $0x2f0] sm:$0xff] }
0x1fcd   :  { %9220 = vmatpush1.bf16.msra.mxu1 %v9219_v60  ;;  %9268 = vmatpush1.bf16.msra.mxu0 %v9267_v52  ;;  %v9295_v2 = vpack.c.bf16 %v5741_v57, %v5725_v19  ;;  %v5832_v60 = vld [vmem:[%s13384_s11 + $0x3b8] sm:$0xff]  ;;  %v5822_v52 = vld [vmem:[%s13384_s11 + $0x368] sm:$0xff]  ;;  %v5837_v54 = vld [vmem:[%s13384_s11 + $0x3e0] sm:$0xff] }
0x1fce   :  { %v11777_v44 = vadd.f32 %v7941_v5, %v5704_v17  ;;  %9222 = vmatprep.subr.bf16.mxu1 %v9221_v36  ;;  %9270 = vmatprep.subr.bf16.mxu0 %v9269_v34  ;;  %v5768_v5 = vld [vmem:[%s13384_s11 + $0x1b8] sm:$0xff]  ;;  %v5815_v36 = vld [vmem:[%s13384_s11 + $0x330] sm:$0xff]  ;;  %v9257_v38 = vpack.c.bf16 %v5832_v60, %v5816_v6  ;;  %v9305_v39 = vpack.c.bf16 %v5838_v22, %v5822_v52  ;;  %v6851_v17 = vld [vmem:[%s13387_s13 + $0x80] sm:$0xff] }
0x1fcf   :  { %v9249_v20 = vpack.c.bf16 %v5768_v5, %v5752_v10  ;;  %v5831_v34 = vld [vmem:[%s13384_s11 + $0x3b0] sm:$0xff]  ;;  %v9307_v11 = vpack.c.bf16 %v5837_v54, %v5821_v40  ;;  %v5820_v57 = vld [vmem:[%s13384_s11 + $0x358] sm:$0xff] }
0x1fd0   :  { %7943 = vmatmul.mubr.msk.f32.gmra.mrb[84].mxu1 %vm399_vm0, %v11777_v44  ;;  %7947 = vmatmul.mubr.msk.f32.gmra.mrb[76].mxu0 %vm399_vm0, %v11777_v44  ;;  %v5803_v19 = vld [vmem:[%s13384_s11 + $0x2d0] sm:$0xff]  ;;  %v5836_v10 = vld [vmem:[%s13384_s11 + $0x3d8] sm:$0xff] }
0x1fd1   :  { %9224 = vmatpush1.bf16.msra.mxu1 %v9223_v41  ;;  %9272 = vmatpush1.bf16.msra.mxu0 %v9271_v42  ;;  %v6852_v41 = vld [vmem:[%s13387_s13 + $0x88] sm:$0xff]  ;;  %v9259_v42 = vpack.c.bf16 %v5831_v34, %v5815_v36  ;;  %v9287_v5 = vpack.c.bf16 %v5803_v19, %v5787_v1  ;;  %v9289_v8 = vpack.c.bf16 %v5836_v10, %v5820_v57  ;;  %v5824_v3 = vld [vmem:[%s13384_s11 + $0x378] sm:$0xff]  ;;  %v5823_v22 = vld [vmem:[%s13384_s11 + $0x370] sm:$0xff] }
0x1fd2   :  { %9226 = vmatprep.subr.bf16.mxu1 %v9225_v45  ;;  %9274 = vmatprep.subr.bf16.mxu0 %v9273_v28  ;;  %v5723_v45 = vld [vmem:[%s13384_s11 + $0x50] sm:$0xff]  ;;  %v9325_v46 = vpack.c.bf16 %v6852_v41, %v6851_v17  ;;  %v5840_v6 = vld [vmem:[%s13384_s11 + $0x3f8] sm:$0xff]  ;;  %v6835_v36 = vld [vmem:[%s13387_s13] sm:$0xff]  ;;  %v9333_v17 = vpack.c.bf16 %v6856_v0, %v6855_v21 }
0x1fd3   :  { %6072 = vmatprep.mubr.f32.mxu1 %v9773_v59  ;;  %6303 = vmatprep.mubr.f32.mxu0 %v9773_v59  ;;  %v5739_v28 = vld [vmem:[%s13384_s11 + $0xd0] sm:$0xff]  ;;  %v9321_v52 = vpack.c.bf16 %v5840_v6, %v5824_v3  ;;  %v6836_v34 = vld [vmem:[%s13387_s13 + $0x8] sm:$0xff]  ;;  %v6838_v40 = vld [vmem:[%s13387_s13 + $0x18] sm:$0xff] }
0x1fd4   :  { %v9279_v24 = vpack.c.bf16 %v5739_v28, %v5723_v45  ;;  %v6839_v41 = vld [vmem:[%s13387_s13 + $0x20] sm:$0xff]  ;;  %v6858_v45 = vld [vmem:[%s13387_s13 + $0xb8] sm:$0xff]  ;;  %v6844_v57 = vld [vmem:[%s13387_s13 + $0x48] sm:$0xff] }
0x1fd5   :  { %9228 = vmatpush1.bf16.msra.mxu1 %v9227_v9  ;;  %9276 = vmatpush1.bf16.msra.mxu0 %v9275_v53  ;;  %v5771_v9 = vld [vmem:[%s13384_s11 + $0x1d0] sm:$0xff]  ;;  %v5788_v53 = vld [vmem:[%s13384_s11 + $0x258] sm:$0xff]  ;;  %v6843_v1 = vld [vmem:[%s13387_s13 + $0x40] sm:$0xff] }
0x1fd6   :  { %9246 = vmatprep.subr.bf16.mxu1 %v9245_v56  ;;  %9294 = vmatprep.subr.bf16.mxu0 %v9293_v29  ;;  %v9283_v56 = vpack.c.bf16 %v5771_v9, %v5755_v49  ;;  %v9285_v29 = vpack.c.bf16 %v5804_v55, %v5788_v53  ;;  %v6859_v9 = vld [vmem:[%s13387_s13 + $0xc0] sm:$0xff]  ;;  %v6860_v53 = vld [vmem:[%s13387_s13 + $0xc8] sm:$0xff]  ;;  %v9343_v10 = vpack.c.bf16 %v6844_v57, %v6843_v1  ;;  %v6845_v15 = vld [vmem:[%s13387_s13 + $0x50] sm:$0xff] }
0x1fd7   :  { %v9341_v55 = vpack.c.bf16 %v6860_v53, %v6859_v9  ;;  %v6875_v0 = vld [vmem:[%s13387_s13 + $0x140] sm:$0xff]  ;;  %v6898_v1 = vld [vmem:[%s13387_s13 + $0x1f8] sm:$0xff]  ;;  %v6881_v57 = vld [vmem:[%s13387_s13 + $0x170] sm:$0xff] }
0x1fd8   :  { %7944 = vmatmul.mubr.msk.f32.vlgmr.msra.gmra.mrb[86].mxu1 %vm399_vm0, %v11720_v31  ;;  %7950 = vmatmul.mubr.msk.f32.vlgmr.msra.gmra.mrb[78].mxu0 %vm399_vm0, %v11720_v31  ;;  %v6879_v53 = vld [vmem:[%s13387_s13 + $0x160] sm:$0xff] }
0x1fd9   :  { %9248 = vmatpush1.bf16.msra.mxu1 %v9247_v14  ;;  %9296 = vmatpush1.bf16.msra.mxu0 %v9295_v2  ;;  %v5835_v14 = vld [vmem:[%s13384_s11 + $0x3d0] sm:$0xff]  ;;  %v5728_v2 = vld [vmem:[%s13384_s11 + $0x78] sm:$0xff] }
0x1fda   :  { %6078 = vmatprep.mubr.f32.mxu1 %v9773_v59  ;;  %6309 = vmatprep.mubr.f32.mxu0 %v9773_v59  ;;  %v9291_v23 = vpack.c.bf16 %v5835_v14, %v5819_v62  ;;  %v9309_v61 = vpack.c.bf16 %v5744_v7, %v5728_v2  ;;  %v6861_v14 = vld [vmem:[%s13387_s13 + $0xd0] sm:$0xff]  ;;  %v6862_v2 = vld [vmem:[%s13387_s13 + $0xd8] sm:$0xff] }
0x1fdb   :  { %9250 = vmatprep.subr.bf16.mxu1 %v9249_v20  ;;  %9298 = vmatprep.subr.bf16.mxu0 %v9297_v16  ;;  %v5760_v20 = vld [vmem:[%s13384_s11 + $0x178] sm:$0xff]  ;;  %v6869_v7 = vld [vmem:[%s13387_s13 + $0x110] sm:$0xff] }
0x1fdc   :  { %7945 = vmatmul.mubr.msk.f32.gmra.mrb[88].mxu1 %vm399_vm0, %v11777_v44  ;;  %7951 = vmatmul.mubr.msk.f32.gmra.mrb[80].mxu0 %vm399_vm0, %v11777_v44  ;;  %v5776_v16 = vld [vmem:[%s13384_s11 + $0x1f8] sm:$0xff] }
0x1fdd   :  { %9252 = vmatpush1.bf16.msra.mxu1 %v9251_v58  ;;  %9300 = vmatpush1.bf16.msra.mxu0 %v9299_v32  ;;  %v9313_v12 = vpack.c.bf16 %v5776_v16, %v5760_v20  ;;  %v5775_v58 = vld [vmem:[%s13384_s11 + $0x1f0] sm:$0xff]  ;;  %v5792_v32 = vld [vmem:[%s13384_s11 + $0x278] sm:$0xff] }
0x1fde   :  { %9254 = vmatprep.subr.bf16.mxu1 %v9253_v18  ;;  %9302 = vmatprep.subr.bf16.mxu0 %v9301_v30  ;;  %v9315_v26 = vpack.c.bf16 %v5775_v58, %v5759_v47  ;;  %v9317_v18 = vpack.c.bf16 %v5808_v37, %v5792_v32  ;;  %v5791_v30 = vld [vmem:[%s13384_s11 + $0x270] sm:$0xff]  ;;  %v6846_v20 = vld [vmem:[%s13387_s13 + $0x58] sm:$0xff]  ;;  %v6863_v58 = vld [vmem:[%s13387_s13 + $0xe0] sm:$0xff] }
0x1fdf   :  { %6226 = vmatprep.mubr.f32.mxu1 %v9773_v59  ;;  %6457 = vmatprep.mubr.f32.mxu0 %v9773_v59  ;;  %v9319_v60 = vpack.c.bf16 %v5807_v13, %v5791_v30  ;;  %v9347_v16 = vpack.c.bf16 %v6846_v20, %v6845_v15  ;;  %v6864_v32 = vld [vmem:[%s13387_s13 + $0xe8] sm:$0xff]  ;;  %v6871_v37 = vld [vmem:[%s13387_s13 + $0x120] sm:$0xff] }
0x1fe0   :  { %v6847_v30 = vld [vmem:[%s13387_s13 + $0x60] sm:$0xff]  ;;  %v6848_v13 = vld [vmem:[%s13387_s13 + $0x68] sm:$0xff] }
0x1fe1   :  { %9256 = vmatpush1.bf16.msra.mxu1 %v9255_v33  ;;  %9304 = vmatpush1.bf16.msra.mxu0 %v9303_v35  ;;  %v5839_v33 = vld [vmem:[%s13384_s11 + $0x3f0] sm:$0xff]  ;;  %v9351_v6 = vpack.c.bf16 %v6848_v13, %v6847_v30 }
0x1fe2   :  { %9258 = vmatprep.subr.bf16.mxu1 %v9257_v38  ;;  %9306 = vmatprep.subr.bf16.mxu0 %v9305_v39  ;;  %v9323_v35 = vpack.c.bf16 %v5839_v33, %v5823_v22  ;;  %v9327_v38 = vpack.c.bf16 %v6836_v34, %v6835_v36  ;;  %v6853_v39 = vld [vmem:[%s13387_s13 + $0x90] sm:$0xff] }
0x1fe3   :  { %v6865_v33 = vld [vmem:[%s13387_s13 + $0xf0] sm:$0xff] }
0x1fe4   :  { %v6873_v36 = vld [vmem:[%s13387_s13 + $0x130] sm:$0xff] }
0x1fe5   :  { %9260 = vmatpush1.bf16.msra.mxu1 %v9259_v42  ;;  %9308 = vmatpush1.bf16.msra.mxu0 %v9307_v11  ;;  %v6840_v42 = vld [vmem:[%s13387_s13 + $0x28] sm:$0xff] }
0x1fe6   :  { %9278 = vmatprep.subr.bf16.mxu1 %v9277_v43  ;;  %9326 = vmatprep.subr.bf16.mxu0 %v9325_v46  ;;  %v9335_v11 = vpack.c.bf16 %v6840_v42, %v6839_v41  ;;  %v6857_v43 = vld [vmem:[%s13387_s13 + $0xb0] sm:$0xff]  ;;  %v6915_v41 = vld [vmem:[%s13387_s13 + $0x280] sm:$0xff] }
0x1fe7   :  { %v9337_v28 = vpack.c.bf16 %v6858_v45, %v6857_v43  ;;  %v6841_v46 = vld [vmem:[%s13387_s13 + $0x30] sm:$0xff] }
0x1fe8   :  { %7948 = vmatmul.mubr.msk.f32.vlgmr.msra.gmra.mrb[90].mxu1 %vm399_vm0, %v11720_v31  ;;  %7954 = vmatmul.mubr.msk.f32.vlgmr.msra.gmra.mrb[82].mxu0 %vm399_vm0, %v11720_v31  ;;  %v9339_v50 = vpack.c.bf16 %v6842_v48, %v6841_v46  ;;  %v6893_v45 = vld [vmem:[%s13387_s13 + $0x1d0] sm:$0xff] }
0x1fe9   :  { %9280 = vmatpush1.bf16.msra.mxu1 %v9279_v24  ;;  %6232 = vmatprep.mubr.f32.mxu1 %v9773_v59  ;;  %v6883_v24 = vld [vmem:[%s13387_s13 + $0x180] sm:$0xff]  ;;  %v6877_v48 = vld [vmem:[%s13387_s13 + $0x150] sm:$0xff] }
0x1fea   :  { %6463 = vmatprep.mubr.f32.mxu0 %v9773_v59  ;;  %9282 = vmatprep.subr.bf16.mxu1 %v9281_v51  ;;  %v6884_v51 = vld [vmem:[%s13387_s13 + $0x188] sm:$0xff] }
0x1feb   :  { %9328 = vmatpush3.bf16.msra.mxu0 %v9327_v38  ;;  %v9357_v49 = vpack.c.bf16 %v6884_v51, %v6883_v24  ;;  %v6874_v38 = vld [vmem:[%s13387_s13 + $0x138] sm:$0xff]  ;;  %v6895_v51 = vld [vmem:[%s13387_s13 + $0x1e0] sm:$0xff] }
0x1fec   :  { %7949 = vmatmul.mubr.msk.f32.gmra.mrb[92].mxu1 %vm399_vm0, %v11777_v44  ;;  %7955 = vmatmul.mubr.msk.f32.gmra.mrb[84].mxu0 %vm399_vm0, %v11777_v44 }
0x1fed   :  { %9284 = vmatpush1.bf16.msra.mxu1 %v9283_v56  ;;  %6380 = vmatprep.mubr.f32.mxu1 %v9773_v59  ;;  %v6867_v56 = vld [vmem:[%s13387_s13 + $0x100] sm:$0xff] }
0x1fee   :  { %9286 = vmatprep.subr.bf16.mxu1 %v9285_v29  ;;  %v6868_v29 = vld [vmem:[%s13387_s13 + $0x108] sm:$0xff] }
0x1fef   :  { %v9359_v19 = vpack.c.bf16 %v6868_v29, %v6867_v56  ;;  %v6897_v29 = vld [vmem:[%s13387_s13 + $0x1f0] sm:$0xff] }
0x1ff1   :  { %9288 = vmatpush1.bf16.msra.mxu1 %v9287_v5  ;;  %v6885_v5 = vld [vmem:[%s13387_s13 + $0x190] sm:$0xff] }
0x1ff2   :  { %9290 = vmatprep.subr.bf16.mxu1 %v9289_v8  ;;  %v6886_v8 = vld [vmem:[%s13387_s13 + $0x198] sm:$0xff] }
0x1ff3   :  { %v9361_v62 = vpack.c.bf16 %v6886_v8, %v6885_v5  ;;  %v6947_v8 = vld [vmem:[%s13387_s13 + $0x380] sm:$0xff] }
0x1ff5   :  { %9292 = vmatpush1.bf16.msra.mxu1 %v9291_v23  ;;  %v9345_v23 = vpack.c.bf16 %v6862_v2, %v6861_v14  ;;  %v5845_v2 = vlaneseq }
0x1ff6   :  { %9310 = vmatprep.subr.bf16.mxu1 %v9309_v61  ;;  %v6870_v61 = vld [vmem:[%s13387_s13 + $0x118] sm:$0xff] }
0x1ff7   :  { %v9363_v4 = vpack.c.bf16 %v6870_v61, %v6869_v7  ;;  %v12221_v7 = vshrl.u32 %v5845_v2, 7  ;;  %v12227_v61 = vld [vmem:[%s13388_s12] sm:$0xff] }
0x1ff8   :  { %7952 = vmatmul.mubr.msk.f32.vlgmr.msra.gmra.mrb[94].mxu1 %vm399_vm0, %v11720_v31 }
0x1ff9   :  { %9312 = vmatpush1.bf16.msra.mxu1 %v9311_v25  ;;  %6386 = vmatprep.mubr.f32.mxu1 %v9773_v59  ;;  %v6887_v25 = vld [vmem:[%s13387_s13 + $0x1a0] sm:$0xff]  ;;  %v5867_v20 = vsub.s32 5, %v12221_v7 }
0x1ffa   :  { %9314 = vmatprep.subr.bf16.mxu1 %v9313_v12  ;;  %v6888_v12 = vld [vmem:[%s13387_s13 + $0x1a8] sm:$0xff] }
0x1ffb   :  { %v9365_v47 = vpack.c.bf16 %v6888_v12, %v6887_v25 }
0x1ffc   :  { %7953 = vmatmul.mubr.msk.f32.gmra.mrb[96].mxu1 %vm399_vm0, %v11777_v44 }
0x1ffd   :  { %9316 = vmatpush1.bf16.msra.mxu1 %v9315_v26  ;;  %6534 = vmatprep.mubr.f32.mxu1 %v9773_v59  ;;  %v9349_v26 = vpack.c.bf16 %v6864_v32, %v6863_v58  ;;  %v12240_v32 = vrot.slane %v12227_v61, %v5867_v20 }
0x1ffe   :  { %9318 = vmatprep.subr.bf16.mxu1 %v9317_v18  ;;  %v6872_v18 = vld [vmem:[%s13387_s13 + $0x128] sm:$0xff] }
0x1fff   :  { %v9367_v3 = vpack.c.bf16 %v6872_v18, %v6871_v37 }
0x2001   :  { %9320 = vmatpush1.bf16.msra.mxu1 %v9319_v60  ;;  %v6889_v60 = vld [vmem:[%s13387_s13 + $0x1b0] sm:$0xff] }
0x2002   :  { %9322 = vmatprep.subr.bf16.mxu1 %v9321_v52  ;;  %v6890_v52 = vld [vmem:[%s13387_s13 + $0x1b8] sm:$0xff] }
0x2003   :  { %v9369_v22 = vpack.c.bf16 %v6890_v52, %v6889_v60 }
0x2005   :  { %9324 = vmatpush1.bf16.msra.mxu1 %v9323_v35  ;;  %v6866_v35 = vld [vmem:[%s13387_s13 + $0xf8] sm:$0xff] }
0x2006   :  { %9358 = vmatprep.subr.bf16.mxu1 %v9357_v49  ;;  %v9353_v34 = vpack.c.bf16 %v6866_v35, %v6865_v33  ;;  %v6896_v49 = vld [vmem:[%s13387_s13 + $0x1e8] sm:$0xff] }
0x2007   :  { %v9381_v9 = vpack.c.bf16 %v6896_v49, %v6895_v51 }
0x2008   :  { %7956 = vmatmul.mubr.msk.f32.vlgmr.msra.gmra.mrb[98].mxu1 %vm399_vm0, %v11720_v31 }
0x2009   :  { %6540 = vmatprep.mubr.f32.mxu1 %v9773_v59  ;;  %v6854_v59 = vld [vmem:[%s13387_s13 + $0x98] sm:$0xff]  ;;  %9360 = vmatpush3.bf16.msra.mxu1 %v9359_v19  ;;  %v9385_v19 = vpack.c.bf16 %v6898_v1, %v6897_v29 }
0x200a   :  { %v9329_v31 = vpack.c.bf16 %v6854_v59, %v6853_v39  ;;  %9362 = vmatprep.subr.bf16.mxu1 %v9361_v62  ;;  %v6849_v39 = vld [vmem:[%s13387_s13 + $0x70] sm:$0xff]  ;;  %v6850_v59 = vld [vmem:[%s13387_s13 + $0x78] sm:$0xff]  ;;  %v6948_v62 = vld [vmem:[%s13387_s13 + $0x388] sm:$0xff] }
0x200b   :  { %v9421_v14 = vpack.c.bf16 %v6948_v62, %v6947_v8 }
0x200c   :  { %7957 = vmatmul.mubr.msk.f32.gmra.mrb[100].mxu1 %vm399_vm0, %v11777_v44  ;;  %v6837_v44 = vld [vmem:[%s13387_s13 + $0x10] sm:$0xff]  ;;  %9330 = vmatprep.subr.bf16.mxu0 %v9329_v31  ;;  %v9371_v31 = vpack.c.bf16 %v6874_v38, %v6873_v36 }
0x200d   :  { %v9331_v54 = vpack.c.bf16 %v6838_v40, %v6837_v44  ;;  %9364 = vmatpush3.bf16.msra.mxu1 %v9363_v4  ;;  %v9355_v44 = vpack.c.bf16 %v6850_v59, %v6849_v39  ;;  %v6891_v40 = vld [vmem:[%s13387_s13 + $0x1c0] sm:$0xff]  ;;  %v5851_v4 = vsub.s32 1, %v12221_v7  ;;  %v5855_v39 = vsub.s32 2, %v12221_v7 }
0x200e   :  { %9366 = vmatprep.subr.bf16.mxu1 %v9365_v47 }
0x200f   :  { %9332 = vmatpush3.bf16.msra.mxu0 %v9331_v54  ;;  %v6892_v54 = vld [vmem:[%s13387_s13 + $0x1c8] sm:$0xff] }
0x2010   :  { %9334 = vmatprep.subr.bf16.mxu0 %v9333_v17  ;;  %v9373_v21 = vpack.c.bf16 %v6892_v54, %v6891_v40  ;;  %v6876_v17 = vld [vmem:[%s13387_s13 + $0x148] sm:$0xff]  ;;  %v5859_v40 = vsub.s32 3, %v12221_v7 }
0x2011   :  { %9368 = vmatpush3.bf16.msra.mxu1 %v9367_v3  ;;  %v9375_v42 = vpack.c.bf16 %v6876_v17, %v6875_v0 }
0x2012   :  { %9370 = vmatprep.subr.bf16.mxu1 %v9369_v22 }
0x2013   :  { %9336 = vmatpush3.bf16.msra.mxu0 %v9335_v11  ;;  %v6916_v11 = vld [vmem:[%s13387_s13 + $0x288] sm:$0xff] }
0x2014   :  { %9338 = vmatprep.subr.bf16.mxu0 %v9337_v28  ;;  %v9389_v43 = vpack.c.bf16 %v6916_v11, %v6915_v41  ;;  %v6894_v28 = vld [vmem:[%s13387_s13 + $0x1d8] sm:$0xff] }
0x2015   :  { %9372 = vmatpush3.bf16.msra.mxu1 %v9371_v31  ;;  %v9377_v46 = vpack.c.bf16 %v6894_v28, %v6893_v45 }
0x2016   :  { %9374 = vmatprep.subr.bf16.mxu1 %v9373_v21  ;;  %v5863_v21 = vsub.s32 4, %v12221_v7 }
0x2017   :  { %9340 = vmatpush3.bf16.msra.mxu0 %v9339_v50  ;;  %v6878_v50 = vld [vmem:[%s13387_s13 + $0x158] sm:$0xff] }
0x2018   :  { %9342 = vmatprep.subr.bf16.mxu0 %v9341_v55  ;;  %v9379_v24 = vpack.c.bf16 %v6878_v50, %v6877_v48  ;;  %v6880_v55 = vld [vmem:[%s13387_s13 + $0x168] sm:$0xff]  ;;  %v5864_v45 = vrot.slane %v12227_v61, %v5863_v21 }
0x2019   :  { %9376 = vmatpush3.bf16.msra.mxu1 %v9375_v42  ;;  %v9383_v56 = vpack.c.bf16 %v6880_v55, %v6879_v53  ;;  %v5856_v42 = vrot.slane %v12227_v61, %v5855_v39  ;;  %v12285_v53 = vld [vmem:[%s13388_s12 + $0x8] sm:$0xff] }
0x201a   :  { %9378 = vmatprep.subr.bf16.mxu1 %v9377_v46  ;;  %v12300_v62 = vrot.slane %v12285_v53, %v5851_v4 }
0x201b   :  { %9344 = vmatpush3.bf16.msra.mxu0 %v9343_v10  ;;  %v6882_v10 = vld [vmem:[%s13387_s13 + $0x178] sm:$0xff] }
0x201c   :  { %9346 = vmatprep.subr.bf16.mxu0 %v9345_v23  ;;  %v9387_v5 = vpack.c.bf16 %v6882_v10, %v6881_v57  ;;  %v5847_v23 = vsub.s32 0, %v12221_v7 }
0x201d   :  { %9380 = vmatpush3.bf16.msra.mxu1 %v9379_v24 }
0x201e   :  { %9382 = vmatprep.subr.bf16.mxu1 %v9381_v9  ;;  %v5848_v15 = vrot.slane %v12227_v61, %v5847_v23 }
0x201f   :  { %9348 = vmatpush3.bf16.msra.mxu0 %v9347_v16  ;;  %v5852_v16 = vrot.slane %v12227_v61, %v5851_v4 }
0x2020   :  { %9350 = vmatprep.subr.bf16.mxu0 %v9349_v26 }
0x2021   :  { %9384 = vmatpush3.bf16.msra.mxu1 %v9383_v56 }
0x2022   :  { %9386 = vmatprep.subr.bf16.mxu1 %v9385_v19 }
0x2023   :  { %9352 = vmatpush3.bf16.msra.mxu0 %v9351_v6 }
0x2024   :  { %9354 = vmatprep.subr.bf16.mxu0 %v9353_v34 }
0x2025   :  { %9388 = vmatpush3.bf16.msra.mxu1 %v9387_v5 }
0x2026   :  { %9422 = vmatprep.subr.bf16.mxu1 %v9421_v14 }
0x2027   :  { %9356 = vmatpush3.bf16.msra.mxu0 %v9355_v44 }
0x2028   :  { %9390 = vmatprep.subr.bf16.mxu0 %v9389_v43  ;;  %v5860_v43 = vrot.slane %v12227_v61, %v5859_v40 }
0x209b   :  { %v5997_v25 = vpop.f32.mrb[82].mxu1  ;;  %v6151_v12 = vpop.f32.mrb[74].mxu0 }
0x209c   :  { %v12235_v47 = vadd.f32 %v5997_v25, %v5848_v15  ;;  %v5999_v58 = vpop.f32.mrb[83].mxu1  ;;  %v6153_v37 = vpop.f32.mrb[75].mxu0  ;;  %v12291_v29 = vadd.f32 %v6151_v12, %v5864_v45  ;;  %v13400_v12 = vsub.s32 6, %v12221_v7 }
0x209d   :  { %v12242_v26 = vadd.f32 %v5999_v58, %v5852_v16  ;;  %v12250_v3 = vadd.f32 %v6153_v37, %v12240_v32  ;;  %v12311_v37 = vrot.slane %v12285_v53, %v5847_v23 }
0x209e   :  { %v6547_v18 = vmul.f32 %v12235_v47, %v12235_v47  ;;  %13422 = vst [vmem:[#allocation5_spill] sm:$0xff] %v12291_v29 }
0x209f   :  { %v6548_v30 = vmul.f32 %v12242_v26, %v12242_v26  ;;  %v6552_v36 = vmul.f32 %v12250_v3, %v12250_v3 }
0x20a0   :  { %v6579_v13 = vmul.f32 %v6547_v18, %v12235_v47  ;;  %v13399_v18 = vsub.s32 7, %v12221_v7 }
0x20a1   :  { %v6580_v6 = vmul.f32 %v6548_v30, %v12242_v26  ;;  %v6584_v17 = vmul.f32 %v6552_v36, %v12250_v3  ;;  %v6551_v30 = vmul.f32 %v12291_v29, %v12291_v29 }
0x20a2   :  { %v6611_v60 = vmul.f32 0.044715, %v6579_v13 }
0x20a3   :  { %v6612_v52 = vmul.f32 0.044715, %v6580_v6  ;;  %v6003_v22 = vpop.f32.mrb[84].mxu1  ;;  %v6157_v33 = vpop.f32.mrb[76].mxu0  ;;  %v6616_v48 = vmul.f32 0.044715, %v6584_v17 }
0x20a4   :  { %v6643_v35 = vadd.f32 %v6611_v60, %v12235_v47  ;;  %v6005_v34 = vpop.f32.mrb[85].mxu1  ;;  %v6159_v38 = vpop.f32.mrb[77].mxu0  ;;  %v12258_v31 = vadd.f32 %v6003_v22, %v5848_v15  ;;  %v12316_v13 = vadd.f32 %v6157_v33, %v5864_v45  ;;  %v12334_v33 = vrot.slane %v12227_v61, %v13400_v12  ;;  %v12350_v45 = vld [vmem:[%s13387_s13 + $0x200] sm:$0xff] }
0x20a5   :  { %v6644_v59 = vadd.f32 %v6612_v52, %v12242_v26  ;;  %v12260_v44 = vadd.f32 %v6005_v34, %v5852_v16  ;;  %v6648_v10 = vadd.f32 %v6616_v48, %v12250_v3 }
0x20a6   :  { %v6675_v54 = vmul.f32 0.7978846, %v6643_v35  ;;  %v6563_v11 = vmul.f32 %v12258_v31, %v12258_v31  ;;  %13423 = vst [vmem:[#allocation6_spill] sm:$0xff] %v12316_v13  ;;  %v12322_v35 = vadd.f32 %v6159_v38, %v12240_v32 }
0x20a7   :  { %v6676_v0 = vmul.f32 0.7978846, %v6644_v59  ;;  %v6564_v41 = vmul.f32 %v12260_v44, %v12260_v44  ;;  %v6680_v52 = vmul.f32 0.7978846, %v6648_v10 }
0x20a8   :  { %9704 = vtanh.f32 %v6675_v54  ;;  %v6595_v9 = vmul.f32 %v6563_v11, %v12258_v31  ;;  %13424 = vst [vmem:[#allocation7_spill] sm:$0xff] %v12322_v35  ;;  %v6567_v11 = vmul.f32 %v12316_v13, %v12316_v13 }
0x20a9   :  { %v6596_v50 = vmul.f32 %v6564_v41, %v12260_v44  ;;  %9706 = vtanh.f32 %v6676_v0  ;;  %v6583_v41 = vmul.f32 %v6551_v30, %v12291_v29  ;;  %v12381_v30 = vld [vmem:[%s13387_s13 + $0x210] sm:$0xff] }
0x20aa   :  { %v6627_v15 = vmul.f32 0.044715, %v6595_v9  ;;  %9708 = vtanh.f32 %v6680_v52 }
0x20ab   :  { %v6074_v28 = vpop.f32.mrb[86].mxu1  ;;  %v12276_v46 = vpop.f32.mrb[78].mxu0  ;;  %v6628_v5 = vmul.f32 0.044715, %v6596_v50  ;;  %v6568_v50 = vmul.f32 %v12322_v35, %v12322_v35 }
0x20ac   :  { %v12279_v24 = vadd.f32 %v6074_v28, %v5856_v42  ;;  %v6076_v51 = vpop.f32.mrb[87].mxu1  ;;  %v6307_v49 = vpop.f32.mrb[79].mxu0  ;;  %v6659_v36 = vadd.f32 %v6627_v15, %v12258_v31  ;;  %v12355_v28 = vld [vmem:[%s13387_s13 + $0x208] sm:$0xff] }
0x20ad   :  { %v12287_v55 = vadd.f32 %v6076_v51, %v5860_v43  ;;  %v6660_v22 = vadd.f32 %v6628_v5, %v12260_v44  ;;  %v12327_v34 = vadd.f32 %v6307_v49, %v12300_v62  ;;  %v12367_v51 = vld [vmem:[%s13387_s13 + $0x298] sm:$0xff] }
0x20ae   :  { %v6549_v56 = vmul.f32 %v12279_v24, %v12279_v24  ;;  %v6691_v49 = vmul.f32 0.7978846, %v6659_v36  ;;  %v12392_v36 = vld [vmem:[%s13387_s13 + $0x218] sm:$0xff] }
0x20af   :  { %v6550_v1 = vmul.f32 %v12287_v55, %v12287_v55  ;;  %v6080_v19 = vpop.f32.mrb[88].mxu1  ;;  %v12295_v57 = vpop.f32.mrb[80].mxu0  ;;  %13425 = vst [vmem:[#allocation8_spill] sm:$0xff] %v12327_v34  ;;  %v6692_v48 = vmul.f32 0.7978846, %v6660_v22  ;;  %v6556_v9 = vmul.f32 %v12327_v34, %v12327_v34 }
0x20b0   :  { %v6581_v8 = vmul.f32 %v6549_v56, %v12279_v24  ;;  %v6082_v14 = vpop.f32.mrb[89].mxu1  ;;  %v12302_v2 = vpop.f32.mrb[81].mxu0  ;;  %v12329_v59 = vadd.f32 %v6080_v19, %v5856_v42  ;;  %v5896_v42 = vrot.slane %v12285_v53, %v5863_v21 }
0x20b1   :  { %v6582_v16 = vmul.f32 %v6550_v1, %v12287_v55  ;;  %v12305_v25 = vadd.f32 %v6082_v14, %v5860_v43  ;;  %v12345_v43 = vrot.slane %v12227_v61, %v13399_v18  ;;  %v12362_v61 = vld [vmem:[%s13387_s13 + $0x290] sm:$0xff] }
0x20b2   :  { %v6613_v58 = vmul.f32 0.044715, %v6581_v8  ;;  %v9705_v4 = vpop.eup %9704  ;;  %13426 = vst [vmem:[#allocation9_spill] sm:$0xff] %v12329_v59  ;;  %v6565_v10 = vmul.f32 %v12329_v59, %v12329_v59  ;;  %v6615_v8 = vmul.f32 0.044715, %v6583_v41  ;;  %v12411_v41 = vld [vmem:[%s13387_s13 + $0x220] sm:$0xff] }
0x20b3   :  { %v6614_v6 = vmul.f32 0.044715, %v6582_v16  ;;  %v6566_v60 = vmul.f32 %v12305_v25, %v12305_v25  ;;  %v9707_v54 = vpop.eup %9706  ;;  %v6739_v0 = vadd.f32 1.0, %v9705_v4  ;;  %v9393_v4 = vpack.c.bf16 %v12367_v51, %v12362_v61  ;;  %v12536_v18 = vld [vmem:[%s13387_s13 + $0x310] sm:$0xff] }
0x20b4   :  { %v6645_v23 = vadd.f32 %v6613_v58, %v12279_v24  ;;  %v6740_v56 = vadd.f32 1.0, %v9707_v54  ;;  %v9391_v58 = vpack.c.bf16 %v12355_v28, %v12350_v45  ;;  %v12397_v54 = vld [vmem:[%s13387_s13 + $0x2a0] sm:$0xff]  ;;  %v6588_v28 = vmul.f32 %v6556_v9, %v12327_v34  ;;  %13431 = vst [vmem:[#allocation14_spill] sm:$0xff] %v12536_v18 }
0x20b5   :  { %v6646_v32 = vadd.f32 %v6614_v6, %v12287_v55  ;;  %v6598_v38 = vmul.f32 %v6566_v60, %v12305_v25  ;;  %v6771_v1 = vmul.f32 0.5, %v6739_v0  ;;  %v6599_v6 = vmul.f32 %v6567_v11, %v12316_v13  ;;  %v12402_v0 = vld [vmem:[%s13387_s13 + $0x2a8] sm:$0xff] }
0x20b6   :  { %v6677_v17 = vmul.f32 0.7978846, %v6645_v23  ;;  %v6772_v16 = vmul.f32 0.5, %v6740_v56  ;;  %v6600_v60 = vmul.f32 %v6568_v50, %v12322_v35  ;;  %v12416_v11 = vld [vmem:[%s13387_s13 + $0x228] sm:$0xff]  ;;  %v12429_v50 = vld [vmem:[%s13387_s13 + $0x2b8] sm:$0xff]  ;;  %v9397_v9 = vpack.c.bf16 %v12402_v0, %v12397_v54  ;;  %v12445_v56 = vld [vmem:[%s13387_s13 + $0x230] sm:$0xff] }
0x20b7   :  { %v6630_v21 = vmul.f32 0.044715, %v6598_v38  ;;  %v6678_v19 = vmul.f32 0.7978846, %v6646_v32  ;;  %v6803_v45 = vmul.f32 %v6771_v1, %v12235_v47  ;;  %v12436_v47 = vrot.slane %v12285_v53, %v5867_v20  ;;  %v12450_v1 = vld [vmem:[%s13387_s13 + $0x238] sm:$0xff]  ;;  %v12455_v20 = vld [vmem:[%s13387_s13 + $0x2c0] sm:$0xff] }
0x20b8   :  { %9710 = vtanh.f32 %v6677_v17  ;;  %v6804_v32 = vmul.f32 %v6772_v16, %v12242_v26  ;;  %v6597_v26 = vmul.f32 %v6565_v10, %v12329_v59  ;;  %v12486_v0 = vld [vmem:[%s13387_s13 + $0x240] sm:$0xff] }
0x20b9   :  { %v6662_v5 = vadd.f32 %v6630_v21, %v12305_v25  ;;  %9712 = vtanh.f32 %v6692_v48  ;;  %v12424_v48 = vld [vmem:[%s13387_s13 + $0x2b0] sm:$0xff] }
0x20ba   :  { %9714 = vtanh.f32 %v6691_v49  ;;  %7162 = vmatprep.mubr.f32.mxu0 %v6804_v32  ;;  %v9395_v49 = vpack.c.bf16 %v12392_v36, %v12381_v30  ;;  %v9399_v30 = vpack.c.bf16 %v12416_v11, %v12411_v41  ;;  %v6632_v36 = vmul.f32 0.044715, %v6600_v60  ;;  %v12491_v32 = vld [vmem:[%s13387_s13 + $0x248] sm:$0xff]  ;;  %v9709_v41 = vpop.eup %9708 }
0x20bb   :  { %v6228_v14 = vpop.f32.mrb[90].mxu1  ;;  %v6459_v15 = vpop.f32.mrb[82].mxu0  ;;  %v6694_v17 = vmul.f32 0.7978846, %v6662_v5  ;;  %9716 = vtanh.f32 %v6678_v19  ;;  %v6647_v19 = vadd.f32 %v6615_v8, %v12291_v29  ;;  %7163 = vmatmul.mubr.f32.vlgmr.msra.gmra.mrb[86].mxu0 %v6803_v45  ;;  %v12475_v8 = vld [vmem:[%s13387_s13 + $0x300] sm:$0xff]  ;;  %v6744_v27 = vadd.f32 1.0, %v9709_v41 }
0x20bc   :  { %v12385_v52 = vadd.f32 %v6459_v15, %v5896_v42  ;;  %v6230_v22 = vpop.f32.mrb[91].mxu1  ;;  %v12387_v23 = vpop.f32.mrb[83].mxu0  ;;  %v12459_v10 = vadd.f32 %v6228_v14, %v12334_v33  ;;  %v6631_v14 = vmul.f32 0.044715, %v6599_v6  ;;  %9392 = vmatpush3.bf16.msra.mxu0 %v9391_v58  ;;  %v6620_v11 = vmul.f32 0.044715, %v6588_v28 }
0x20bd   :  { %v12406_v38 = vadd.f32 %v6230_v22, %v12345_v43  ;;  %v12470_v22 = vld [vmem:[%s13387_s13 + $0x2c8] sm:$0xff]  ;;  %9718 = vtanh.f32 %v6694_v17  ;;  %v6629_v45 = vmul.f32 0.044715, %v6597_v26  ;;  %9394 = vmatprep.subr.bf16.mxu0 %v9393_v4  ;;  %v9401_v6 = vpack.c.bf16 %v12429_v50, %v12424_v48  ;;  %v12509_v4 = vld [vmem:[%s13387_s13 + $0x390] sm:$0xff]  ;;  %v12514_v26 = vld [vmem:[%s13387_s13 + $0x398] sm:$0xff] }
0x20be   :  { %13427 = vst [vmem:[#allocation10_spill] sm:$0xff] %v12385_v52  ;;  %v9403_v58 = vpack.c.bf16 %v12450_v1, %v12445_v56  ;;  %v6679_v48 = vmul.f32 0.7978846, %v6647_v19  ;;  %v6553_v50 = vmul.f32 %v12459_v10, %v12459_v10  ;;  %v12541_v19 = vld [vmem:[%s13387_s13 + $0x318] sm:$0xff]  ;;  %v12551_v28 = vrot.slane %v12285_v53, %v5859_v40  ;;  %v12556_v1 = vld [vmem:[%s13387_s13 + $0x250] sm:$0xff] }
0x20bf   :  { %13428 = vst [vmem:[#allocation11_spill] sm:$0xff] %v12406_v38  ;;  %v6554_v21 = vmul.f32 %v12406_v38, %v12406_v38  ;;  %v6234_v61 = vpop.f32.mrb[92].mxu1  ;;  %v6465_v51 = vpop.f32.mrb[84].mxu0  ;;  %v6776_v29 = vmul.f32 0.5, %v6744_v27  ;;  %v12593_v27 = vld [vmem:[%s13387_s13 + $0x3a0] sm:$0xff] }
0x20c0   :  { %v12461_v5 = vadd.f32 %v6465_v51, %v5896_v42  ;;  %v6236_v15 = vpop.f32.mrb[93].mxu1  ;;  %v12463_v16 = vpop.f32.mrb[85].mxu0  ;;  %v12480_v42 = vld [vmem:[%s13387_s13 + $0x308] sm:$0xff]  ;;  %v12500_v51 = vrot.slane %v12285_v53, %v5855_v39  ;;  %v12519_v39 = vld [vmem:[%s13387_s13 + $0x2d0] sm:$0xff]  ;;  %v12546_v12 = vadd.f32 %v6234_v61, %v12334_v33  ;;  %9396 = vmatpush3.bf16.msra.mxu0 %v9395_v49  ;;  %v6652_v33 = vadd.f32 %v6620_v11, %v12327_v34 }
0x20c1   :  { %13430 = vst [vmem:[#allocation13_spill] sm:$0xff] %v12463_v16  ;;  %v6586_v54 = vmul.f32 %v6554_v21, %v12406_v38  ;;  %v12524_v56 = vadd.f32 %v6236_v15, %v12345_v43  ;;  %v6663_v43 = vadd.f32 %v6631_v14, %v12316_v13  ;;  %v6664_v15 = vadd.f32 %v6632_v36, %v12322_v35  ;;  %v12561_v14 = vld [vmem:[%s13387_s13 + $0x258] sm:$0xff] }
0x20c2   :  { %13429 = vst [vmem:[#allocation12_spill] sm:$0xff] %v12461_v5  ;;  %v9711_v60 = vpop.eup %9710  ;;  %v6661_v61 = vadd.f32 %v6629_v45, %v12329_v59  ;;  %9398 = vmatprep.subr.bf16.mxu0 %v9397_v9  ;;  %9720 = vtanh.f32 %v6679_v48  ;;  %v6585_v11 = vmul.f32 %v6553_v50, %v12459_v10  ;;  %v6569_v41 = vmul.f32 %v12546_v12, %v12546_v12 }
0x20c3   :  { %v6618_v21 = vmul.f32 0.044715, %v6586_v54  ;;  %v12531_v54 = vld [vmem:[%s13387_s13 + $0x2d8] sm:$0xff]  ;;  %v9713_v36 = vpop.eup %9712  ;;  %v6741_v17 = vadd.f32 1.0, %v9711_v60  ;;  %v6570_v9 = vmul.f32 %v12524_v56, %v12524_v56  ;;  %v6695_v60 = vmul.f32 0.7978846, %v6663_v43 }
0x20c4   :  { %v9715_v49 = vpop.eup %9714  ;;  %v6696_v40 = vmul.f32 0.7978846, %v6664_v15  ;;  %9400 = vmatpush3.bf16.msra.mxu0 %v9399_v30  ;;  %v12579_v34 = vmul.f32 0.7978846, %v6652_v33  ;;  %v6693_v52 = vmul.f32 0.7978846, %v6661_v61  ;;  %v13432_v33 = vpack.c.bf16 %v12470_v22, %v12455_v20 }
0x20c5   :  { %v6650_v63 = vadd.f32 %v6618_v21, %v12406_v38  ;;  %v9717_v16 = vpop.eup %9716  ;;  %v6756_v21 = vadd.f32 1.0, %v9713_v36  ;;  %v6773_v5 = vmul.f32 0.5, %v6741_v17  ;;  %v6755_v48 = vadd.f32 1.0, %v9715_v49  ;;  %9402 = vmatprep.subr.bf16.mxu0 %v9401_v6  ;;  %v12627_v22 = vld [vmem:[%s13387_s13 + $0x328] sm:$0xff] }
0x20c6   :  { %v6742_v38 = vadd.f32 1.0, %v9717_v16  ;;  %v6617_v45 = vmul.f32 0.044715, %v6585_v11  ;;  %v6602_v43 = vmul.f32 %v6570_v9, %v12524_v56  ;;  %v6601_v17 = vmul.f32 %v6569_v41, %v12546_v12  ;;  %v12642_v11 = vld [vmem:[%s13387_s13 + $0x268] sm:$0xff]  ;;  %v12647_v9 = vld [vmem:[%s13387_s13 + $0x3b0] sm:$0xff] }
0x20c7   :  { %v9719_v50 = vpop.eup %9718  ;;  %v6682_v13 = vmul.f32 0.7978846, %v6650_v63  ;;  %v6788_v35 = vmul.f32 0.5, %v6756_v21  ;;  %v6787_v15 = vmul.f32 0.5, %v6755_v48  ;;  %v6805_v16 = vmul.f32 %v6773_v5, %v12279_v24  ;;  %v12622_v5 = vld [vmem:[%s13387_s13 + $0x320] sm:$0xff]  ;;  %v12659_v21 = vld [vmem:[%s13387_s13 + $0x3b8] sm:$0xff] }
0x20c8   :  { %9404 = vmatpush3.bf16.msra.mxu0 %v9403_v58  ;;  %v6774_v6 = vmul.f32 0.5, %v6742_v38  ;;  %v6758_v61 = vadd.f32 1.0, %v9719_v50  ;;  %9722 = vtanh.f32 %v6693_v52  ;;  %v6808_v24 = vmul.f32 %v6776_v29, %v12250_v3  ;;  %v12632_v3 = vld [vmem:[%s13387_s13 + $0x260] sm:$0xff] }
0x20c9   :  { %v6820_v36 = vmul.f32 %v6788_v35, %v12260_v44  ;;  %9406 = vmatprep.subr.bf16.mxu0 %v13432_v33  ;;  %v12603_v44 = vld [vmem:[%s13387_s13 + $0x3a8] sm:$0xff]  ;;  %v12608_v35 = vld [vmem:[%s13387_s13 + $0x2e0] sm:$0xff]  ;;  %9724 = vtanh.f32 %v6682_v13  ;;  %v12651_v13 = vadd.f32 %v12276_v46, %v12311_v37  ;;  %v12669_v46 = vld [vmem:[%s13387_s13 + $0x2f8] sm:$0xff]  ;;  %v12673_v50 = vadd.f32 %v12302_v2, %v12300_v62 }
0x20ca   :  { %v6806_v52 = vmul.f32 %v6774_v6, %v12287_v55  ;;  %v6634_v55 = vmul.f32 0.044715, %v6602_v43  ;;  %v6790_v29 = vmul.f32 0.5, %v6758_v61  ;;  %9726 = vtanh.f32 %v6696_v40  ;;  %v12664_v40 = vld [vmem:[%s13387_s13 + $0x2f0] sm:$0xff]  ;;  %v12689_v62 = vld [vmem:[%s13387_s13 + $0x338] sm:$0xff] }
0x20cb   :  { %v6382_v59 = vpop.f32.mrb[94].mxu1  ;;  %7167 = vmatprep.mubr.f32.mxu0 %v6820_v36  ;;  %v9429_v41 = vpack.c.bf16 %v12603_v44, %v12593_v27  ;;  %9728 = vtanh.f32 %v6695_v60  ;;  %v13433_v43 = vpack.c.bf16 %v12491_v32, %v12486_v0  ;;  %v12684_v36 = vld [vmem:[%s13387_s13 + $0x330] sm:$0xff]  ;;  %v6633_v0 = vmul.f32 0.044715, %v6601_v17 }
0x20cc   :  { %v12583_v18 = vadd.f32 %v6382_v59, %v12500_v51  ;;  %v6384_v30 = vpop.f32.mrb[95].mxu1  ;;  %v6819_v59 = vmul.f32 %v6787_v15, %v12258_v31  ;;  %v12613_v31 = vld [vmem:[%s13387_s13 + $0x2e8] sm:$0xff]  ;;  %7237 = vmatprep.mubr.f32.mxu1 %v6806_v52  ;;  %v9721_v48 = vpop.eup %9720  ;;  %v6822_v15 = vmul.f32 %v6790_v29, %v12305_v25  ;;  %v12694_v2 = vld [vmem:[%s13387_s13 + $0x270] sm:$0xff]  ;;  %9730 = vtanh.f32 %v12579_v34  ;;  %v12711_v34 = vld [vmem:[%s13387_s13 + $0x278] sm:$0xff] }
0x20cd   :  { %v12588_v63 = vadd.f32 %v6384_v30, %v12551_v28  ;;  %7238 = vmatmul.mubr.f32.vlgmr.msra.gmra.mrb[102].mxu1 %v6805_v16  ;;  %9408 = vmatpush3.bf16.msra.mxu0 %v13433_v43  ;;  %v9413_v30 = vpack.c.bf16 %v12613_v31, %v12608_v35  ;;  %v6649_v25 = vadd.f32 %v6617_v45, %v12459_v10  ;;  %v12734_v16 = vld [vmem:[%s13387_s13 + $0x340] sm:$0xff]  ;;  %v13437_v44 = vsub.s32 6, %v12221_v7  ;;  %v12760_v31 = vld [vmem:[%s13387_s13 + $0x488] sm:$0xff] }
0x20ce   :  { %7168 = vmatmul.mubr.f32.gmra.mrb[88].mxu0 %v6819_v59  ;;  %v13434_v32 = vpack.c.bf16 %v12480_v42, %v12475_v8  ;;  %v13435_v60 = vpack.c.bf16 %v12531_v54, %v12519_v39  ;;  %v9431_v6 = vpack.c.bf16 %v12627_v22, %v12622_v5  ;;  %v9415_v27 = vpack.c.bf16 %v12642_v11, %v12632_v3  ;;  %v12716_v8 = vld [vmem:[%s13387_s13 + $0x3c0] sm:$0xff]  ;;  %v12721_v42 = vld [vmem:[%s13387_s13 + $0x3c8] sm:$0xff] }
0x20cf   :  { %v6558_v38 = vmul.f32 %v12588_v63, %v12588_v63  ;;  %v6388_v20 = vpop.f32.mrb[96].mxu1  ;;  %7312 = vmatprep.mubr.f32.mxu0 %v6808_v24  ;;  %v6666_v39 = vadd.f32 %v6634_v55, %v12524_v56  ;;  %7242 = vmatprep.mubr.f32.mxu1 %v6822_v15  ;;  %v13436_v54 = vpack.c.bf16 %v12514_v26, %v12509_v4  ;;  %v12739_v59 = vld [vmem:[%s13387_s13 + $0x348] sm:$0xff]  ;;  %v12744_v4 = vld [vmem:[%s13387_s13 + $0x480] sm:$0xff]  ;;  %v6681_v22 = vmul.f32 0.7978846, %v6649_v25  ;;  %v13439_v55 = vld [vmem:[#allocation14_spill] sm:$0xff] }
0x20d0   :  { %v12635_v58 = vadd.f32 %v6388_v20, %v12500_v51  ;;  %v12637_v49 = vpop.f32.mrb[97].mxu1  ;;  %9424 = vmatpush3.bf16.msra.mxu1 %v13434_v32  ;;  %9410 = vmatprep.subr.bf16.mxu0 %v13435_v60  ;;  %v9433_v45 = vpack.c.bf16 %v12659_v21, %v12647_v9  ;;  %v9417_v17 = vpack.c.bf16 %v12669_v46, %v12664_v40  ;;  %v12765_v24 = vld [vmem:[%s13387_s13 + $0x400] sm:$0xff] }
0x20d1   :  { %v6590_v51 = vmul.f32 %v6558_v38, %v12588_v63  ;;  %9426 = vmatprep.subr.bf16.mxu1 %v13436_v54  ;;  %v6555_v26 = vmul.f32 %v12651_v13, %v12651_v13  ;;  %v12750_v33 = vadd.f32 %v12295_v57, %v12311_v37  ;;  %v12755_v35 = vrot.slane %v12285_v53, %v13437_v44  ;;  %v12770_v57 = vld [vmem:[%s13387_s13 + $0x408] sm:$0xff] }
0x20d2   :  { %v6743_v37 = vadd.f32 1.0, %v9721_v48  ;;  %v6572_v52 = vmul.f32 %v12673_v50, %v12673_v50  ;;  %v12776_v38 = vadd.f32 %v12387_v23, %v12436_v47  ;;  %v13438_v20 = vpack.c.bf16 %v12561_v14, %v12556_v1  ;;  %v9723_v9 = vpop.eup %9722 }
0x20d3   :  { %v6622_v61 = vmul.f32 0.044715, %v6590_v51  ;;  %v9435_v5 = vpack.c.bf16 %v12689_v62, %v12684_v36  ;;  %v6665_v3 = vadd.f32 %v6633_v0, %v12546_v12  ;;  %v13440_v29 = vpack.c.bf16 %v12541_v19, %v13439_v55  ;;  %v9725_v21 = vpop.eup %9724  ;;  %v6958_v55 = vld [vmem:[%s13387_s13 + $0x3d8] sm:$0xff] }
0x20d4   :  { %9412 = vmatpush3.bf16.msra.mxu0 %v13438_v20  ;;  %v9419_v11 = vpack.c.bf16 %v12711_v34, %v12694_v2  ;;  %v9437_v23 = vpack.c.bf16 %v12721_v42, %v12716_v8  ;;  %v6698_v1 = vmul.f32 0.7978846, %v6666_v39  ;;  %v9439_v14 = vpack.c.bf16 %v12739_v59, %v12734_v16  ;;  %v9727_v15 = vpop.eup %9726  ;;  %v6981_v2 = vld [vmem:[%s13387_s13 + $0x490] sm:$0xff]  ;;  %v6982_v39 = vld [vmem:[%s13387_s13 + $0x498] sm:$0xff]  ;;  %v6959_v42 = vld [vmem:[%s13387_s13 + $0x3e0] sm:$0xff] }
0x20d5   :  { %9428 = vmatpush3.bf16.msra.mxu1 %v13440_v29  ;;  %9414 = vmatprep.subr.bf16.mxu0 %v9413_v30  ;;  %v9453_v51 = vpack.c.bf16 %v12760_v31, %v12744_v4  ;;  %v9455_v19 = vpack.c.bf16 %v12770_v57, %v12765_v24  ;;  %v6587_v40 = vmul.f32 %v6555_v26, %v12651_v13  ;;  %v6757_v43 = vadd.f32 1.0, %v9723_v9  ;;  %v9729_v25 = vpop.eup %9728  ;;  %v13441_v31 = vld [vmem:[#allocation9_spill] sm:$0xff]  ;;  %v6967_v24 = vld [vmem:[%s13387_s13 + $0x420] sm:$0xff]  ;;  %v6968_v57 = vld [vmem:[%s13387_s13 + $0x428] sm:$0xff] }
0x20d6   :  { %9430 = vmatprep.subr.bf16.mxu1 %v9429_v41  ;;  %v6571_v46 = vmul.f32 %v12750_v33, %v12750_v33  ;;  %v6654_v48 = vadd.f32 %v6622_v61, %v12588_v63  ;;  %v6775_v41 = vmul.f32 0.5, %v6743_v37  ;;  %v6604_v30 = vmul.f32 %v6572_v52, %v12673_v50  ;;  %v9731_v54 = vpop.eup %9730  ;;  %v13443_v9 = vld [vmem:[#allocation5_spill] sm:$0xff] }
0x20d7   :  { %v6560_v36 = vmul.f32 %v12776_v38, %v12776_v38  ;;  %v6746_v62 = vadd.f32 1.0, %v9725_v21  ;;  %9732 = vtanh.f32 %v6681_v22  ;;  %v6697_v0 = vmul.f32 0.7978846, %v6665_v3  ;;  %v13442_v22 = vld [vmem:[#allocation11_spill] sm:$0xff] }
0x20d8   :  { %9416 = vmatpush3.bf16.msra.mxu0 %v9415_v27  ;;  %v6789_v32 = vmul.f32 0.5, %v6757_v43  ;;  %v6760_v34 = vadd.f32 1.0, %v9727_v15  ;;  %v6759_v61 = vadd.f32 1.0, %v9729_v25  ;;  %9734 = vtanh.f32 %v6698_v1  ;;  %v6966_v43 = vld [vmem:[%s13387_s13 + $0x418] sm:$0xff]  ;;  %v13444_v15 = vld [vmem:[#allocation7_spill] sm:$0xff] }
0x20d9   :  { %9432 = vmatpush3.bf16.msra.mxu1 %v9431_v6  ;;  %9418 = vmatprep.subr.bf16.mxu0 %v9417_v17  ;;  %v6778_v27 = vmul.f32 0.5, %v6746_v62  ;;  %v6686_v44 = vmul.f32 0.7978846, %v6654_v48  ;;  %v6748_v37 = vadd.f32 1.0, %v9731_v54  ;;  %v6619_v52 = vmul.f32 0.044715, %v6587_v40 }
0x20da   :  { %9434 = vmatprep.subr.bf16.mxu1 %v9433_v45  ;;  %v6821_v6 = vmul.f32 %v6789_v32, %v13441_v31  ;;  %v6792_v17 = vmul.f32 0.5, %v6760_v34  ;;  %v6603_v20 = vmul.f32 %v6571_v46, %v12750_v33  ;;  %v6957_v45 = vld [vmem:[%s13387_s13 + $0x3d0] sm:$0xff]  ;;  %v9457_v29 = vpack.c.bf16 %v6982_v39, %v6981_v2  ;;  %v6984_v2 = vld [vmem:[%s13387_s13 + $0x4a8] sm:$0xff]  ;;  %v6942_v25 = vld [vmem:[%s13387_s13 + $0x358] sm:$0xff] }
0x20db   :  { %v6536_v60 = vpop.f32.mrb[98].mxu1  ;;  %v6810_v3 = vmul.f32 %v6778_v27, %v13442_v22  ;;  %v6807_v1 = vmul.f32 %v6775_v41, %v13443_v9  ;;  %v6636_v21 = vmul.f32 0.044715, %v6604_v30  ;;  %v6592_v48 = vmul.f32 %v6560_v36, %v12776_v38  ;;  %v6965_v46 = vld [vmem:[%s13387_s13 + $0x410] sm:$0xff]  ;;  %v6983_v36 = vld [vmem:[%s13387_s13 + $0x4a0] sm:$0xff]  ;;  %v13445_v39 = vld [vmem:[#allocation6_spill] sm:$0xff] }
0x20dc   :  { %v12811_v4 = vadd.f32 %v6536_v60, %v12755_v35  ;;  %v12813_v26 = vpop.f32.mrb[99].mxu1  ;;  %9420 = vmatpush3.bf16.msra.mxu0 %v9419_v11  ;;  %7243 = vmatmul.mubr.f32.gmra.mrb[104].mxu1 %v6821_v6  ;;  %v6791_v11 = vmul.f32 0.5, %v6759_v61  ;;  %v6824_v62 = vmul.f32 %v6792_v17, %v13444_v15  ;;  %9736 = vtanh.f32 %v6697_v0  ;;  %v13446_v61 = vld [vmem:[#allocation8_spill] sm:$0xff]  ;;  %v6985_v31 = vld [vmem:[%s13387_s13 + $0x4b0] sm:$0xff]  ;;  %v6986_v6 = vld [vmem:[%s13387_s13 + $0x4b8] sm:$0xff] }
0x20dd   :  { %9454 = vmatprep.subr.bf16.mxu0 %v9453_v51  ;;  %9436 = vmatpush3.bf16.msra.mxu1 %v9435_v5  ;;  %v6780_v51 = vmul.f32 0.5, %v6748_v37  ;;  %v9441_v5 = vpack.c.bf16 %v6958_v55, %v6957_v45  ;;  %9738 = vtanh.f32 %v6686_v44  ;;  %v6651_v32 = vadd.f32 %v6619_v52, %v12651_v13  ;;  %v6969_v9 = vld [vmem:[%s13387_s13 + $0x430] sm:$0xff] }
0x20de   :  { %7387 = vmatprep.mubr.f32.mxu1 %v6810_v3  ;;  %9438 = vmatprep.subr.bf16.mxu1 %v9437_v23  ;;  %v6635_v60 = vmul.f32 0.044715, %v6603_v20  ;;  %v9459_v8 = vpack.c.bf16 %v6966_v43, %v6965_v46  ;;  %v6960_v23 = vld [vmem:[%s13387_s13 + $0x3e8] sm:$0xff]  ;;  %v6668_v0 = vadd.f32 %v6636_v21, %v12673_v50  ;;  %v6624_v34 = vmul.f32 0.044715, %v6592_v48 }
0x20df   :  { %v6542_v40 = vpop.f32.mrb[100].mxu1  ;;  %7313 = vmatmul.mubr.f32.vlgmr.msra.gmra.mrb[90].mxu0 %v6807_v1  ;;  %v6823_v54 = vmul.f32 %v6791_v11, %v13445_v39  ;;  %v9461_v27 = vpack.c.bf16 %v6984_v2, %v6983_v36  ;;  %v6812_v44 = vmul.f32 %v6780_v51, %v13446_v61  ;;  %v12883_v37 = vadd.f32 %v12637_v49, %v12551_v28  ;;  %v6944_v20 = vld [vmem:[%s13387_s13 + $0x368] sm:$0xff]  ;;  %v6962_v49 = vld [vmem:[%s13387_s13 + $0x3f8] sm:$0xff]  ;;  %v6987_v11 = vld [vmem:[%s13387_s13 + $0x4c0] sm:$0xff] }
0x20e0   :  { %v12834_v41 = vadd.f32 %v6542_v40, %v12755_v35  ;;  %v12836_v30 = vpop.f32.mrb[101].mxu1  ;;  %v6941_v35 = vld [vmem:[%s13387_s13 + $0x350] sm:$0xff]  ;;  %7317 = vmatprep.mubr.f32.mxu0 %v6824_v62  ;;  %9456 = vmatpush3.bf16.msra.mxu0 %v9455_v19  ;;  %v13447_v52 = vsub.s32 7, %v12221_v7  ;;  %v9445_v59 = vpack.c.bf16 %v6960_v23, %v6959_v42  ;;  %v6683_v3 = vmul.f32 0.7978846, %v6651_v32  ;;  %v6970_v1 = vld [vmem:[%s13387_s13 + $0x438] sm:$0xff] }
0x20e1   :  { %9458 = vmatprep.subr.bf16.mxu0 %v9457_v29  ;;  %9440 = vmatpush3.bf16.msra.mxu1 %v9439_v14  ;;  %v9443_v19 = vpack.c.bf16 %v6942_v25, %v6941_v35  ;;  %v9733_v17 = vpop.eup %9732  ;;  %v6943_v14 = vld [vmem:[%s13387_s13 + $0x360] sm:$0xff]  ;;  %v6667_v28 = vadd.f32 %v6635_v60, %v12750_v33  ;;  %v9463_v7 = vpack.c.bf16 %v6968_v57, %v6967_v24  ;;  %v6700_v45 = vmul.f32 0.7978846, %v6668_v0  ;;  %v6945_v40 = vld [vmem:[%s13387_s13 + $0x370] sm:$0xff]  ;;  %v6988_v46 = vld [vmem:[%s13387_s13 + $0x4c8] sm:$0xff] }
0x20e2   :  { %v12888_v16 = vrot.slane %v12285_v53, %v13447_v52  ;;  %9442 = vmatprep.subr.bf16.mxu1 %v9441_v5  ;;  %v9735_v22 = vpop.eup %9734  ;;  %v6961_v53 = vld [vmem:[%s13387_s13 + $0x3f0] sm:$0xff]  ;;  %v6656_v55 = vadd.f32 %v6624_v34, %v12776_v38  ;;  %v9465_v29 = vpack.c.bf16 %v6986_v6, %v6985_v31  ;;  %v6557_v21 = vmul.f32 %v12583_v18, %v12583_v18  ;;  %v6946_v36 = vld [vmem:[%s13387_s13 + $0x378] sm:$0xff]  ;;  %v7011_v2 = vld [vmem:[%s13387_s13 + $0x580] sm:$0xff] }
0x20e3   :  { %7318 = vmatmul.mubr.f32.gmra.mrb[92].mxu0 %v6823_v54  ;;  %v9447_v48 = vpack.c.bf16 %v6944_v20, %v6943_v14  ;;  %v6745_v43 = vadd.f32 1.0, %v9733_v17  ;;  %v6574_v15 = vmul.f32 %v12883_v37, %v12883_v37  ;;  %v9449_v51 = vpack.c.bf16 %v6962_v49, %v6961_v53  ;;  %v7012_v5 = vld [vmem:[%s13387_s13 + $0x588] sm:$0xff]  ;;  %v6971_v23 = vld [vmem:[%s13387_s13 + $0x440] sm:$0xff]  ;;  %v6989_v57 = vld [vmem:[%s13387_s13 + $0x4d0] sm:$0xff] }
0x20e4   :  { %9460 = vmatpush3.bf16.msra.mxu0 %v9459_v8  ;;  %7462 = vmatprep.mubr.f32.mxu0 %v6812_v44  ;;  %v12925_v62 = vadd.f32 %v12813_v26, %v12888_v16  ;;  %9740 = vtanh.f32 %v6683_v3  ;;  %v6699_v25 = vmul.f32 0.7978846, %v6667_v28  ;;  %v9467_v26 = vpack.c.bf16 %v6970_v1, %v6969_v9  ;;  %v6972_v0 = vld [vmem:[%s13387_s13 + $0x448] sm:$0xff]  ;;  %v6995_v24 = vld [vmem:[%s13387_s13 + $0x500] sm:$0xff]  ;;  %v7013_v52 = vld [vmem:[%s13387_s13 + $0x590] sm:$0xff] }
0x20e5   :  { %9462 = vmatprep.subr.bf16.mxu0 %v9461_v27  ;;  %9444 = vmatpush3.bf16.msra.mxu1 %v9443_v19  ;;  %v6762_v32 = vadd.f32 1.0, %v9735_v22  ;;  %v6688_v8 = vmul.f32 0.7978846, %v6656_v55  ;;  %v9469_v42 = vpack.c.bf16 %v6988_v46, %v6987_v11  ;;  %9742 = vtanh.f32 %v6700_v45  ;;  %v6990_v19 = vld [vmem:[%s13387_s13 + $0x4d8] sm:$0xff]  ;;  %v6996_v6 = vld [vmem:[%s13387_s13 + $0x508] sm:$0xff]  ;;  %v6973_v28 = vld [vmem:[%s13387_s13 + $0x450] sm:$0xff] }
0x20e6   :  { %9446 = vmatprep.subr.bf16.mxu1 %v9445_v59  ;;  %v9737_v35 = vpop.eup %9736  ;;  %v6589_v34 = vmul.f32 %v6557_v21, %v12583_v18  ;;  %v6573_v39 = vmul.f32 %v12635_v58, %v12635_v58  ;;  %v9451_v54 = vpack.c.bf16 %v6946_v36, %v6945_v40  ;;  %v9485_v27 = vpack.c.bf16 %v7012_v5, %v7011_v2  ;;  %v7014_v59 = vld [vmem:[%s13387_s13 + $0x598] sm:$0xff]  ;;  %v6992_v9 = vld [vmem:[%s13387_s13 + $0x4e8] sm:$0xff]  ;;  %v6997_v11 = vld [vmem:[%s13387_s13 + $0x510] sm:$0xff] }
0x20e7   :  { %v9739_v60 = vpop.eup %9738  ;;  %v6777_v61 = vmul.f32 0.5, %v6745_v43  ;;  %v6606_v44 = vmul.f32 %v6574_v15, %v12883_v37  ;;  %v6562_v31 = vmul.f32 %v12925_v62, %v12925_v62  ;;  %v6761_v17 = vadd.f32 1.0, %v9737_v35  ;;  %v6998_v46 = vld [vmem:[%s13387_s13 + $0x518] sm:$0xff]  ;;  %v7016_v36 = vld [vmem:[%s13387_s13 + $0x5a8] sm:$0xff]  ;;  %v13448_v2 = vld [vmem:[#allocation13_spill] sm:$0xff] }
0x20e8   :  { %9464 = vmatpush3.bf16.msra.mxu0 %v9463_v7  ;;  %v6794_v14 = vmul.f32 0.5, %v6762_v32  ;;  %v9471_v20 = vpack.c.bf16 %v6972_v0, %v6971_v23  ;;  %v6750_v22 = vadd.f32 1.0, %v9739_v60  ;;  %9744 = vtanh.f32 %v6699_v25  ;;  %v6974_v7 = vld [vmem:[%s13387_s13 + $0x458] sm:$0xff]  ;;  %v6976_v25 = vld [vmem:[%s13387_s13 + $0x468] sm:$0xff] }
0x20e9   :  { %9466 = vmatprep.subr.bf16.mxu0 %v9465_v29  ;;  %9448 = vmatpush3.bf16.msra.mxu1 %v9447_v48  ;;  %v9473_v3 = vpack.c.bf16 %v6990_v19, %v6989_v57  ;;  %9746 = vtanh.f32 %v6688_v8  ;;  %v6621_v53 = vmul.f32 0.044715, %v6589_v34  ;;  %v6605_v49 = vmul.f32 %v6573_v39, %v12635_v58  ;;  %v6991_v29 = vld [vmem:[%s13387_s13 + $0x4e0] sm:$0xff]  ;;  %v13449_v57 = vld [vmem:[#allocation10_spill] sm:$0xff] }
0x20ea   :  { %9450 = vmatprep.subr.bf16.mxu1 %v9449_v51  ;;  %v9487_v45 = vpack.c.bf16 %v6996_v6, %v6995_v24  ;;  %v9489_v55 = vpack.c.bf16 %v7014_v59, %v7013_v52  ;;  %v6809_v1 = vmul.f32 %v6777_v61, %v12459_v10  ;;  %v6638_v21 = vmul.f32 0.044715, %v6606_v44  ;;  %v7015_v10 = vld [vmem:[%s13387_s13 + $0x5a0] sm:$0xff]  ;;  %v7000_v24 = vld [vmem:[%s13387_s13 + $0x528] sm:$0xff]  ;;  %v13031_v6 = vld [vmem:[%s13387_s13 + $0x530] sm:$0xff] }
0x20eb   :  { %v6594_v48 = vmul.f32 %v6562_v31, %v12925_v62  ;;  %v6793_v40 = vmul.f32 0.5, %v6761_v17  ;;  %v6826_v43 = vmul.f32 %v6794_v14, %v12524_v56  ;;  %v6782_v15 = vmul.f32 0.5, %v6750_v22  ;;  %v6975_v56 = vld [vmem:[%s13387_s13 + $0x460] sm:$0xff]  ;;  %v7018_v31 = vld [vmem:[%s13387_s13 + $0x5b8] sm:$0xff]  ;;  %v6977_v14 = vld [vmem:[%s13387_s13 + $0x470] sm:$0xff] }
0x20ec   :  { %9468 = vmatpush3.bf16.msra.mxu0 %v9467_v26  ;;  %v9475_v51 = vpack.c.bf16 %v6974_v7, %v6973_v28  ;;  %v12996_v5 = vadd.f32 %v13448_v2, %v12436_v47  ;;  %v9477_v35 = vpack.c.bf16 %v6992_v9, %v6991_v29  ;;  %v6653_v32 = vadd.f32 %v6621_v53, %v12583_v18  ;;  %v6993_v47 = vld [vmem:[%s13387_s13 + $0x4f0] sm:$0xff]  ;;  %v7002_v59 = vld [vmem:[%s13387_s13 + $0x538] sm:$0xff]  ;;  %v7043_v53 = vld [vmem:[%s13387_s13 + $0x680] sm:$0xff] }
0x20ed   :  { %9470 = vmatprep.subr.bf16.mxu0 %v9469_v42  ;;  %9452 = vmatpush3.bf16.msra.mxu1 %v9451_v54  ;;  %v6637_v60 = vmul.f32 0.044715, %v6605_v49  ;;  %v9491_v8 = vpack.c.bf16 %v6998_v46, %v6997_v11  ;;  %v6994_v42 = vld [vmem:[%s13387_s13 + $0x4f8] sm:$0xff]  ;;  %v6670_v0 = vadd.f32 %v6638_v21, %v12883_v37  ;;  %v6626_v34 = vmul.f32 0.044715, %v6594_v48  ;;  %v7044_v49 = vld [vmem:[%s13387_s13 + $0x688] sm:$0xff] }
0x20ee   :  { %9486 = vmatprep.subr.bf16.mxu1 %v9485_v27  ;;  %v9741_v26 = vpop.eup %9740  ;;  %v6825_v39 = vmul.f32 %v6793_v40, %v12546_v12  ;;  %v9493_v54 = vpack.c.bf16 %v7016_v36, %v7015_v10  ;;  %v6999_v27 = vld [vmem:[%s13387_s13 + $0x520] sm:$0xff]  ;;  %v6559_v19 = vmul.f32 %v13449_v57, %v13449_v57  ;;  %v6814_v61 = vmul.f32 %v6782_v15, %v12588_v63  ;;  %v7017_v12 = vld [vmem:[%s13387_s13 + $0x5b0] sm:$0xff]  ;;  %v13450_v48 = vld [vmem:[#allocation12_spill] sm:$0xff] }
0x20ef   :  { %v9743_v23 = vpop.eup %9742  ;;  %v9479_v44 = vpack.c.bf16 %v6976_v25, %v6975_v56  ;;  %v6747_v17 = vadd.f32 1.0, %v9741_v26  ;;  %v6576_v52 = vmul.f32 %v12996_v5, %v12996_v5  ;;  %v9481_v63 = vpack.c.bf16 %v6994_v42, %v6993_v47  ;;  %v7020_v15 = vld [vmem:[%s13387_s13 + $0x5c8] sm:$0xff]  ;;  %v7027_v2 = vld [vmem:[%s13387_s13 + $0x600] sm:$0xff] }
0x20f0   :  { %9472 = vmatpush3.bf16.msra.mxu0 %v9471_v20  ;;  %7388 = vmatmul.mubr.f32.vlgmr.msra.gmra.mrb[106].mxu1 %v6809_v1  ;;  %v6978_v20 = vld [vmem:[%s13387_s13 + $0x478] sm:$0xff]  ;;  %v6669_v28 = vadd.f32 %v6637_v60, %v12635_v58  ;;  %v9495_v7 = vpack.c.bf16 %v7000_v24, %v6999_v27  ;;  %v6702_v29 = vmul.f32 0.7978846, %v6670_v0  ;;  %v6658_v9 = vadd.f32 %v6626_v34, %v12925_v62  ;;  %v7004_v0 = vld [vmem:[%s13387_s13 + $0x548] sm:$0xff]  ;;  %v7021_v27 = vld [vmem:[%s13387_s13 + $0x5d0] sm:$0xff] }
0x20f1   :  { %9474 = vmatprep.subr.bf16.mxu0 %v9473_v3  ;;  %7392 = vmatprep.mubr.f32.mxu1 %v6826_v43  ;;  %v6685_v3 = vmul.f32 0.7978846, %v6653_v32  ;;  %v9497_v1 = vpack.c.bf16 %v7018_v31, %v7017_v12  ;;  %v6591_v21 = vmul.f32 %v6559_v19, %v13449_v57  ;;  %v6575_v40 = vmul.f32 %v13450_v48, %v13450_v48  ;;  %v7019_v43 = vld [vmem:[%s13387_s13 + $0x5c0] sm:$0xff]  ;;  %v7045_v32 = vld [vmem:[%s13387_s13 + $0x690] sm:$0xff]  ;;  %v7046_v60 = vld [vmem:[%s13387_s13 + $0x698] sm:$0xff] }
0x20f2   :  { %9488 = vmatpush3.bf16.msra.mxu1 %v9487_v45  ;;  %v9745_v22 = vpop.eup %9744  ;;  %v6764_v45 = vadd.f32 1.0, %v9743_v23  ;;  %v9499_v11 = vpack.c.bf16 %v7002_v59, %v13031_v6  ;;  %v9483_v46 = vpack.c.bf16 %v6978_v20, %v6977_v14  ;;  %v6608_v10 = vmul.f32 %v6576_v52, %v12996_v5  ;;  %v7003_v23 = vld [vmem:[%s13387_s13 + $0x540] sm:$0xff]  ;;  %v7022_v24 = vld [vmem:[%s13387_s13 + $0x5d8] sm:$0xff]  ;;  %v7029_v31 = vld [vmem:[%s13387_s13 + $0x610] sm:$0xff] }
0x20f3   :  { %9490 = vmatprep.subr.bf16.mxu1 %v9489_v55  ;;  %v9747_v55 = vpop.eup %9746  ;;  %v9517_v36 = vpack.c.bf16 %v7044_v49, %v7043_v53  ;;  %v6763_v56 = vadd.f32 1.0, %v9745_v22  ;;  %9748 = vtanh.f32 %v6685_v3  ;;  %v6701_v25 = vmul.f32 0.7978846, %v6669_v28  ;;  %v7030_v6 = vld [vmem:[%s13387_s13 + $0x618] sm:$0xff]  ;;  %v7048_v59 = vld [vmem:[%s13387_s13 + $0x6a8] sm:$0xff]  ;;  %v7005_v20 = vld [vmem:[%s13387_s13 + $0x550] sm:$0xff] }
0x20f4   :  { %9476 = vmatpush3.bf16.msra.mxu0 %v9475_v51  ;;  %7393 = vmatmul.mubr.f32.gmra.mrb[108].mxu1 %v6825_v39  ;;  %v6779_v51 = vmul.f32 0.5, %v6747_v17  ;;  %v6796_v26 = vmul.f32 0.5, %v6764_v45  ;;  %v6690_v47 = vmul.f32 0.7978846, %v6658_v9  ;;  %v9501_v42 = vpack.c.bf16 %v7020_v15, %v7019_v43  ;;  %v7024_v53 = vld [vmem:[%s13387_s13 + $0x5e8] sm:$0xff]  ;;  %v7007_v43 = vld [vmem:[%s13387_s13 + $0x560] sm:$0xff] }
0x20f5   :  { %9478 = vmatprep.subr.bf16.mxu0 %v9477_v35  ;;  %7537 = vmatprep.mubr.f32.mxu1 %v6814_v61  ;;  %v7028_v35 = vld [vmem:[%s13387_s13 + $0x608] sm:$0xff]  ;;  %9750 = vtanh.f32 %v6702_v29  ;;  %v6623_v34 = vmul.f32 0.044715, %v6591_v21  ;;  %v6607_v39 = vmul.f32 %v6575_v40, %v13450_v48  ;;  %v6640_v61 = vmul.f32 0.044715, %v6608_v10  ;;  %v7031_v29 = vld [vmem:[%s13387_s13 + $0x620] sm:$0xff] }
0x20f6   :  { %9492 = vmatpush3.bf16.msra.mxu1 %v9491_v8  ;;  %v6752_v8 = vadd.f32 1.0, %v9747_v55  ;;  %v6811_v19 = vmul.f32 %v6779_v51, %v12651_v13  ;;  %v9521_v12 = vpack.c.bf16 %v7046_v60, %v7045_v32  ;;  %v9503_v17 = vpack.c.bf16 %v7004_v0, %v7003_v23  ;;  %v7047_v13 = vld [vmem:[%s13387_s13 + $0x6a0] sm:$0xff]  ;;  %v7032_v9 = vld [vmem:[%s13387_s13 + $0x628] sm:$0xff]  ;;  %v7049_v40 = vld [vmem:[%s13387_s13 + $0x6b0] sm:$0xff] }
0x20f7   :  { %9494 = vmatprep.subr.bf16.mxu1 %v9493_v54  ;;  %v9519_v54 = vpack.c.bf16 %v7028_v35, %v7027_v2  ;;  %v6828_v52 = vmul.f32 %v6796_v26, %v12673_v50  ;;  %9752 = vtanh.f32 %v6701_v25  ;;  %v9505_v14 = vpack.c.bf16 %v7022_v24, %v7021_v27  ;;  %v7006_v50 = vld [vmem:[%s13387_s13 + $0x558] sm:$0xff]  ;;  %v7033_v25 = vld [vmem:[%s13387_s13 + $0x630] sm:$0xff] }
0x20f8   :  { %9480 = vmatpush3.bf16.msra.mxu0 %v9479_v44  ;;  %v6795_v44 = vmul.f32 0.5, %v6763_v56  ;;  %9754 = vtanh.f32 %v6690_v47  ;;  %v6655_v22 = vadd.f32 %v6623_v34, %v13449_v57  ;;  %v6639_v3 = vmul.f32 0.044715, %v6607_v39  ;;  %v7034_v26 = vld [vmem:[%s13387_s13 + $0x638] sm:$0xff]  ;;  %v7052_v47 = vld [vmem:[%s13387_s13 + $0x6c8] sm:$0xff]  ;;  %v7009_v34 = vld [vmem:[%s13387_s13 + $0x570] sm:$0xff] }
0x20f9   :  { %9482 = vmatprep.subr.bf16.mxu0 %v9481_v63  ;;  %v6784_v63 = vmul.f32 0.5, %v6752_v8  ;;  %v9523_v28 = vpack.c.bf16 %v7030_v6, %v7029_v31  ;;  %v6672_v49 = vadd.f32 %v6640_v61, %v12996_v5  ;;  %v9525_v55 = vpack.c.bf16 %v7048_v59, %v7047_v13  ;;  %v7051_v8 = vld [vmem:[%s13387_s13 + $0x6c0] sm:$0xff]  ;;  %v7010_v39 = vld [vmem:[%s13387_s13 + $0x578] sm:$0xff]  ;;  %v7076_v61 = vld [vmem:[%s13387_s13 + $0x788] sm:$0xff] }
0x20fa   :  { %9496 = vmatpush3.bf16.msra.mxu1 %v9495_v7  ;;  %v7023_v7 = vld [vmem:[%s13387_s13 + $0x5e0] sm:$0xff]  ;;  %v6827_v45 = vmul.f32 %v6795_v44, %v12750_v33  ;;  %v7050_v33 = vld [vmem:[%s13387_s13 + $0x6b8] sm:$0xff]  ;;  %v6687_v51 = vmul.f32 0.7978846, %v6655_v22  ;;  %v6671_v10 = vadd.f32 %v6639_v3, %v13450_v48  ;;  %v6561_v32 = vmul.f32 %v12811_v4, %v12811_v4  ;;  %v7053_v59 = vld [vmem:[%s13387_s13 + $0x6d0] sm:$0xff] }
0x20fb   :  { %9498 = vmatprep.subr.bf16.mxu1 %v9497_v1  ;;  %v9507_v1 = vpack.c.bf16 %v7006_v50, %v7005_v20  ;;  %v6816_v21 = vmul.f32 %v6784_v63, %v12776_v38  ;;  %v7008_v38 = vld [vmem:[%s13387_s13 + $0x568] sm:$0xff]  ;;  %v6704_v35 = vmul.f32 0.7978846, %v6672_v49  ;;  %v9529_v56 = vpack.c.bf16 %v7050_v33, %v7049_v40  ;;  %v7035_v6 = vld [vmem:[%s13387_s13 + $0x640] sm:$0xff] }
0x20fc   :  { %9484 = vmatpush3.bf16.msra.mxu0 %v9483_v46  ;;  %v9509_v46 = vpack.c.bf16 %v7024_v53, %v7023_v7  ;;  %v9511_v60 = vpack.c.bf16 %v7008_v38, %v7007_v43  ;;  %9756 = vtanh.f32 %v6687_v51  ;;  %v6703_v27 = vmul.f32 0.7978846, %v6671_v10  ;;  %v7059_v3 = vld [vmem:[%s13387_s13 + $0x700] sm:$0xff]  ;;  %v7056_v38 = vld [vmem:[%s13387_s13 + $0x6e8] sm:$0xff] }
0x20fd   :  { %9518 = vmatprep.subr.bf16.mxu0 %v9517_v36  ;;  %v9749_v15 = vpop.eup %9748  ;;  %v9527_v36 = vpack.c.bf16 %v7032_v9, %v7031_v29  ;;  %v9531_v24 = vpack.c.bf16 %v7034_v26, %v7033_v25  ;;  %v9533_v31 = vpack.c.bf16 %v7052_v47, %v7051_v8  ;;  %9758 = vtanh.f32 %v6704_v35  ;;  %v7055_v43 = vld [vmem:[%s13387_s13 + $0x6e0] sm:$0xff]  ;;  %v7080_v25 = vld [vmem:[%s13387_s13 + $0x7a8] sm:$0xff] }
0x20fe   :  { %9500 = vmatpush3.bf16.msra.mxu1 %v9499_v11  ;;  %v13132_v11 = vadd.f32 %v12836_v30, %v12888_v16  ;;  %v7025_v30 = vld [vmem:[%s13387_s13 + $0x5f0] sm:$0xff]  ;;  %v7026_v16 = vld [vmem:[%s13387_s13 + $0x5f8] sm:$0xff]  ;;  %v6577_v63 = vmul.f32 %v12834_v41, %v12834_v41  ;;  %v9515_v13 = vpack.c.bf16 %v7010_v39, %v7009_v34  ;;  %9760 = vtanh.f32 %v6703_v27 }
0x20ff   :  { %9502 = vmatprep.subr.bf16.mxu1 %v9501_v42  ;;  %7463 = vmatmul.mubr.f32.vlgmr.msra.gmra.mrb[94].mxu0 %v6811_v19  ;;  %v9751_v2 = vpop.eup %9750  ;;  %v6749_v42 = vadd.f32 1.0, %v9749_v15  ;;  %v9513_v0 = vpack.c.bf16 %v7026_v16, %v7025_v30  ;;  %v7075_v19 = vld [vmem:[%s13387_s13 + $0x780] sm:$0xff]  ;;  %v7061_v30 = vld [vmem:[%s13387_s13 + $0x710] sm:$0xff]  ;;  %v7062_v16 = vld [vmem:[%s13387_s13 + $0x718] sm:$0xff]  ;;  %v9541_v26 = vpack.c.bf16 %v7056_v38, %v7055_v43 }
0x2100   :  { %7467 = vmatprep.mubr.f32.mxu0 %v6828_v52  ;;  %9520 = vmatpush3.bf16.msra.mxu0 %v9519_v54  ;;  %v6578_v23 = vmul.f32 %v13132_v11, %v13132_v11  ;;  %v6766_v44 = vadd.f32 1.0, %v9751_v2  ;;  %v6593_v52 = vmul.f32 %v6561_v32, %v12811_v4  ;;  %v9549_v22 = vpack.c.bf16 %v7076_v61, %v7075_v19  ;;  %v7039_v32 = vld [vmem:[%s13387_s13 + $0x660] sm:$0xff]  ;;  %v7064_v19 = vld [vmem:[%s13387_s13 + $0x728] sm:$0xff] }
0x2101   :  { %9522 = vmatprep.subr.bf16.mxu0 %v9521_v12  ;;  %v9753_v54 = vpop.eup %9752  ;;  %v6781_v20 = vmul.f32 0.5, %v6749_v42  ;;  %v6609_v33 = vmul.f32 %v6577_v63, %v12834_v41  ;;  %v9555_v42 = vpack.c.bf16 %v7062_v16, %v7061_v30  ;;  %v7070_v30 = vld [vmem:[%s13387_s13 + $0x758] sm:$0xff] }
0x2102   :  { %9504 = vmatpush3.bf16.msra.mxu1 %v9503_v17  ;;  %v9755_v12 = vpop.eup %9754  ;;  %v7036_v17 = vld [vmem:[%s13387_s13 + $0x648] sm:$0xff]  ;;  %v6610_v50 = vmul.f32 %v6578_v23, %v13132_v11  ;;  %v6765_v7 = vadd.f32 1.0, %v9753_v54  ;;  %v6798_v53 = vmul.f32 0.5, %v6766_v44  ;;  %v6625_v40 = vmul.f32 0.044715, %v6593_v52  ;;  %v7057_v23 = vld [vmem:[%s13387_s13 + $0x6f0] sm:$0xff] }
0x2103   :  { %9506 = vmatprep.subr.bf16.mxu1 %v9505_v14  ;;  %7468 = vmatmul.mubr.f32.gmra.mrb[96].mxu0 %v6827_v45  ;;  %v7054_v14 = vld [vmem:[%s13387_s13 + $0x6d8] sm:$0xff]  ;;  %v9535_v49 = vpack.c.bf16 %v7036_v17, %v7035_v6  ;;  %v7077_v45 = vld [vmem:[%s13387_s13 + $0x790] sm:$0xff]  ;;  %v6754_v29 = vadd.f32 1.0, %v9755_v12  ;;  %v6813_v15 = vmul.f32 %v6781_v20, %v12583_v18  ;;  %v7079_v18 = vld [vmem:[%s13387_s13 + $0x7a0] sm:$0xff]  ;;  %v6641_v47 = vmul.f32 0.044715, %v6609_v33 }
0x2104   :  { %9524 = vmatpush3.bf16.msra.mxu0 %v9523_v28  ;;  %7612 = vmatprep.mubr.f32.mxu0 %v6816_v21  ;;  %v7060_v28 = vld [vmem:[%s13387_s13 + $0x708] sm:$0xff]  ;;  %v9537_v9 = vpack.c.bf16 %v7054_v14, %v7053_v59  ;;  %v7038_v21 = vld [vmem:[%s13387_s13 + $0x658] sm:$0xff]  ;;  %v6642_v51 = vmul.f32 0.044715, %v6610_v50  ;;  %v6797_v10 = vmul.f32 0.5, %v6765_v7  ;;  %v6830_v2 = vmul.f32 %v6798_v53, %v12883_v37  ;;  %v7081_v12 = vld [vmem:[%s13387_s13 + $0x7b0] sm:$0xff] }
0x2105   :  { %9526 = vmatprep.subr.bf16.mxu0 %v9525_v55  ;;  %v7078_v55 = vld [vmem:[%s13387_s13 + $0x798] sm:$0xff]  ;;  %v6786_v35 = vmul.f32 0.5, %v6754_v29  ;;  %v7040_v37 = vld [vmem:[%s13387_s13 + $0x668] sm:$0xff]  ;;  %v6657_v8 = vadd.f32 %v6625_v40, %v12811_v4  ;;  %v9557_v27 = vpack.c.bf16 %v7080_v25, %v7079_v18  ;;  %v7041_v17 = vld [vmem:[%s13387_s13 + $0x670] sm:$0xff] }
0x2106   :  { %9508 = vmatpush3.bf16.msra.mxu1 %v9507_v1  ;;  %v7037_v1 = vld [vmem:[%s13387_s13 + $0x650] sm:$0xff]  ;;  %v6674_v39 = vadd.f32 %v6642_v51, %v13132_v11  ;;  %v6829_v54 = vmul.f32 %v6797_v10, %v12635_v58  ;;  %v9543_v44 = vpack.c.bf16 %v7040_v37, %v7039_v32  ;;  %v7082_v58 = vld [vmem:[%s13387_s13 + $0x7b8] sm:$0xff]  ;;  %v7083_v7 = vld [vmem:[%s13387_s13 + $0x7c0] sm:$0xff] }
0x2107   :  { %9510 = vmatprep.subr.bf16.mxu1 %v9509_v46  ;;  %v9551_v46 = vpack.c.bf16 %v7060_v28, %v7059_v3  ;;  %v6818_v61 = vmul.f32 %v6786_v35, %v12925_v62  ;;  %v7042_v62 = vld [vmem:[%s13387_s13 + $0x678] sm:$0xff]  ;;  %v6689_v63 = vmul.f32 0.7978846, %v6657_v8  ;;  %v9561_v50 = vpack.c.bf16 %v7082_v58, %v7081_v12  ;;  %v7084_v53 = vld [vmem:[%s13387_s13 + $0x7c8] sm:$0xff]  ;;  %v7085_v33 = vld [vmem:[%s13387_s13 + $0x7d0] sm:$0xff] }
0x2108   :  { %9528 = vmatpush3.bf16.msra.mxu0 %v9527_v36  ;;  %v9553_v36 = vpack.c.bf16 %v7078_v55, %v7077_v45  ;;  %v6706_v20 = vmul.f32 0.7978846, %v6674_v39  ;;  %v7066_v3 = vld [vmem:[%s13387_s13 + $0x738] sm:$0xff]  ;;  %v9547_v28 = vpack.c.bf16 %v7042_v62, %v7041_v17  ;;  %v7068_v40 = vld [vmem:[%s13387_s13 + $0x748] sm:$0xff]  ;;  %v7958_v17 = vld [vmem:[%s13389_s14] ss:$0 sm:$0xff] }
0x2109   :  { %9530 = vmatprep.subr.bf16.mxu0 %v9529_v56  ;;  %v9539_v56 = vpack.c.bf16 %v7038_v21, %v7037_v1  ;;  %9762 = vtanh.f32 %v6689_v63  ;;  %v9565_v1 = vpack.c.bf16 %v7084_v53, %v7083_v7  ;;  %v7067_v21 = vld [vmem:[%s13387_s13 + $0x740] sm:$0xff]  ;;  %v7072_v18 = vld [vmem:[%s13387_s13 + $0x768] sm:$0xff] }
0x210a   :  { %9512 = vmatpush3.bf16.msra.mxu1 %v9511_v60  ;;  %v9757_v60 = vpop.eup %9756  ;;  %9764 = vtanh.f32 %v6706_v20 }
0x210b   :  { %9514 = vmatprep.subr.bf16.mxu1 %v9513_v0  ;;  %v7058_v0 = vld [vmem:[%s13387_s13 + $0x6f8] sm:$0xff]  ;;  %v9759_v34 = vpop.eup %9758 }
0x210c   :  { %9532 = vmatpush3.bf16.msra.mxu0 %v9531_v24  ;;  %v7063_v24 = vld [vmem:[%s13387_s13 + $0x720] sm:$0xff]  ;;  %v9545_v6 = vpack.c.bf16 %v7058_v0, %v7057_v23  ;;  %v9761_v52 = vpop.eup %9760  ;;  %v6768_v14 = vadd.f32 1.0, %v9759_v34 }
0x210d   :  { %9534 = vmatprep.subr.bf16.mxu0 %v9533_v31  ;;  %v6751_v31 = vadd.f32 1.0, %v9757_v60  ;;  %v9559_v59 = vpack.c.bf16 %v7064_v19, %v7063_v24  ;;  %v6767_v45 = vadd.f32 1.0, %v9761_v52 }
0x210e   :  { %9516 = vmatpush3.bf16.msra.mxu1 %v9515_v13  ;;  %v6673_v13 = vadd.f32 %v6641_v47, %v12834_v41  ;;  %v7073_v47 = vld [vmem:[%s13387_s13 + $0x770] sm:$0xff] }
0x210f   :  { %9550 = vmatprep.subr.bf16.mxu1 %v9549_v22  ;;  %v7065_v22 = vld [vmem:[%s13387_s13 + $0x730] sm:$0xff]  ;;  %v6799_v38 = vmul.f32 0.5, %v6767_v45 }
0x2110   :  { %9536 = vmatpush3.bf16.msra.mxu0 %v9535_v49  ;;  %v6783_v49 = vmul.f32 0.5, %v6751_v31  ;;  %v6705_v55 = vmul.f32 0.7978846, %v6673_v13  ;;  %v9563_v29 = vpack.c.bf16 %v7066_v3, %v7065_v22 }
0x2111   :  { %7538 = vmatmul.mubr.f32.vlgmr.msra.gmra.mrb[110].mxu1 %v6813_v15  ;;  %9538 = vmatprep.subr.bf16.mxu0 %v9537_v9  ;;  %v6800_v9 = vmul.f32 0.5, %v6768_v14  ;;  %v9567_v15 = vpack.c.bf16 %v7068_v40, %v7067_v21  ;;  %v6831_v16 = vmul.f32 %v6799_v38, %v13450_v48  ;;  %v7090_v48 = vld [vmem:[%s13387_s13 + $0x7f8] sm:$0xff] }
0x2112   :  { %7542 = vmatprep.mubr.f32.mxu1 %v6830_v2  ;;  %9552 = vmatpush3.bf16.msra.mxu1 %v9551_v46  ;;  %v7086_v46 = vld [vmem:[%s13387_s13 + $0x7d8] sm:$0xff]  ;;  %v6815_v43 = vmul.f32 %v6783_v49, %v13449_v57  ;;  %9766 = vtanh.f32 %v6705_v55  ;;  %v7087_v57 = vld [vmem:[%s13387_s13 + $0x7e0] sm:$0xff] }
0x2113   :  { %9554 = vmatprep.subr.bf16.mxu1 %v9553_v36  ;;  %v6832_v51 = vmul.f32 %v6800_v9, %v12996_v5  ;;  %v9569_v10 = vpack.c.bf16 %v7086_v46, %v7085_v33  ;;  %v7069_v36 = vld [vmem:[%s13387_s13 + $0x750] sm:$0xff]  ;;  %v7088_v5 = vld [vmem:[%s13387_s13 + $0x7e8] sm:$0xff]  ;;  %v9763_v25 = vpop.eup %9762 }
0x2114   :  { %9540 = vmatpush3.bf16.msra.mxu0 %v9539_v56  ;;  %v9571_v2 = vpack.c.bf16 %v7070_v30, %v7069_v36  ;;  %v9573_v35 = vpack.c.bf16 %v7088_v5, %v7087_v57  ;;  %v7071_v56 = vld [vmem:[%s13387_s13 + $0x760] sm:$0xff]  ;;  %v9765_v32 = vpop.eup %9764  ;;  %v6753_v60 = vadd.f32 1.0, %v9763_v25 }
0x2115   :  { %7543 = vmatmul.mubr.f32.gmra.mrb[112].mxu1 %v6829_v54  ;;  %9542 = vmatprep.subr.bf16.mxu0 %v9541_v26  ;;  %v7089_v26 = vld [vmem:[%s13387_s13 + $0x7f0] sm:$0xff]  ;;  %v9575_v37 = vpack.c.bf16 %v7072_v18, %v7071_v56  ;;  %v6770_v0 = vadd.f32 1.0, %v9765_v32 }
0x2116   :  { %9556 = vmatpush3.bf16.msra.mxu1 %v9555_v42  ;;  %7687 = vmatprep.mubr.f32.mxu1 %v6818_v61  ;;  %v9577_v8 = vpack.c.bf16 %v7090_v48, %v7089_v26  ;;  %v7074_v42 = vld [vmem:[%s13387_s13 + $0x778] sm:$0xff]  ;;  %v6785_v39 = vmul.f32 0.5, %v6753_v60 }
0x2117   :  { %9558 = vmatprep.subr.bf16.mxu1 %v9557_v27  ;;  %v9579_v34 = vpack.c.bf16 %v7074_v42, %v7073_v47  ;;  %v6802_v27 = vmul.f32 0.5, %v6770_v0 }
0x2118   :  { %9544 = vmatpush3.bf16.msra.mxu0 %v9543_v44  ;;  %v6817_v24 = vmul.f32 %v6785_v39, %v12811_v4 }
0x2119   :  { %9546 = vmatprep.subr.bf16.mxu0 %v9545_v6  ;;  %v6834_v61 = vmul.f32 %v6802_v27, %v13132_v11 }
0x211a   :  { %9560 = vmatpush3.bf16.msra.mxu1 %v9559_v59 }
0x211b   :  { %9562 = vmatprep.subr.bf16.mxu1 %v9561_v50 }
0x211c   :  { %9548 = vmatpush3.bf16.msra.mxu0 %v9547_v28  ;;  %v9767_v23 = vpop.eup %9766 }
0x211d   :  { %v6769_v54 = vadd.f32 1.0, %v9767_v23 }
0x211e   :  { %9564 = vmatpush3.bf16.msra.mxu1 %v9563_v29 }
0x211f   :  { %9566 = vmatprep.subr.bf16.mxu1 %v9565_v1  ;;  %7613 = vmatmul.mubr.f32.vlgmr.msra.gmra.mrb[98].mxu0 %v6815_v43  ;;  %v6801_v19 = vmul.f32 0.5, %v6769_v54 }
0x2120   :  { %7617 = vmatprep.mubr.f32.mxu0 %v6832_v51 }
0x2121   :  { %v6833_v44 = vmul.f32 %v6801_v19, %v12834_v41 }
0x2122   :  { %9568 = vmatpush3.bf16.msra.mxu1 %v9567_v15 }
0x2123   :  { %9570 = vmatprep.subr.bf16.mxu1 %v9569_v10  ;;  %7618 = vmatmul.mubr.f32.gmra.mrb[100].mxu0 %v6831_v16 }
0x2126   :  { %9572 = vmatpush3.bf16.msra.mxu1 %v9571_v2 }
0x2127   :  { %9574 = vmatprep.subr.bf16.mxu1 %v9573_v35 }
0x212a   :  { %9576 = vmatpush3.bf16.msra.mxu1 %v9575_v37 }
0x212b   :  { %9578 = vmatprep.subr.bf16.mxu1 %v9577_v8 }
0x212e   :  { %9580 = vmatpush3.bf16.msra.mxu1 %v9579_v34 }
0x2131   :  { %7688 = vmatmul.mubr.f32.vlgmr.msra.gmra.mrb[114].mxu1 %v6817_v24 }
0x2132   :  { %7692 = vmatprep.mubr.f32.mxu1 %v6834_v61 }
0x2135   :  { %7693 = vmatmul.mubr.f32.gmra.mrb[116].mxu1 %v6833_v44 }
0x218e   :  { %v8320_v12 = vpop.f32.mrb[86].mxu0 }
0x218f   :  { %v8321_v58 = vpop.f32.mrb[87].mxu0 }
0x2190   :  { %v8322_v31 = vadd.f32 %v8321_v58, %v8320_v12  ;;  %v13451_v12 = vld [vmem:[#allocation3_spill] sm:$0xff] }
0x2192   :  { %v7165_v13 = vadd.f32 %v8322_v31, %v7958_v17 }
0x21a0   :  { %v8358_v63 = vpop.f32.mrb[102].mxu1 }
0x21a1   :  { %v8323_v6 = vpop.f32.mrb[88].mxu0  ;;  %v8359_v4 = vpop.f32.mrb[103].mxu1 }
0x21a2   :  { %v8324_v62 = vpop.f32.mrb[89].mxu0  ;;  %v8360_v59 = vadd.f32 %v8359_v4, %v8358_v63 }
0x21a3   :  { %v8325_v52 = vadd.f32 %v8324_v62, %v8323_v6 }
0x21a4   :  { %v7240_v11 = vadd.f32 %v8360_v59, %v7165_v13 }
0x21a5   :  { %v7170_v50 = vadd.f32 %v8325_v52, %v7958_v17  ;;  %v13452_v17 = vld [vmem:[#allocation4_spill] sm:$0xff] }
0x21af   :  { %v8361_v14 = vpop.f32.mrb[104].mxu1 }
0x21b0   :  { %v8362_v20 = vpop.f32.mrb[105].mxu1 }
0x21b1   :  { %v8363_v41 = vadd.f32 %v8362_v20, %v8361_v14 }
0x21b2   :  { %v8396_v22 = vpop.f32.mrb[90].mxu0 }
0x21b3   :  { %v8397_v3 = vpop.f32.mrb[91].mxu0  ;;  %v7245_v28 = vadd.f32 %v8363_v41, %v7170_v50 }
0x21b4   :  { %v8398_v7 = vadd.f32 %v8397_v3, %v8396_v22  ;;  %v7744_v3 = vld [vmem:[%s13390_s17] sm:$0xff] }
0x21b6   :  { %v7315_v53 = vadd.f32 %v8398_v7, %v7240_v11  ;;  %v8399_v49 = vpop.f32.mrb[92].mxu0  ;;  %v7746_v7 = vld [vmem:[%s13390_s17 + $0x10] sm:$0xff] }
0x21b7   :  { %v8400_v45 = vpop.f32.mrb[93].mxu0 }
0x21b8   :  { %v8401_v55 = vadd.f32 %v8400_v45, %v8399_v49  ;;  %v7747_v49 = vld [vmem:[%s13390_s17 + $0x18] sm:$0xff] }
0x21b9   :  { %v9585_v45 = vpack.c.bf16 %v7747_v49, %v7746_v7 }
0x21ba   :  { %v7320_v29 = vadd.f32 %v8401_v55, %v7245_v28  ;;  %v7745_v28 = vld [vmem:[%s13390_s17 + $0x8] sm:$0xff]  ;;  %v7748_v55 = vld [vmem:[%s13390_s17 + $0x20] sm:$0xff] }
0x21c3   :  { %v8434_v9 = vpop.f32.mrb[106].mxu1 }
0x21c4   :  { %v8435_v1 = vpop.f32.mrb[107].mxu1 }
0x21c5   :  { %v8436_v21 = vadd.f32 %v8435_v1, %v8434_v9  ;;  %v7750_v1 = vld [vmem:[%s13390_s17 + $0x30] sm:$0xff] }
0x21c7   :  { %v7390_v40 = vadd.f32 %v8436_v21, %v7315_v53  ;;  %v8437_v33 = vpop.f32.mrb[108].mxu1  ;;  %v9581_v53 = vpack.c.bf16 %v7745_v28, %v7744_v3  ;;  %v7751_v21 = vld [vmem:[%s13390_s17 + $0x38] sm:$0xff] }
0x21c8   :  { %v8438_v46 = vpop.f32.mrb[109].mxu1 }
0x21c9   :  { %v8439_v43 = vadd.f32 %v8438_v46, %v8437_v33  ;;  %9582 = vmatprep.subr.bf16.mxu0 %v9581_v53 }
0x21ca   :  { %9584 = vmatpush3.bf16.msra.mxu0 %v9581_v53 }
0x21cb   :  { %v7395_v38 = vadd.f32 %v8439_v43, %v7320_v29  ;;  %v7749_v29 = vld [vmem:[%s13390_s17 + $0x28] sm:$0xff]  ;;  %9586 = vmatprep.subr.bf16.mxu0 %v9585_v45 }
0x21cc   :  { %v9589_v9 = vpack.c.bf16 %v7749_v29, %v7748_v55 }
0x21ce   :  { %9588 = vmatpush3.bf16.msra.mxu0 %v9585_v45 }
0x21cf   :  { %9590 = vmatprep.subr.bf16.mxu0 %v9589_v9 }
0x21d2   :  { %v8472_v15 = vpop.f32.mrb[94].mxu0  ;;  %9592 = vmatpush3.bf16.msra.mxu0 %v9589_v9 }
0x21d3   :  { %v8473_v51 = vpop.f32.mrb[95].mxu0 }
0x21d4   :  { %v8474_v10 = vadd.f32 %v8473_v51, %v8472_v15 }
0x21d6   :  { %v7465_v36 = vadd.f32 %v8474_v10, %v7390_v40  ;;  %v8475_v30 = vpop.f32.mrb[96].mxu0  ;;  %v9593_v40 = vpack.c.bf16 %v7751_v21, %v7750_v1 }
0x21d7   :  { %v8476_v57 = vpop.f32.mrb[97].mxu0 }
0x21d8   :  { %v8477_v5 = vadd.f32 %v8476_v57, %v8475_v30  ;;  %9594 = vmatprep.subr.bf16.mxu0 %v9593_v40  ;;  %v7960_v57 = vld [vmem:[%s13392_s16] ss:$0 sm:$0xff] }
0x21d9   :  { %9596 = vmatpush3.bf16.msra.mxu0 %v9593_v40 }
0x21da   :  { %v7470_v16 = vadd.f32 %v8477_v5, %v7395_v38 }
0x21e4   :  { %v8510_v2 = vpop.f32.mrb[110].mxu1 }
0x21e5   :  { %v8511_v35 = vpop.f32.mrb[111].mxu1 }
0x21e6   :  { %v8512_v56 = vadd.f32 %v8511_v35, %v8510_v2 }
0x21e8   :  { %v7540_v18 = vadd.f32 %v8512_v56, %v7465_v36  ;;  %v8513_v25 = vpop.f32.mrb[112].mxu1  ;;  %v7959_v36 = vld [vmem:[%s13391_s15] ss:$0 sm:$0xff] }
0x21e9   :  { %v8514_v26 = vpop.f32.mrb[113].mxu1 }
0x21ea   :  { %v8515_v48 = vadd.f32 %v8514_v26, %v8513_v25  ;;  %v7961_v25 = vld [vmem:[%s13393_s18] ss:$0 sm:$0xff] }
0x21ec   :  { %v7545_v32 = vadd.f32 %v8515_v48, %v7470_v16 }
0x21f2   :  { %v8548_v37 = vpop.f32.mrb[98].mxu0 }
0x21f3   :  { %v8549_v60 = vpop.f32.mrb[99].mxu0 }
0x21f4   :  { %v8550_v8 = vadd.f32 %v8549_v60, %v8548_v37 }
0x21f6   :  { %v7615_v47 = vadd.f32 %v8550_v8, %v7540_v18  ;;  %v8551_v42 = vpop.f32.mrb[100].mxu0 }
0x21f7   :  { %v8552_v23 = vpop.f32.mrb[101].mxu0 }
0x21f8   :  { %v8553_v0 = vadd.f32 %v8552_v23, %v8551_v42 }
0x21fa   :  { %v7620_v34 = vadd.f32 %v8553_v0, %v7545_v32 }
0x2204   :  { %v8586_v39 = vpop.f32.mrb[114].mxu1 }
0x2205   :  { %v8587_v54 = vpop.f32.mrb[115].mxu1 }
0x2206   :  { %v8588_v27 = vadd.f32 %v8587_v54, %v8586_v39 }
0x2208   :  { %v7690_v24 = vadd.f32 %v8588_v27, %v7615_v47  ;;  %v8589_v19 = vpop.f32.mrb[116].mxu1 }
0x2209   :  { %v8590_v61 = vpop.f32.mrb[117].mxu1 }
0x220a   :  { %v8591_v44 = vadd.f32 %v8590_v61, %v8589_v19  ;;  %v7698_v58 = vadd.f32 %v7690_v24, %v13451_v12 }
0x220c   :  { %v7695_v31 = vadd.f32 %v8591_v44, %v7620_v34  ;;  %v7702_v6 = vsel %vm399_vm0, %v7698_v58, 0.0 }
0x220d   :  { %7703 = vadd.xlane.f32.xlu0 %v7702_v6 }
0x220e   :  { %v7699_v62 = vadd.f32 %v7695_v31, %v13452_v17 }
0x2210   :  { %v7705_v52 = vsel %vm399_vm0, %v7699_v62, 0.0 }
0x2211   :  { %7706 = vadd.xlane.f32.xlu1 %v7705_v52 }
0x229a   :  { %v7704_v63 = vpop.xlane.xlu0 %7703 }
0x229b   :  { %v7708_v4 = vmul.f32 0.015625, %v7704_v63 }
0x229d   :  { %v7710_v13 = vsub.f32 %v7698_v58, %v7708_v4 }
0x229e   :  { %v7707_v59 = vpop.xlane.xlu1 %7706 }
0x229f   :  { %v7709_v11 = vmul.f32 0.015625, %v7707_v59  ;;  %v7712_v14 = vmul.f32 %v7710_v13, %v7710_v13 }
0x22a1   :  { %v7711_v20 = vsub.f32 %v7699_v62, %v7709_v11  ;;  %v7714_v50 = vsel %vm399_vm0, %v7712_v14, 0.0 }
0x22a2   :  { %7715 = vadd.xlane.f32.xlu0 %v7714_v50 }
0x22a3   :  { %v7713_v41 = vmul.f32 %v7711_v20, %v7711_v20 }
0x22a5   :  { %v7717_v22 = vsel %vm399_vm0, %v7713_v41, 0.0 }
0x22a6   :  { %7718 = vadd.xlane.f32.xlu1 %v7717_v22 }
0x232f   :  { %v7716_v33 = vpop.xlane.xlu0 %7715 }
0x2330   :  { %v7720_v46 = vmul.f32 0.015625, %v7716_v33 }
0x2332   :  { %v7722_v43 = vadd.f32 1e-05, %v7720_v46 }
0x2333   :  { %v7719_v38 = vpop.xlane.xlu1 %7718 }
0x2334   :  { %9768 = vrsqrt.f32 %v7722_v43  ;;  %v7721_v15 = vmul.f32 0.015625, %v7719_v38 }
0x2336   :  { %v7723_v51 = vadd.f32 1e-05, %v7721_v15 }
0x2338   :  { %9770 = vrsqrt.f32 %v7723_v51 }
0x233e   :  { %v9769_v10 = vpop.eup %9768 }
0x233f   :  { %v7726_v30 = vmul.f32 %v9769_v10, %v7710_v13 }
0x2341   :  { %v7734_v5 = vmul.f32 %v7959_v36, %v7726_v30 }
0x2342   :  { %v9771_v16 = vpop.eup %9770 }
0x2343   :  { %v7727_v2 = vmul.f32 %v9771_v16, %v7711_v20  ;;  %v7742_v35 = vadd.f32 %v7960_v57, %v7734_v5 }
0x2345   :  { %v7735_v56 = vmul.f32 %v7959_v36, %v7727_v2  ;;  %8858 = vmatprep.mubr.msk.f32.mxu0 %vm399_vm0, %v7742_v35 }
0x2347   :  { %v7743_v18 = vadd.f32 %v7960_v57, %v7735_v56 }
0x2349   :  { %8859 = vmatmul.mubr.msk.f32.vlgmr.msra.gmra.mrb[102].mxu0 %vm399_vm0, %v7743_v18 }
0x241c   :  { %v8860_v26 = vpop.f32.mrb[102].mxu0 }
0x241d   :  { %v7837_v48 = vadd.f32 %v8860_v26, %v7961_v25  ;;  %v7831_v32 = vpop.f32.mrb[103].mxu0 }
0x241e   :  { %v7832_v37 = vadd.f32 %v7961_v25, %v7831_v32 }
0x241f   :  { %7841 = vst [vmem:[%s13394_s19 + $0x8] sm:$0xff] %v7837_v48 }
0x2420   :  { %7840 = vst [vmem:[%s13394_s19] sm:$0xff] %v7832_v37 }

</bundles_post_ra>
